<compile_context>
chip_gen: v7x
topology: tpu7x:2x2x1
jax: 0.10.0
libtpu: 0.0.40
codegen_flags: <defaults>
</compile_context>

<pallas_src>
import functools

import jax
import jax.numpy as jnp
import numpy as np
from jax.experimental import pallas as pl
from jax.experimental.pallas import tpu as pltpu

EPS = 1e-5                       # PyTorch BatchNorm2d default
_VMEM_LIMIT = 32 * 1024 * 1024   # <= physical VMEM on every generation


# --------------------------------------------------------------------------
# Kernel 1: 3x3 "same" conv (shifted-matmul accumulation) + BN partial stats.
# --------------------------------------------------------------------------
def _conv3x3_stats_kernel(xp_ref, w_ref, mask_ref, o_ref, st_ref, *, H, Wp, Cout):
    """One padded image per grid step.

    xp_ref:   ((H+3)*Wp, Cin)  bf16  zero-padded image, row-flattened
    w_ref:    (9, Cin, Cout)   bf16  taps ordered t = kh*3 + kw
    mask_ref: (H*Wp, 1)        f32   1.0 on valid output columns, 0.0 on the
                                     2 padded/wrap-around columns per row
    o_ref:    (H*Wp, Cout)     f32   conv output in padded-width coordinates
    st_ref:   (2, Cout)        f32   [sum, sum_of_squares] over valid pixels
    """
    rows = H * Wp
    acc = jnp.zeros((rows, Cout), jnp.float32)
    # 9 shifted matmuls: out[y*Wp+x] += P[(y+kh)*Wp + (x+kw)] @ W[kh,kw].
    # Wrap-around contamination only lands in the masked (discarded) columns.
    for t in range(9):
        kh, kw = divmod(t, 3)
        lhs = xp_ref[pl.ds(kh * Wp + kw, rows), :]
        acc = acc + jnp.dot(lhs, w_ref[t], preferred_element_type=jnp.float32)

    am = acc * mask_ref[...]                       # zero the garbage columns
    o_ref[...] = am

    s1 = jnp.sum(am, axis=0, keepdims=True)        # (1, Cout)
    s2 = jnp.sum(am * am, axis=0, keepdims=True)   # (1, Cout)
    st_ref[...] = jnp.concatenate([s1, s2], axis=0)


def _conv3x3_batchstats(x_nhwc, w9, compute_dtype=jnp.bfloat16):
    """3x3 same-conv (no bias) + batch statistics.

    x_nhwc: (N, H, W, Cin) f32,  w9: (9, Cin, Cout) f32
    returns conv (N, H, W, Cout) f32, mean (Cout,), biased var (Cout,)
    """
    N, H, W, Cin = x_nhwc.shape
    Cout = w9.shape[-1]
    Wp = W + 2
    Hp = H + 3          # 1 top + 2 bottom pad rows (keeps all slices in-bounds)

    xpad = jnp.pad(x_nhwc, ((0, 0), (1, 2), (1, 1), (0, 0)))
    xpf = xpad.reshape(N, Hp * Wp, Cin).astype(compute_dtype)
    w9c = w9.astype(compute_dtype)

    # valid-column mask in padded-width coordinates (columns >= W are garbage)
    col = np.arange(H * Wp) % Wp
    mask = jnp.asarray((col < W).astype(np.float32)).reshape(H * Wp, 1)

    kern = functools.partial(_conv3x3_stats_kernel, H=H, Wp=Wp, Cout=Cout)
    conv_raw, stats = pl.pallas_call(
        kern,
        out_shape=(
            jax.ShapeDtypeStruct((N, H * Wp, Cout), jnp.float32),
            jax.ShapeDtypeStruct((N, 2, Cout), jnp.float32),
        ),
        grid=(N,),
        in_specs=[
            pl.BlockSpec((None, Hp * Wp, Cin), lambda n: (n, 0, 0)),
            pl.BlockSpec((9, Cin, Cout), lambda n: (0, 0, 0)),
            pl.BlockSpec((H * Wp, 1), lambda n: (0, 0)),
        ],
        out_specs=(
            pl.BlockSpec((None, H * Wp, Cout), lambda n: (n, 0, 0)),
            pl.BlockSpec((None, 2, Cout), lambda n: (n, 0, 0)),
        ),
        compiler_params=pltpu.CompilerParams(
            dimension_semantics=("parallel",),
            vmem_limit_bytes=_VMEM_LIMIT),
    )(xpf, w9c, mask)

    m = N * H * W
    ssum = jnp.sum(stats[:, 0, :], axis=0)
    ssq = jnp.sum(stats[:, 1, :], axis=0)
    mean = ssum / m
    var = jnp.maximum(ssq / m - mean * mean, 0.0)   # biased (population) var

    conv = conv_raw.reshape(N, H, Wp, Cout)[:, :, :W, :]   # drop garbage cols
    return conv, mean, var


# --------------------------------------------------------------------------
# Kernel 2: BatchNorm affine + ReLU, lane-dense (rows, W*Cout) layout.
# --------------------------------------------------------------------------
def _bn_relu_kernel(x_ref, sc_ref, sh_ref, o_ref):
    o_ref[...] = jnp.maximum(x_ref[...] * sc_ref[...] + sh_ref[...], 0.0)


def _row_tile(total, cap=1024):
    if total <= cap:
        return total
    for cand in range(cap, 7, -8):            # multiples of 8 only
        if total % cand == 0:
            return cand
    return total


def _bn_relu(conv, mean, var, gamma, beta):
    N, H, W, Cout = conv.shape
    inv = jax.lax.rsqrt(var + EPS)
    scale = gamma * inv
    shift = beta - mean * scale

    L = W * Cout                                   # lane-dense last dim
    R = N * H
    x2 = conv.reshape(R, L)
    sc = jnp.tile(scale, W).reshape(1, L)          # channel repeats every Cout
    sh = jnp.tile(shift, W).reshape(1, L)

    TR = _row_tile(R)
    y2 = pl.pallas_call(
        _bn_relu_kernel,
        out_shape=jax.ShapeDtypeStruct((R, L), jnp.float32),
        grid=(R // TR,),
        in_specs=[
            pl.BlockSpec((TR, L), lambda i: (i, 0)),
            pl.BlockSpec((1, L), lambda i: (0, 0)),
            pl.BlockSpec((1, L), lambda i: (0, 0)),
        ],
        out_specs=pl.BlockSpec((TR, L), lambda i: (i, 0)),
        compiler_params=pltpu.CompilerParams(
            dimension_semantics=("parallel",),
            vmem_limit_bytes=_VMEM_LIMIT),
    )(x2, sc, sh)
    return y2.reshape(N, H, W, Cout)


# --------------------------------------------------------------------------
# conv_block forward (PyTorch semantics, training-mode BatchNorm)
# --------------------------------------------------------------------------
@jax.jit
def conv_block_forward(x_nchw, w1, b1, g1, be1, w2, b2, g2, be2):
    """x: (N, Cin, H, W); w*: (Cout, Cin, 3, 3) OIHW; returns (N, Cout, H, W)."""
    del b1, b2  # conv bias cancels exactly under training-mode BatchNorm

    x = jnp.transpose(x_nchw, (0, 2, 3, 1)).astype(jnp.float32)     # NHWC

    # OIHW -> (kh, kw, Cin, Cout) -> (9, Cin, Cout)
    w1_9 = jnp.transpose(w1, (2, 3, 1, 0)).reshape(9, w1.shape[1], w1.shape[0])
    w2_9 = jnp.transpose(w2, (2, 3, 1, 0)).reshape(9, w2.shape[1], w2.shape[0])

    c1, m1, v1 = _conv3x3_batchstats(x, w1_9)
    y1 = _bn_relu(c1, m1, v1, g1, be1)
    # TODO(synk): fuse this bn_relu into the second conv pass (apply the affine
    # + ReLU to the halo'd tile inside the kernel) to save one HBM round trip.

    c2, m2, v2 = _conv3x3_batchstats(y1, w2_9)
    y2 = _bn_relu(c2, m2, v2, g2, be2)

    return jnp.transpose(y2, (0, 3, 1, 2))                          # NCHW


# --------------------------------------------------------------------------
# Pure-JAX reference (lax conv + bias + batch-stats BN + ReLU, twice).
# The conv inputs are cast to bf16 to match the kernel's MXU precision
# (accumulation stays f32), so the comparison is tight.
# --------------------------------------------------------------------------
def conv_block_reference(x_nchw, w1, b1, g1, be1, w2, b2, g2, be2,
                         conv_dtype=jnp.bfloat16):
    def stage(x, w, b, g, be):
        wh = jnp.transpose(w, (2, 3, 1, 0))                         # HWIO
        y = jax.lax.conv_general_dilated(
            x.astype(conv_dtype), wh.astype(conv_dtype),
            window_strides=(1, 1), padding=((1, 1), (1, 1)),
            dimension_numbers=("NHWC", "HWIO", "NHWC"),
            preferred_element_type=jnp.float32)
        y = y + b.reshape(1, 1, 1, -1)
        mean = jnp.mean(y, axis=(0, 1, 2), keepdims=True)
        var = jnp.mean((y - mean) ** 2, axis=(0, 1, 2), keepdims=True)
        y = (y - mean) * jax.lax.rsqrt(var + EPS) * g.reshape(1, 1, 1, -1) \
            + be.reshape(1, 1, 1, -1)
        return jnp.maximum(y, 0.0)

    x = jnp.transpose(x_nchw, (0, 2, 3, 1))
    y = stage(x, w1, b1, g1, be1)
    y = stage(y, w2, b2, g2, be2)
    return jnp.transpose(y, (0, 3, 1, 2))


if __name__ == "__main__":
    key = jax.random.PRNGKey(0)
    kx, kw1, kb1, kw2, kb2 = jax.random.split(key, 5)

    # Small deterministic example: in_ch=4, out_ch=8, 16x16 spatial.
    # (W * out_ch = 128 -> lane-dense normalize pass.)
    N, Cin, Cout, H, W = 2, 4, 8, 16, 16
    x = jax.random.normal(kx, (N, Cin, H, W), dtype=jnp.float32)

    # Parameters shaped per nn.Conv2d / nn.BatchNorm2d defaults.
    bnd1 = 1.0 / np.sqrt(Cin * 9)
    w1 = jax.random.uniform(kw1, (Cout, Cin, 3, 3), jnp.float32, -bnd1, bnd1)
    b1 = jax.random.uniform(kb1, (Cout,), jnp.float32, -bnd1, bnd1)
    bnd2 = 1.0 / np.sqrt(Cout * 9)
    w2 = jax.random.uniform(kw2, (Cout, Cout, 3, 3), jnp.float32, -bnd2, bnd2)
    b2 = jax.random.uniform(kb2, (Cout,), jnp.float32, -bnd2, bnd2)
    g1 = jnp.ones((Cout,), jnp.float32)
    be1 = jnp.zeros((Cout,), jnp.float32)
    g2 = jnp.ones((Cout,), jnp.float32)
    be2 = jnp.zeros((Cout,), jnp.float32)

    out = jax.block_until_ready(
        conv_block_forward(x, w1, b1, g1, be1, w2, b2, g2, be2))
    ref = jax.block_until_ready(
        conv_block_reference(x, w1, b1, g1, be1, w2, b2, g2, be2))

    assert out.shape == (N, Cout, H, W), out.shape
    np.testing.assert_allclose(np.asarray(out), np.asarray(ref),
                               rtol=1e-2, atol=1e-2)
    print("KERNEL_OK")
</pallas_src>

<mosaic_0001>
module attributes {stable_mosaic.version = 11 : i64} {
  func.func @_conv3x3_stats_kernel(%arg0: i32, %arg1: memref<1x342x4xbf16, #tpu.memory_space<vmem>>, %arg2: memref<9x4x8xbf16, #tpu.memory_space<vmem>>, %arg3: memref<288x1xf32, #tpu.memory_space<vmem>>, %arg4: memref<1x288x8xf32, #tpu.memory_space<vmem>>, %arg5: memref<1x2x8xf32, #tpu.memory_space<vmem>>) attributes {dimension_semantics = [#tpu.dimension_semantics<parallel>], iteration_bounds = array<i64: 2>, scalar_prefetch = 0 : i64, scratch_operands = 0 : i64, tpu.core_type = #tpu.core_type<tc>, window_params = [{transform_indices = @transform_0, window_bounds = array<i64: 1, 342, 4>}, {pipeline_mode = #tpu.pipeline_mode<synchronous>, transform_indices = @transform_1, window_bounds = array<i64: 9, 4, 8>}, {pipeline_mode = #tpu.pipeline_mode<synchronous>, transform_indices = @transform_2, window_bounds = array<i64: 288, 1>}, {transform_indices = @transform_3, window_bounds = array<i64: 1, 288, 8>}, {transform_indices = @transform_4, window_bounds = array<i64: 1, 2, 8>}]} {
    %cst = arith.constant 0.000000e+00 : f32
    %0 = vector.broadcast %cst : f32 to vector<288x8xf32>
    %c0 = arith.constant 0 : index
    %c0_0 = arith.constant 0 : index
    %c0_1 = arith.constant 0 : index
    %1 = vector.load %arg1[%c0, %c0_0, %c0_1] : memref<1x342x4xbf16, #tpu.memory_space<vmem>>, vector<1x288x4xbf16>
    %2 = vector.shape_cast %1 : vector<1x288x4xbf16> to vector<288x4xbf16>
    %c0_2 = arith.constant 0 : index
    %c0_3 = arith.constant 0 : index
    %c0_4 = arith.constant 0 : index
    %3 = vector.load %arg2[%c0_2, %c0_3, %c0_4] : memref<9x4x8xbf16, #tpu.memory_space<vmem>>, vector<1x4x8xbf16>
    %4 = vector.shape_cast %3 : vector<1x4x8xbf16> to vector<4x8xbf16>
    %cst_5 = arith.constant dense<0.000000e+00> : vector<288x8xf32>
    %5 = tpu.matmul %2, %4, %cst_5 {dimension_numbers = #tpu.dot_dimension_numbers<[1], [0], [0], [1], [0, 0, 1, 1], [], []>} : vector<288x4xbf16>, vector<4x8xbf16>, vector<288x8xf32> -> vector<288x8xf32>
    %6 = arith.addf %0, %5 : vector<288x8xf32>
    %c0_6 = arith.constant 0 : index
    %c1 = arith.constant 1 : index
    %c0_7 = arith.constant 0 : index
    %7 = vector.load %arg1[%c0_6, %c1, %c0_7] : memref<1x342x4xbf16, #tpu.memory_space<vmem>>, vector<1x288x4xbf16>
    %8 = vector.shape_cast %7 : vector<1x288x4xbf16> to vector<288x4xbf16>
    %c1_8 = arith.constant 1 : index
    %c0_9 = arith.constant 0 : index
    %c0_10 = arith.constant 0 : index
    %9 = vector.load %arg2[%c1_8, %c0_9, %c0_10] : memref<9x4x8xbf16, #tpu.memory_space<vmem>>, vector<1x4x8xbf16>
    %10 = vector.shape_cast %9 : vector<1x4x8xbf16> to vector<4x8xbf16>
    %cst_11 = arith.constant dense<0.000000e+00> : vector<288x8xf32>
    %11 = tpu.matmul %8, %10, %cst_11 {dimension_numbers = #tpu.dot_dimension_numbers<[1], [0], [0], [1], [0, 0, 1, 1], [], []>} : vector<288x4xbf16>, vector<4x8xbf16>, vector<288x8xf32> -> vector<288x8xf32>
    %12 = arith.addf %6, %11 : vector<288x8xf32>
    %c0_12 = arith.constant 0 : index
    %c2 = arith.constant 2 : index
    %c0_13 = arith.constant 0 : index
    %13 = vector.load %arg1[%c0_12, %c2, %c0_13] : memref<1x342x4xbf16, #tpu.memory_space<vmem>>, vector<1x288x4xbf16>
    %14 = vector.shape_cast %13 : vector<1x288x4xbf16> to vector<288x4xbf16>
    %c2_14 = arith.constant 2 : index
    %c0_15 = arith.constant 0 : index
    %c0_16 = arith.constant 0 : index
    %15 = vector.load %arg2[%c2_14, %c0_15, %c0_16] : memref<9x4x8xbf16, #tpu.memory_space<vmem>>, vector<1x4x8xbf16>
    %16 = vector.shape_cast %15 : vector<1x4x8xbf16> to vector<4x8xbf16>
    %cst_17 = arith.constant dense<0.000000e+00> : vector<288x8xf32>
    %17 = tpu.matmul %14, %16, %cst_17 {dimension_numbers = #tpu.dot_dimension_numbers<[1], [0], [0], [1], [0, 0, 1, 1], [], []>} : vector<288x4xbf16>, vector<4x8xbf16>, vector<288x8xf32> -> vector<288x8xf32>
    %18 = arith.addf %12, %17 : vector<288x8xf32>
    %c0_18 = arith.constant 0 : index
    %c18 = arith.constant 18 : index
    %c0_19 = arith.constant 0 : index
    %19 = vector.load %arg1[%c0_18, %c18, %c0_19] : memref<1x342x4xbf16, #tpu.memory_space<vmem>>, vector<1x288x4xbf16>
    %20 = vector.shape_cast %19 : vector<1x288x4xbf16> to vector<288x4xbf16>
    %c3 = arith.constant 3 : index
    %c0_20 = arith.constant 0 : index
    %c0_21 = arith.constant 0 : index
    %21 = vector.load %arg2[%c3, %c0_20, %c0_21] : memref<9x4x8xbf16, #tpu.memory_space<vmem>>, vector<1x4x8xbf16>
    %22 = vector.shape_cast %21 : vector<1x4x8xbf16> to vector<4x8xbf16>
    %cst_22 = arith.constant dense<0.000000e+00> : vector<288x8xf32>
    %23 = tpu.matmul %20, %22, %cst_22 {dimension_numbers = #tpu.dot_dimension_numbers<[1], [0], [0], [1], [0, 0, 1, 1], [], []>} : vector<288x4xbf16>, vector<4x8xbf16>, vector<288x8xf32> -> vector<288x8xf32>
    %24 = arith.addf %18, %23 : vector<288x8xf32>
    %c0_23 = arith.constant 0 : index
    %c19 = arith.constant 19 : index
    %c0_24 = arith.constant 0 : index
    %25 = vector.load %arg1[%c0_23, %c19, %c0_24] : memref<1x342x4xbf16, #tpu.memory_space<vmem>>, vector<1x288x4xbf16>
    %26 = vector.shape_cast %25 : vector<1x288x4xbf16> to vector<288x4xbf16>
    %c4 = arith.constant 4 : index
    %c0_25 = arith.constant 0 : index
    %c0_26 = arith.constant 0 : index
    %27 = vector.load %arg2[%c4, %c0_25, %c0_26] : memref<9x4x8xbf16, #tpu.memory_space<vmem>>, vector<1x4x8xbf16>
    %28 = vector.shape_cast %27 : vector<1x4x8xbf16> to vector<4x8xbf16>
    %cst_27 = arith.constant dense<0.000000e+00> : vector<288x8xf32>
    %29 = tpu.matmul %26, %28, %cst_27 {dimension_numbers = #tpu.dot_dimension_numbers<[1], [0], [0], [1], [0, 0, 1, 1], [], []>} : vector<288x4xbf16>, vector<4x8xbf16>, vector<288x8xf32> -> vector<288x8xf32>
    %30 = arith.addf %24, %29 : vector<288x8xf32>
    %c0_28 = arith.constant 0 : index
    %c20 = arith.constant 20 : index
    %c0_29 = arith.constant 0 : index
    %31 = vector.load %arg1[%c0_28, %c20, %c0_29] : memref<1x342x4xbf16, #tpu.memory_space<vmem>>, vector<1x288x4xbf16>
    %32 = vector.shape_cast %31 : vector<1x288x4xbf16> to vector<288x4xbf16>
    %c5 = arith.constant 5 : index
    %c0_30 = arith.constant 0 : index
    %c0_31 = arith.constant 0 : index
    %33 = vector.load %arg2[%c5, %c0_30, %c0_31] : memref<9x4x8xbf16, #tpu.memory_space<vmem>>, vector<1x4x8xbf16>
    %34 = vector.shape_cast %33 : vector<1x4x8xbf16> to vector<4x8xbf16>
    %cst_32 = arith.constant dense<0.000000e+00> : vector<288x8xf32>
    %35 = tpu.matmul %32, %34, %cst_32 {dimension_numbers = #tpu.dot_dimension_numbers<[1], [0], [0], [1], [0, 0, 1, 1], [], []>} : vector<288x4xbf16>, vector<4x8xbf16>, vector<288x8xf32> -> vector<288x8xf32>
    %36 = arith.addf %30, %35 : vector<288x8xf32>
    %c0_33 = arith.constant 0 : index
    %c36 = arith.constant 36 : index
    %c0_34 = arith.constant 0 : index
    %37 = vector.load %arg1[%c0_33, %c36, %c0_34] : memref<1x342x4xbf16, #tpu.memory_space<vmem>>, vector<1x288x4xbf16>
    %38 = vector.shape_cast %37 : vector<1x288x4xbf16> to vector<288x4xbf16>
    %c6 = arith.constant 6 : index
    %c0_35 = arith.constant 0 : index
    %c0_36 = arith.constant 0 : index
    %39 = vector.load %arg2[%c6, %c0_35, %c0_36] : memref<9x4x8xbf16, #tpu.memory_space<vmem>>, vector<1x4x8xbf16>
    %40 = vector.shape_cast %39 : vector<1x4x8xbf16> to vector<4x8xbf16>
    %cst_37 = arith.constant dense<0.000000e+00> : vector<288x8xf32>
    %41 = tpu.matmul %38, %40, %cst_37 {dimension_numbers = #tpu.dot_dimension_numbers<[1], [0], [0], [1], [0, 0, 1, 1], [], []>} : vector<288x4xbf16>, vector<4x8xbf16>, vector<288x8xf32> -> vector<288x8xf32>
    %42 = arith.addf %36, %41 : vector<288x8xf32>
    %c0_38 = arith.constant 0 : index
    %c37 = arith.constant 37 : index
    %c0_39 = arith.constant 0 : index
    %43 = vector.load %arg1[%c0_38, %c37, %c0_39] : memref<1x342x4xbf16, #tpu.memory_space<vmem>>, vector<1x288x4xbf16>
    %44 = vector.shape_cast %43 : vector<1x288x4xbf16> to vector<288x4xbf16>
    %c7 = arith.constant 7 : index
    %c0_40 = arith.constant 0 : index
    %c0_41 = arith.constant 0 : index
    %45 = vector.load %arg2[%c7, %c0_40, %c0_41] : memref<9x4x8xbf16, #tpu.memory_space<vmem>>, vector<1x4x8xbf16>
    %46 = vector.shape_cast %45 : vector<1x4x8xbf16> to vector<4x8xbf16>
    %cst_42 = arith.constant dense<0.000000e+00> : vector<288x8xf32>
    %47 = tpu.matmul %44, %46, %cst_42 {dimension_numbers = #tpu.dot_dimension_numbers<[1], [0], [0], [1], [0, 0, 1, 1], [], []>} : vector<288x4xbf16>, vector<4x8xbf16>, vector<288x8xf32> -> vector<288x8xf32>
    %48 = arith.addf %42, %47 : vector<288x8xf32>
    %c0_43 = arith.constant 0 : index
    %c38 = arith.constant 38 : index
    %c0_44 = arith.constant 0 : index
    %49 = vector.load %arg1[%c0_43, %c38, %c0_44] : memref<1x342x4xbf16, #tpu.memory_space<vmem>>, vector<1x288x4xbf16>
    %50 = vector.shape_cast %49 : vector<1x288x4xbf16> to vector<288x4xbf16>
    %c8 = arith.constant 8 : index
    %c0_45 = arith.constant 0 : index
    %c0_46 = arith.constant 0 : index
    %51 = vector.load %arg2[%c8, %c0_45, %c0_46] : memref<9x4x8xbf16, #tpu.memory_space<vmem>>, vector<1x4x8xbf16>
    %52 = vector.shape_cast %51 : vector<1x4x8xbf16> to vector<4x8xbf16>
    %cst_47 = arith.constant dense<0.000000e+00> : vector<288x8xf32>
    %53 = tpu.matmul %50, %52, %cst_47 {dimension_numbers = #tpu.dot_dimension_numbers<[1], [0], [0], [1], [0, 0, 1, 1], [], []>} : vector<288x4xbf16>, vector<4x8xbf16>, vector<288x8xf32> -> vector<288x8xf32>
    %54 = arith.addf %48, %53 : vector<288x8xf32>
    %c0_48 = arith.constant 0 : index
    %c0_49 = arith.constant 0 : index
    %55 = vector.load %arg3[%c0_48, %c0_49] : memref<288x1xf32, #tpu.memory_space<vmem>>, vector<288x1xf32>
    %56 = vector.broadcast %55 : vector<288x1xf32> to vector<288x8xf32>
    %57 = arith.mulf %54, %56 : vector<288x8xf32>
    %c0_50 = arith.constant 0 : index
    %c0_51 = arith.constant 0 : index
    %c0_52 = arith.constant 0 : index
    %58 = vector.load %arg4[%c0_50, %c0_51, %c0_52] : memref<1x288x8xf32, #tpu.memory_space<vmem>>, vector<1x288x8xf32>
    %59 = vector.shape_cast %58 : vector<1x288x8xf32> to vector<288x8xf32>
    %60 = vector.shape_cast %57 : vector<288x8xf32> to vector<1x288x8xf32>
    tpu.vector_store %arg4[%c0_50, %c0_51, %c0_52], %60 {strides = array<i32>} : memref<1x288x8xf32, #tpu.memory_space<vmem>>, vector<1x288x8xf32>,
    %cst_53 = arith.constant dense<0.000000e+00> : vector<8xf32>
    %61 = vector.multi_reduction <add>, %57, %cst_53 [0] : vector<288x8xf32> to vector<8xf32>
    %62 = vector.shape_cast %61 : vector<8xf32> to vector<1x8xf32>
    %63 = arith.mulf %57, %57 : vector<288x8xf32>
    %cst_54 = arith.constant dense<0.000000e+00> : vector<8xf32>
    %64 = vector.multi_reduction <add>, %63, %cst_54 [0] : vector<288x8xf32> to vector<8xf32>
    %65 = vector.shape_cast %64 : vector<8xf32> to vector<1x8xf32>
    %66 = tpu.concatenate %62, %65 in 0 : vector<1x8xf32>, vector<1x8xf32> -> vector<2x8xf32>
    %c0_55 = arith.constant 0 : index
    %c0_56 = arith.constant 0 : index
    %c0_57 = arith.constant 0 : index
    %67 = vector.load %arg5[%c0_55, %c0_56, %c0_57] : memref<1x2x8xf32, #tpu.memory_space<vmem>>, vector<1x2x8xf32>
    %68 = vector.shape_cast %67 : vector<1x2x8xf32> to vector<2x8xf32>
    %69 = vector.shape_cast %66 : vector<2x8xf32> to vector<1x2x8xf32>
    tpu.vector_store %arg5[%c0_55, %c0_56, %c0_57], %69 {strides = array<i32>} : memref<1x2x8xf32, #tpu.memory_space<vmem>>, vector<1x2x8xf32>,
    return
  }
  func.func @transform_0(%arg0: i32) -> (i32, i32, i32) {
    %c0_i32 = arith.constant 0 : i32
    %c0_i32_0 = arith.constant 0 : i32
    %c0_i32_1 = arith.constant 0 : i32
    return %arg0, %c0_i32, %c0_i32_0 : i32, i32, i32
  }
  func.func @transform_1(%arg0: i32) -> (i32, i32, i32) {
    %c0_i32 = arith.constant 0 : i32
    %c0_i32_0 = arith.constant 0 : i32
    %c0_i32_1 = arith.constant 0 : i32
    %c0_i32_2 = arith.constant 0 : i32
    return %c0_i32, %c0_i32_0, %c0_i32_1 : i32, i32, i32
  }
  func.func @transform_2(%arg0: i32) -> (i32, i32) {
    %c0_i32 = arith.constant 0 : i32
    %c0_i32_0 = arith.constant 0 : i32
    %c0_i32_1 = arith.constant 0 : i32
    return %c0_i32, %c0_i32_0 : i32, i32
  }
  func.func @transform_3(%arg0: i32) -> (i32, i32, i32) {
    %c0_i32 = arith.constant 0 : i32
    %c0_i32_0 = arith.constant 0 : i32
    %c0_i32_1 = arith.constant 0 : i32
    return %arg0, %c0_i32, %c0_i32_0 : i32, i32, i32
  }
  func.func @transform_4(%arg0: i32) -> (i32, i32, i32) {
    %c0_i32 = arith.constant 0 : i32
    %c0_i32_0 = arith.constant 0 : i32
    %c0_i32_1 = arith.constant 0 : i32
    return %arg0, %c0_i32, %c0_i32_0 : i32, i32, i32
  }
}

module attributes {stable_mosaic.version = 11 : i64} {
  func.func @_bn_relu_kernel(%arg0: i32, %arg1: memref<32x128xf32, #tpu.memory_space<vmem>>, %arg2: memref<1x128xf32, #tpu.memory_space<vmem>>, %arg3: memref<1x128xf32, #tpu.memory_space<vmem>>, %arg4: memref<32x128xf32, #tpu.memory_space<vmem>>) attributes {dimension_semantics = [#tpu.dimension_semantics<parallel>], iteration_bounds = array<i64: 1>, scalar_prefetch = 0 : i64, scratch_operands = 0 : i64, tpu.core_type = #tpu.core_type<tc>, window_params = [{transform_indices = @transform_0, window_bounds = array<i64: 32, 128>}, {pipeline_mode = #tpu.pipeline_mode<synchronous>, transform_indices = @transform_1, window_bounds = array<i64: 1, 128>}, {pipeline_mode = #tpu.pipeline_mode<synchronous>, transform_indices = @transform_2, window_bounds = array<i64: 1, 128>}, {transform_indices = @transform_3, window_bounds = array<i64: 32, 128>}]} {
    %c0 = arith.constant 0 : index
    %c0_0 = arith.constant 0 : index
    %0 = vector.load %arg1[%c0, %c0_0] : memref<32x128xf32, #tpu.memory_space<vmem>>, vector<32x128xf32>
    %c0_1 = arith.constant 0 : index
    %c0_2 = arith.constant 0 : index
    %1 = vector.load %arg2[%c0_1, %c0_2] : memref<1x128xf32, #tpu.memory_space<vmem>>, vector<1x128xf32>
    %2 = vector.broadcast %1 : vector<1x128xf32> to vector<32x128xf32>
    %3 = arith.mulf %0, %2 : vector<32x128xf32>
    %c0_3 = arith.constant 0 : index
    %c0_4 = arith.constant 0 : index
    %4 = vector.load %arg3[%c0_3, %c0_4] : memref<1x128xf32, #tpu.memory_space<vmem>>, vector<1x128xf32>
    %5 = vector.broadcast %4 : vector<1x128xf32> to vector<32x128xf32>
    %6 = arith.addf %3, %5 : vector<32x128xf32>
    %cst = arith.constant 0.000000e+00 : f32
    %7 = vector.broadcast %cst : f32 to vector<32x128xf32>
    %8 = arith.maximumf %6, %7 : vector<32x128xf32>
    %c0_5 = arith.constant 0 : index
    %c0_6 = arith.constant 0 : index
    %9 = vector.load %arg4[%c0_5, %c0_6] : memref<32x128xf32, #tpu.memory_space<vmem>>, vector<32x128xf32>
    tpu.vector_store %arg4[%c0_5, %c0_6], %8 {strides = array<i32>} : memref<32x128xf32, #tpu.memory_space<vmem>>, vector<32x128xf32>,
    return
  }
  func.func @transform_0(%arg0: i32) -> (i32, i32) {
    %c0_i32 = arith.constant 0 : i32
    %c0_i32_0 = arith.constant 0 : i32
    return %arg0, %c0_i32 : i32, i32
  }
  func.func @transform_1(%arg0: i32) -> (i32, i32) {
    %c0_i32 = arith.constant 0 : i32
    %c0_i32_0 = arith.constant 0 : i32
    %c0_i32_1 = arith.constant 0 : i32
    return %c0_i32, %c0_i32_0 : i32, i32
  }
  func.func @transform_2(%arg0: i32) -> (i32, i32) {
    %c0_i32 = arith.constant 0 : i32
    %c0_i32_0 = arith.constant 0 : i32
    %c0_i32_1 = arith.constant 0 : i32
    return %c0_i32, %c0_i32_0 : i32, i32
  }
  func.func @transform_3(%arg0: i32) -> (i32, i32) {
    %c0_i32 = arith.constant 0 : i32
    %c0_i32_0 = arith.constant 0 : i32
    return %arg0, %c0_i32 : i32, i32
  }
}

module attributes {stable_mosaic.version = 11 : i64} {
  func.func @_conv3x3_stats_kernel(%arg0: i32, %arg1: memref<1x342x8xbf16, #tpu.memory_space<vmem>>, %arg2: memref<9x8x8xbf16, #tpu.memory_space<vmem>>, %arg3: memref<288x1xf32, #tpu.memory_space<vmem>>, %arg4: memref<1x288x8xf32, #tpu.memory_space<vmem>>, %arg5: memref<1x2x8xf32, #tpu.memory_space<vmem>>) attributes {dimension_semantics = [#tpu.dimension_semantics<parallel>], iteration_bounds = array<i64: 2>, scalar_prefetch = 0 : i64, scratch_operands = 0 : i64, tpu.core_type = #tpu.core_type<tc>, window_params = [{transform_indices = @transform_0, window_bounds = array<i64: 1, 342, 8>}, {pipeline_mode = #tpu.pipeline_mode<synchronous>, transform_indices = @transform_1, window_bounds = array<i64: 9, 8, 8>}, {pipeline_mode = #tpu.pipeline_mode<synchronous>, transform_indices = @transform_2, window_bounds = array<i64: 288, 1>}, {transform_indices = @transform_3, window_bounds = array<i64: 1, 288, 8>}, {transform_indices = @transform_4, window_bounds = array<i64: 1, 2, 8>}]} {
    %cst = arith.constant 0.000000e+00 : f32
    %0 = vector.broadcast %cst : f32 to vector<288x8xf32>
    %c0 = arith.constant 0 : index
    %c0_0 = arith.constant 0 : index
    %c0_1 = arith.constant 0 : index
    %1 = vector.load %arg1[%c0, %c0_0, %c0_1] : memref<1x342x8xbf16, #tpu.memory_space<vmem>>, vector<1x288x8xbf16>
    %2 = vector.shape_cast %1 : vector<1x288x8xbf16> to vector<288x8xbf16>
    %c0_2 = arith.constant 0 : index
    %c0_3 = arith.constant 0 : index
    %c0_4 = arith.constant 0 : index
    %3 = vector.load %arg2[%c0_2, %c0_3, %c0_4] : memref<9x8x8xbf16, #tpu.memory_space<vmem>>, vector<1x8x8xbf16>
    %4 = vector.shape_cast %3 : vector<1x8x8xbf16> to vector<8x8xbf16>
    %cst_5 = arith.constant dense<0.000000e+00> : vector<288x8xf32>
    %5 = tpu.matmul %2, %4, %cst_5 {dimension_numbers = #tpu.dot_dimension_numbers<[1], [0], [0], [1], [0, 0, 1, 1], [], []>} : vector<288x8xbf16>, vector<8x8xbf16>, vector<288x8xf32> -> vector<288x8xf32>
    %6 = arith.addf %0, %5 : vector<288x8xf32>
    %c0_6 = arith.constant 0 : index
    %c1 = arith.constant 1 : index
    %c0_7 = arith.constant 0 : index
    %7 = vector.load %arg1[%c0_6, %c1, %c0_7] : memref<1x342x8xbf16, #tpu.memory_space<vmem>>, vector<1x288x8xbf16>
    %8 = vector.shape_cast %7 : vector<1x288x8xbf16> to vector<288x8xbf16>
    %c1_8 = arith.constant 1 : index
    %c0_9 = arith.constant 0 : index
    %c0_10 = arith.constant 0 : index
    %9 = vector.load %arg2[%c1_8, %c0_9, %c0_10] : memref<9x8x8xbf16, #tpu.memory_space<vmem>>, vector<1x8x8xbf16>
    %10 = vector.shape_cast %9 : vector<1x8x8xbf16> to vector<8x8xbf16>
    %cst_11 = arith.constant dense<0.000000e+00> : vector<288x8xf32>
    %11 = tpu.matmul %8, %10, %cst_11 {dimension_numbers = #tpu.dot_dimension_numbers<[1], [0], [0], [1], [0, 0, 1, 1], [], []>} : vector<288x8xbf16>, vector<8x8xbf16>, vector<288x8xf32> -> vector<288x8xf32>
    %12 = arith.addf %6, %11 : vector<288x8xf32>
    %c0_12 = arith.constant 0 : index
    %c2 = arith.constant 2 : index
    %c0_13 = arith.constant 0 : index
    %13 = vector.load %arg1[%c0_12, %c2, %c0_13] : memref<1x342x8xbf16, #tpu.memory_space<vmem>>, vector<1x288x8xbf16>
    %14 = vector.shape_cast %13 : vector<1x288x8xbf16> to vector<288x8xbf16>
    %c2_14 = arith.constant 2 : index
    %c0_15 = arith.constant 0 : index
    %c0_16 = arith.constant 0 : index
    %15 = vector.load %arg2[%c2_14, %c0_15, %c0_16] : memref<9x8x8xbf16, #tpu.memory_space<vmem>>, vector<1x8x8xbf16>
    %16 = vector.shape_cast %15 : vector<1x8x8xbf16> to vector<8x8xbf16>
    %cst_17 = arith.constant dense<0.000000e+00> : vector<288x8xf32>
    %17 = tpu.matmul %14, %16, %cst_17 {dimension_numbers = #tpu.dot_dimension_numbers<[1], [0], [0], [1], [0, 0, 1, 1], [], []>} : vector<288x8xbf16>, vector<8x8xbf16>, vector<288x8xf32> -> vector<288x8xf32>
    %18 = arith.addf %12, %17 : vector<288x8xf32>
    %c0_18 = arith.constant 0 : index
    %c18 = arith.constant 18 : index
    %c0_19 = arith.constant 0 : index
    %19 = vector.load %arg1[%c0_18, %c18, %c0_19] : memref<1x342x8xbf16, #tpu.memory_space<vmem>>, vector<1x288x8xbf16>
    %20 = vector.shape_cast %19 : vector<1x288x8xbf16> to vector<288x8xbf16>
    %c3 = arith.constant 3 : index
    %c0_20 = arith.constant 0 : index
    %c0_21 = arith.constant 0 : index
    %21 = vector.load %arg2[%c3, %c0_20, %c0_21] : memref<9x8x8xbf16, #tpu.memory_space<vmem>>, vector<1x8x8xbf16>
    %22 = vector.shape_cast %21 : vector<1x8x8xbf16> to vector<8x8xbf16>
    %cst_22 = arith.constant dense<0.000000e+00> : vector<288x8xf32>
    %23 = tpu.matmul %20, %22, %cst_22 {dimension_numbers = #tpu.dot_dimension_numbers<[1], [0], [0], [1], [0, 0, 1, 1], [], []>} : vector<288x8xbf16>, vector<8x8xbf16>, vector<288x8xf32> -> vector<288x8xf32>
    %24 = arith.addf %18, %23 : vector<288x8xf32>
    %c0_23 = arith.constant 0 : index
    %c19 = arith.constant 19 : index
    %c0_24 = arith.constant 0 : index
    %25 = vector.load %arg1[%c0_23, %c19, %c0_24] : memref<1x342x8xbf16, #tpu.memory_space<vmem>>, vector<1x288x8xbf16>
    %26 = vector.shape_cast %25 : vector<1x288x8xbf16> to vector<288x8xbf16>
    %c4 = arith.constant 4 : index
    %c0_25 = arith.constant 0 : index
    %c0_26 = arith.constant 0 : index
    %27 = vector.load %arg2[%c4, %c0_25, %c0_26] : memref<9x8x8xbf16, #tpu.memory_space<vmem>>, vector<1x8x8xbf16>
    %28 = vector.shape_cast %27 : vector<1x8x8xbf16> to vector<8x8xbf16>
    %cst_27 = arith.constant dense<0.000000e+00> : vector<288x8xf32>
    %29 = tpu.matmul %26, %28, %cst_27 {dimension_numbers = #tpu.dot_dimension_numbers<[1], [0], [0], [1], [0, 0, 1, 1], [], []>} : vector<288x8xbf16>, vector<8x8xbf16>, vector<288x8xf32> -> vector<288x8xf32>
    %30 = arith.addf %24, %29 : vector<288x8xf32>
    %c0_28 = arith.constant 0 : index
    %c20 = arith.constant 20 : index
    %c0_29 = arith.constant 0 : index
    %31 = vector.load %arg1[%c0_28, %c20, %c0_29] : memref<1x342x8xbf16, #tpu.memory_space<vmem>>, vector<1x288x8xbf16>
    %32 = vector.shape_cast %31 : vector<1x288x8xbf16> to vector<288x8xbf16>
    %c5 = arith.constant 5 : index
    %c0_30 = arith.constant 0 : index
    %c0_31 = arith.constant 0 : index
    %33 = vector.load %arg2[%c5, %c0_30, %c0_31] : memref<9x8x8xbf16, #tpu.memory_space<vmem>>, vector<1x8x8xbf16>
    %34 = vector.shape_cast %33 : vector<1x8x8xbf16> to vector<8x8xbf16>
    %cst_32 = arith.constant dense<0.000000e+00> : vector<288x8xf32>
    %35 = tpu.matmul %32, %34, %cst_32 {dimension_numbers = #tpu.dot_dimension_numbers<[1], [0], [0], [1], [0, 0, 1, 1], [], []>} : vector<288x8xbf16>, vector<8x8xbf16>, vector<288x8xf32> -> vector<288x8xf32>
    %36 = arith.addf %30, %35 : vector<288x8xf32>
    %c0_33 = arith.constant 0 : index
    %c36 = arith.constant 36 : index
    %c0_34 = arith.constant 0 : index
    %37 = vector.load %arg1[%c0_33, %c36, %c0_34] : memref<1x342x8xbf16, #tpu.memory_space<vmem>>, vector<1x288x8xbf16>
    %38 = vector.shape_cast %37 : vector<1x288x8xbf16> to vector<288x8xbf16>
    %c6 = arith.constant 6 : index
    %c0_35 = arith.constant 0 : index
    %c0_36 = arith.constant 0 : index
    %39 = vector.load %arg2[%c6, %c0_35, %c0_36] : memref<9x8x8xbf16, #tpu.memory_space<vmem>>, vector<1x8x8xbf16>
    %40 = vector.shape_cast %39 : vector<1x8x8xbf16> to vector<8x8xbf16>
    %cst_37 = arith.constant dense<0.000000e+00> : vector<288x8xf32>
    %41 = tpu.matmul %38, %40, %cst_37 {dimension_numbers = #tpu.dot_dimension_numbers<[1], [0], [0], [1], [0, 0, 1, 1], [], []>} : vector<288x8xbf16>, vector<8x8xbf16>, vector<288x8xf32> -> vector<288x8xf32>
    %42 = arith.addf %36, %41 : vector<288x8xf32>
    %c0_38 = arith.constant 0 : index
    %c37 = arith.constant 37 : index
    %c0_39 = arith.constant 0 : index
    %43 = vector.load %arg1[%c0_38, %c37, %c0_39] : memref<1x342x8xbf16, #tpu.memory_space<vmem>>, vector<1x288x8xbf16>
    %44 = vector.shape_cast %43 : vector<1x288x8xbf16> to vector<288x8xbf16>
    %c7 = arith.constant 7 : index
    %c0_40 = arith.constant 0 : index
    %c0_41 = arith.constant 0 : index
    %45 = vector.load %arg2[%c7, %c0_40, %c0_41] : memref<9x8x8xbf16, #tpu.memory_space<vmem>>, vector<1x8x8xbf16>
    %46 = vector.shape_cast %45 : vector<1x8x8xbf16> to vector<8x8xbf16>
    %cst_42 = arith.constant dense<0.000000e+00> : vector<288x8xf32>
    %47 = tpu.matmul %44, %46, %cst_42 {dimension_numbers = #tpu.dot_dimension_numbers<[1], [0], [0], [1], [0, 0, 1, 1], [], []>} : vector<288x8xbf16>, vector<8x8xbf16>, vector<288x8xf32> -> vector<288x8xf32>
    %48 = arith.addf %42, %47 : vector<288x8xf32>
    %c0_43 = arith.constant 0 : index
    %c38 = arith.constant 38 : index
    %c0_44 = arith.constant 0 : index
    %49 = vector.load %arg1[%c0_43, %c38, %c0_44] : memref<1x342x8xbf16, #tpu.memory_space<vmem>>, vector<1x288x8xbf16>
    %50 = vector.shape_cast %49 : vector<1x288x8xbf16> to vector<288x8xbf16>
    %c8 = arith.constant 8 : index
    %c0_45 = arith.constant 0 : index
    %c0_46 = arith.constant 0 : index
    %51 = vector.load %arg2[%c8, %c0_45, %c0_46] : memref<9x8x8xbf16, #tpu.memory_space<vmem>>, vector<1x8x8xbf16>
    %52 = vector.shape_cast %51 : vector<1x8x8xbf16> to vector<8x8xbf16>
    %cst_47 = arith.constant dense<0.000000e+00> : vector<288x8xf32>
    %53 = tpu.matmul %50, %52, %cst_47 {dimension_numbers = #tpu.dot_dimension_numbers<[1], [0], [0], [1], [0, 0, 1, 1], [], []>} : vector<288x8xbf16>, vector<8x8xbf16>, vector<288x8xf32> -> vector<288x8xf32>
    %54 = arith.addf %48, %53 : vector<288x8xf32>
    %c0_48 = arith.constant 0 : index
    %c0_49 = arith.constant 0 : index
    %55 = vector.load %arg3[%c0_48, %c0_49] : memref<288x1xf32, #tpu.memory_space<vmem>>, vector<288x1xf32>
    %56 = vector.broadcast %55 : vector<288x1xf32> to vector<288x8xf32>
    %57 = arith.mulf %54, %56 : vector<288x8xf32>
    %c0_50 = arith.constant 0 : index
    %c0_51 = arith.constant 0 : index
    %c0_52 = arith.constant 0 : index
    %58 = vector.load %arg4[%c0_50, %c0_51, %c0_52] : memref<1x288x8xf32, #tpu.memory_space<vmem>>, vector<1x288x8xf32>
    %59 = vector.shape_cast %58 : vector<1x288x8xf32> to vector<288x8xf32>
    %60 = vector.shape_cast %57 : vector<288x8xf32> to vector<1x288x8xf32>
    tpu.vector_store %arg4[%c0_50, %c0_51, %c0_52], %60 {strides = array<i32>} : memref<1x288x8xf32, #tpu.memory_space<vmem>>, vector<1x288x8xf32>,
    %cst_53 = arith.constant dense<0.000000e+00> : vector<8xf32>
    %61 = vector.multi_reduction <add>, %57, %cst_53 [0] : vector<288x8xf32> to vector<8xf32>
    %62 = vector.shape_cast %61 : vector<8xf32> to vector<1x8xf32>
    %63 = arith.mulf %57, %57 : vector<288x8xf32>
    %cst_54 = arith.constant dense<0.000000e+00> : vector<8xf32>
    %64 = vector.multi_reduction <add>, %63, %cst_54 [0] : vector<288x8xf32> to vector<8xf32>
    %65 = vector.shape_cast %64 : vector<8xf32> to vector<1x8xf32>
    %66 = tpu.concatenate %62, %65 in 0 : vector<1x8xf32>, vector<1x8xf32> -> vector<2x8xf32>
    %c0_55 = arith.constant 0 : index
    %c0_56 = arith.constant 0 : index
    %c0_57 = arith.constant 0 : index
    %67 = vector.load %arg5[%c0_55, %c0_56, %c0_57] : memref<1x2x8xf32, #tpu.memory_space<vmem>>, vector<1x2x8xf32>
    %68 = vector.shape_cast %67 : vector<1x2x8xf32> to vector<2x8xf32>
    %69 = vector.shape_cast %66 : vector<2x8xf32> to vector<1x2x8xf32>
    tpu.vector_store %arg5[%c0_55, %c0_56, %c0_57], %69 {strides = array<i32>} : memref<1x2x8xf32, #tpu.memory_space<vmem>>, vector<1x2x8xf32>,
    return
  }
  func.func @transform_0(%arg0: i32) -> (i32, i32, i32) {
    %c0_i32 = arith.constant 0 : i32
    %c0_i32_0 = arith.constant 0 : i32
    %c0_i32_1 = arith.constant 0 : i32
    return %arg0, %c0_i32, %c0_i32_0 : i32, i32, i32
  }
  func.func @transform_1(%arg0: i32) -> (i32, i32, i32) {
    %c0_i32 = arith.constant 0 : i32
    %c0_i32_0 = arith.constant 0 : i32
    %c0_i32_1 = arith.constant 0 : i32
    %c0_i32_2 = arith.constant 0 : i32
    return %c0_i32, %c0_i32_0, %c0_i32_1 : i32, i32, i32
  }
  func.func @transform_2(%arg0: i32) -> (i32, i32) {
    %c0_i32 = arith.constant 0 : i32
    %c0_i32_0 = arith.constant 0 : i32
    %c0_i32_1 = arith.constant 0 : i32
    return %c0_i32, %c0_i32_0 : i32, i32
  }
  func.func @transform_3(%arg0: i32) -> (i32, i32, i32) {
    %c0_i32 = arith.constant 0 : i32
    %c0_i32_0 = arith.constant 0 : i32
    %c0_i32_1 = arith.constant 0 : i32
    return %arg0, %c0_i32, %c0_i32_0 : i32, i32, i32
  }
  func.func @transform_4(%arg0: i32) -> (i32, i32, i32) {
    %c0_i32 = arith.constant 0 : i32
    %c0_i32_0 = arith.constant 0 : i32
    %c0_i32_1 = arith.constant 0 : i32
    return %arg0, %c0_i32, %c0_i32_0 : i32, i32, i32
  }
}

</mosaic_0001>

<bundles_post_ra>
// kernel: tile.23
= control target key start
LH: loop header
LB: loop body
LE: loop exit
PB: predicated region body
PF: predicated region fallthrough
CT: control target
= control target key end

     0   :  { %s28_s0 = inlined_call_operand.vmem [shape: f32[8], index: 0, kind: input, shape index: {}]   ;;  %s29_s1 = inlined_call_operand.vmem [shape: f32[16,8], index: 1, kind: output, shape index: {}]  }
   0x1   :  { %v4_v0 = vld [vmem:[%s28_s0] ss:$0 sm:$0xff] }
   0x2   :  { %5 = vst [vmem:[%s29_s1] sm:$0xff] %v4_v0  ;;  %8 = vst [vmem:[%s29_s1 + $0x8] sm:$0xff] %v4_v0 }

// kernel: tile.24
= control target key start
LH: loop header
LB: loop body
LE: loop exit
PB: predicated region body
PF: predicated region fallthrough
CT: control target
= control target key end

     0   :  { %s131_s10 = smov 120   ;;  %s132_s11 = smov 104   ;;  %vm3_vm0 = vcmask 64512   ;;  %vm9_vm1 = vcmask 1048512   ;;  %vm15_vm2 = vcmask 982912   ;;  %vm21_vm3 = vcmask 917312   ;;  %s207_s0 = inlined_call_operand.vmem [shape: f32[16,8], index: 0, kind: input, shape index: {}]   ;;  %s208_s1 = inlined_call_operand.vmem [shape: f32[1,128], index: 1, kind: output, shape index: {}]  }
   0x1   :  { %v101_v0 = vld [vmem:[%s207_s0 + $0xf] sm:$0x1]   ;;  %v103_v1 = vld [vmem:[%s207_s0 + $0xd] sm:$0x1]   ;;  %v102_v2 = vld [vmem:[%s207_s0 + $0xe] sm:$0x1]  }
   0x2   :  { %7 = vrot.lane.b32.xlu0 %v101_v0, %s131_s10  ;;  %19 = vrot.lane.b32.xlu1 %v103_v1, %s132_s11  ;;  %v104_v3 = vld [vmem:[%s207_s0 + $0xc] sm:$0x1]   ;;  %s133_s16 = smov 112   ;;  %s134_s17 = smov 96   ;;  %v105_v4 = vld [vmem:[%s207_s0 + $0xb] sm:$0x1]  }
   0x3   :  { %v106_v5 = vld [vmem:[%s207_s0 + $0xa] sm:$0x1]   ;;  %v2_v6 = vld [vmem:[%s207_s0] sm:$0x1]   ;;  %s135_s24 = smov 88   ;;  %s136_s25 = smov 80  }
   0x4   :  { %4 = vst.msk [vmem:[#allocation0] sm:$0x1] %vm3_vm0, %v2_v6   ;;  %v107_v7 = vld [vmem:[%s207_s0 + $0x9] sm:$0x1]   ;;  %v108_v8 = vld [vmem:[%s207_s0 + $0x8] sm:$0x1]  }
   0x5   :  { %s137_s30 = smov 72   ;;  %s138_s2 = smov 64   ;;  %v109_v9 = vld [vmem:[%s207_s0 + $0x7] sm:$0x1]   ;;  %v110_v10 = vld [vmem:[%s207_s0 + $0x6] sm:$0x1]  }
   0x6   :  { %13 = vrot.lane.b32.xlu0 %v102_v2, %s133_s16  ;;  %25 = vrot.lane.b32.xlu1 %v104_v3, %s134_s17  ;;  %s139_s7 = smov 56   ;;  %s140_s8 = smov 48   ;;  %v111_v11 = vld [vmem:[%s207_s0 + $0x5] sm:$0x1]   ;;  %v112_v12 = vld [vmem:[%s207_s0 + $0x4] sm:$0x1]  }
   0x7   :  { %s141_s13 = smov 40   ;;  %s142_s14 = smov 32   ;;  %v113_v13 = vld [vmem:[%s207_s0 + $0x3] sm:$0x1]   ;;  %v114_v14 = vld [vmem:[%s207_s0 + $0x2] sm:$0x1]  }
   0x8   :  { %s143_s19 = smov 24   ;;  %s144_s20 = smov 16   ;;  %v115_v15 = vld [vmem:[%s207_s0 + $0x1] sm:$0x1]   ;;  %vm27_vm4 = vcmask 851712   ;;  %vm33_vm5 = vcmask 786112  }
   0x9   :  { %s145_s0 = smov 8   ;;  %vm39_vm6 = vcmask 720512   ;;  %vm45_vm7 = vcmask 654912   ;;  %vm51_vm8 = vcmask 589312   ;;  %vm57_vm9 = vcmask 523712  }
   0xa   :  { %31 = vrot.lane.b32.xlu0 %v105_v4, %s135_s24  ;;  %37 = vrot.lane.b32.xlu1 %v106_v5, %s136_s25  ;;  %vm63_vm10 = vcmask 458112   ;;  %vm69_vm11 = vcmask 392512   ;;  %vm75_vm12 = vcmask 326912   ;;  %vm81_vm13 = vcmask 261312  }
   0xb   :  { %vm87_vm14 = vcmask 195712   ;;  %vm93_vm15 = vcmask 130112  }
   0xe   :  { %43 = vrot.lane.b32.xlu0 %v107_v7, %s137_s30  ;;  %49 = vrot.lane.b32.xlu1 %v108_v8, %s138_s2 }
  0x12   :  { %55 = vrot.lane.b32.xlu0 %v109_v9, %s139_s7  ;;  %61 = vrot.lane.b32.xlu1 %v110_v10, %s140_s8 }
  0x16   :  { %67 = vrot.lane.b32.xlu0 %v111_v11, %s141_s13  ;;  %73 = vrot.lane.b32.xlu1 %v112_v12, %s142_s14 }
  0x1a   :  { %79 = vrot.lane.b32.xlu0 %v113_v13, %s143_s19  ;;  %85 = vrot.lane.b32.xlu1 %v114_v14, %s144_s20 }
  0x1e   :  { %91 = vrot.lane.b32.xlu0 %v115_v15, %s145_s0 }
  0x74   :  { %v8_v16 = vpop.permute.xlu0 %7   ;;  %v20_v17 = vpop.permute.xlu1 %19  }
  0x75   :  { %10 = vst.msk [vmem:[#allocation0] sm:$0x1] %vm9_vm1, %v8_v16  }
  0x78   :  { %v14_v18 = vpop.permute.xlu0 %13   ;;  %v26_v19 = vpop.permute.xlu1 %25  }
  0x79   :  { %16 = vst.msk [vmem:[#allocation0] sm:$0x1] %vm15_vm2, %v14_v18  }
  0x7a   :  { %22 = vst.msk [vmem:[#allocation0] sm:$0x1] %vm21_vm3, %v20_v17  }
  0x7b   :  { %28 = vst.msk [vmem:[#allocation0] sm:$0x1] %vm27_vm4, %v26_v19  }
  0x7c   :  { %v32_v20 = vpop.permute.xlu0 %31   ;;  %v38_v21 = vpop.permute.xlu1 %37  }
  0x7d   :  { %34 = vst.msk [vmem:[#allocation0] sm:$0x1] %vm33_vm5, %v32_v20  }
  0x7e   :  { %40 = vst.msk [vmem:[#allocation0] sm:$0x1] %vm39_vm6, %v38_v21  }
  0x80   :  { %v44_v22 = vpop.permute.xlu0 %43   ;;  %v50_v23 = vpop.permute.xlu1 %49  }
  0x81   :  { %46 = vst.msk [vmem:[#allocation0] sm:$0x1] %vm45_vm7, %v44_v22  }
  0x82   :  { %52 = vst.msk [vmem:[#allocation0] sm:$0x1] %vm51_vm8, %v50_v23  }
  0x84   :  { %v56_v24 = vpop.permute.xlu0 %55   ;;  %v62_v25 = vpop.permute.xlu1 %61  }
  0x85   :  { %58 = vst.msk [vmem:[#allocation0] sm:$0x1] %vm57_vm9, %v56_v24  }
  0x86   :  { %64 = vst.msk [vmem:[#allocation0] sm:$0x1] %vm63_vm10, %v62_v25  }
  0x88   :  { %v68_v26 = vpop.permute.xlu0 %67   ;;  %v74_v27 = vpop.permute.xlu1 %73  }
  0x89   :  { %70 = vst.msk [vmem:[#allocation0] sm:$0x1] %vm69_vm11, %v68_v26  }
  0x8a   :  { %76 = vst.msk [vmem:[#allocation0] sm:$0x1] %vm75_vm12, %v74_v27  }
  0x8c   :  { %v80_v28 = vpop.permute.xlu0 %79   ;;  %v86_v29 = vpop.permute.xlu1 %85  }
  0x8d   :  { %82 = vst.msk [vmem:[#allocation0] sm:$0x1] %vm81_vm13, %v80_v28  }
  0x8e   :  { %88 = vst.msk [vmem:[#allocation0] sm:$0x1] %vm87_vm14, %v86_v29  }
  0x90   :  { %v92_v30 = vpop.permute.xlu0 %91  }
  0x91   :  { %94 = vst.msk [vmem:[#allocation0] sm:$0x1] %vm93_vm15, %v92_v30  }
  0x98   :  { %v98_v31 = vld [vmem:[#allocation0] sm:$0x1] }
  0x99   :  { %100 = vst [vmem:[%s208_s1] sm:$0x1] %v98_v31 }

// kernel: conv_block_forward.5
= control target key start
LH: loop header
LB: loop body
LE: loop exit
PB: predicated region body
PF: predicated region fallthrough
CT: control target
= control target key end

     0   :  { %s104_s0 = inlined_call_operand.vmem [shape: f32[32,128], index: 0, kind: input, shape index: {}]   ;;  %s105_s1 = inlined_call_operand.vmem [shape: f32[1,128], index: 1, kind: input, shape index: {}]   ;;  %s106_s2 = inlined_call_operand.vmem [shape: f32[1,128], index: 2, kind: input, shape index: {}]   ;;  %s107_s3 = inlined_call_operand.vmem [shape: f32[32,128], index: 3, kind: output, shape index: {}]  }
   0x1   :  { %v14_v0 = vld [vmem:[%s104_s0] sm:$0xff]  ;;  %v15_v4 = vld [vmem:[%s104_s0 + $0x8] sm:$0xff]  ;;  %v16_v5 = vld [vmem:[%s104_s0 + $0x10] sm:$0xff] }
   0x2   :  { %v52_v1 = vld [vmem:[%s105_s1] ss:$0 sm:$0xff]  ;;  %v17_v6 = vld [vmem:[%s104_s0 + $0x18] sm:$0xff] }
   0x3   :  { %v53_v2 = vld [vmem:[%s106_s2] ss:$0 sm:$0xff]  ;;  %v25_v3 = vmul.f32 %v52_v1, %v14_v0  ;;  %v26_v7 = vmul.f32 %v52_v1, %v15_v4  ;;  %v27_v8 = vmul.f32 %v52_v1, %v16_v5  ;;  %v28_v9 = vmul.f32 %v52_v1, %v17_v6 }
   0x5   :  { %v36_v10 = vadd.f32 %v53_v2, %v25_v3  ;;  %v37_v11 = vadd.f32 %v53_v2, %v26_v7  ;;  %v38_v12 = vadd.f32 %v53_v2, %v27_v8  ;;  %v39_v13 = vadd.f32 %v53_v2, %v28_v9 }
   0x7   :  { %v40_v14 = vmax.f32 %v36_v10, 0.0  ;;  %v41_v15 = vmax.f32 %v37_v11, 0.0  ;;  %v42_v16 = vmax.f32 %v38_v12, 0.0  ;;  %v43_v17 = vmax.f32 %v39_v13, 0.0 }
   0x9   :  { %44 = vst [vmem:[%s107_s3] sm:$0xff] %v40_v14  ;;  %45 = vst [vmem:[%s107_s3 + $0x8] sm:$0xff] %v41_v15 }
   0xa   :  { %46 = vst [vmem:[%s107_s3 + $0x10] sm:$0xff] %v42_v16  ;;  %47 = vst [vmem:[%s107_s3 + $0x18] sm:$0xff] %v43_v17 }

// kernel: conv_block_forward.4
= control target key start
LH: loop header
LB: loop body
LE: loop exit
PB: predicated region body
PF: predicated region fallthrough
CT: control target
= control target key end

     0   :  { %s5402_s15 = smov 0   ;;  %s6637_s0 = inlined_call_operand.vmem [shape: bf16[2,342,4], index: 0, kind: input, shape index: {}]   ;;  %s6638_s1 = inlined_call_operand.vmem [shape: bf16[9,4,8], index: 1, kind: input, shape index: {}]   ;;  %s6639_s2 = inlined_call_operand.vmem [shape: f32[288,1], index: 2, kind: input, shape index: {}]   ;;  %s6640_s3 = inlined_call_operand.vmem [shape: f32[2,288,8], index: 3, kind: output, shape index: {0}]   ;;  %s6641_s4 = inlined_call_operand.vmem [shape: f32[2,2,8], index: 4, kind: output, shape index: {1}]  }
   0x1 LB: > { %s4227_s16 = sadd.s32 4294967295, %s5374_s15   ;;  %p4231_p0 = scmp.ge.s32.totalorder %s5374_s15, 1  ;;  %s5374_s15 = sphi %s5402_s15, %s15_s15  }
   0x2   : > { %p165_p1 = scmp.lt.s32.totalorder %s5374_s15, 3 }
   0x4   : > { %p166_p2 = pnand %p4231_p0, %p165_p1 }
   0x5   : > { %vm547_vm0 = vcmask (!%p166_p2), 1041408   ;;  %v4349_v0 = vld [vmem:[%s6638_s1 + $0x8] sm:$0x3] (!%p166_p2)  ;;  %v4235_v1 = vld [vmem:[%s6638_s1 + $0x2] sm:$0x3] (!%p166_p2)  ;;  %p195_p3 = scmp.lt.s32.totalorder (!%p166_p2), %s4227_s16, 1 }
   0x6   : > { %169 = sbr.rel (%p166_p2) target bundleno = 593 (0x251), region = 32  ;;  %5276 = vmatprep.subr.msk.bf16.mxu0 (!%p166_p2), %vm547_vm0, %v4349_v0  ;;  %5272 = vmatprep.subr.msk.bf16.mxu1 (!%p166_p2), %vm547_vm0, %v4235_v1  ;;  %v5419_v2 = vsel (!%p166_p2), %vm547_vm0, %v4349_v0, 0  ;;  %v549_v3 = vsel (!%p166_p2), %vm547_vm0, %v4235_v1, 0  ;;  %v4369_v4 = vld [vmem:[%s6638_s1 + $0xa] sm:$0x3] (!%p166_p2)  ;;  %vm492_vm2 = vcmask (!%p166_p2), 31744  }
   0x7   : > { %4793 = vmatpush3.bf16.msra.mxu0 (!%p166_p2), %v5419_v2  ;;  %4641 = vmatpush3.bf16.msra.mxu1 (!%p166_p2), %v549_v3  ;;  %v246_v5 = vld [vmem:[%s6638_s1] sm:$0x3] (!%p166_p2)  ;;  %vm343_vm1 = vsmask.f32 (!%p166_p2), 7424  ;;  %v5440_v6 = vsel (!%p166_p2), %vm547_vm0, %v4369_v4, 0  ;;  %vm2150_vm4 = vcmask (!%p166_p2), 1045504  }
   0x8   : > { %5278 = vmatprep.subr.msk.bf16.mxu0 (!%p166_p2), %vm547_vm0, %v4369_v4  ;;  %5273 = vmatprep.subr.msk.bf16.mxu1 (!%p166_p2), %vm547_vm0, %v246_v5  ;;  %vm1703_vm3 = vsmask.f32 (!%p166_p2), 6400  ;;  %v765_v12 = vsel (!%p166_p2), %vm547_vm0, %v246_v5, 0  ;;  %v5488_v39 = vld [vmem:[%s6638_s1 + $0x4] sm:$0x3] (!%p166_p2)  ;;  %vm950_vm5 = vcmask (!%p166_p2), 1046528  }
   0x9   : > { %v5522_v1 = vld [vmem:[%s6638_s1 + $0xc] sm:$0x3] (!%p166_p2)  ;;  %vm2903_vm6 = vsmask.f32 (!%p166_p2), 5376  ;;  %vm3350_vm7 = vcmask (!%p166_p2), 1044480   ;;  %vm3910_vm8 = vcmask (!%p166_p2), 64512  }
   0xa   : > { %vm4137_vm9 = vcmask (!%p166_p2), 1040384   ;;  %vm4139_vm10 = vcmask (!%p166_p2), 58368  }
   0xd   : > { %s6643_s16 = smov (!%p195_p3, %s4227_s16), 1 }
   0xe   : > { %s5282_s25 = smul.u32 172, %s6643_s16  ;;  %s4234_s23 = sshll.u32 %s6643_s16, 1 }
   0xf   : > { %s208_s26 = scalar_lea.vmem %s6641_s4, %s4234_s23 }
  0x10   : > { %s5437_s28 = scalar_lea.vmem %s6637_s0, %s5282_s25 }
  0x11   : > { %v210_v7 = vld [vmem:[%s5437_s28] sm:$0xf]  ;;  %v5444_v8 = vld [vmem:[%s5437_s28 + $0x4] sm:$0xf]  ;;  %v5450_v10 = vld [vmem:[%s5437_s28 + $0x8] sm:$0xff]  }
  0x12   : > { %v5447_v9 = vcombine.low %v210_v7, %v5444_v8  ;;  %v1258_v11 = vld [vmem:[%s5437_s28 + $0x8] sm:$0xe]  ;;  %v5455_v13 = vld [vmem:[%s5437_s28 + $0xc] sm:$0xf]  ;;  %v352_v16 = vshll.u32 %v5450_v10, 16  ;;  %v356_v17 = vshrl.u32 %v5450_v10, 16 }
  0x13   : > { %v5462_v18 = vld [vmem:[%s5437_s28 + $0x10] sm:$0xff]   ;;  %v5468_v20 = vcombine.low %v1258_v11, %v5455_v13  ;;  %v5476_v28 = vld [vmem:[%s5437_s28 + $0x18] sm:$0xff]   ;;  %v5482_v34 = vld [vmem:[%s5437_s28 + $0x20] sm:$0xff]  }
  0x14   : > { %v345_v14 = vshrl.u32 %v5447_v9, 16  ;;  %v347_v15 = vshll.u32 %v5447_v9, 16  ;;  %v5465_v19 = vld [vmem:[%s5437_s28 + $0x10] sm:$0xff]   ;;  %v354_v22 = vrot.slane %v352_v16, 1  ;;  %v1713_v23 = vshrl.u32 %v5462_v18, 16  ;;  %v5479_v33 = vld [vmem:[%s5437_s28 + $0x18] sm:$0xff]  }
  0x15   : > { %v1716_v24 = vshll.u32 %v5462_v18, 16  ;;  %v1705_v25 = vshrl.u32 %v5468_v20, 16  ;;  %v1708_v26 = vshll.u32 %v5468_v20, 16  ;;  %v360_v27 = vshll.u32 %v5465_v19, 16  ;;  %v5497_v48 = vld [vmem:[%s5437_s28 + $0x20] sm:$0xff]   ;;  %v5500_v49 = vld [vmem:[%s5437_s28 + $0x28] sm:$0xff]  }
  0x16   : > { %v349_v21 = vrot.slane %v347_v15, 1  ;;  %v358_v30 = vor.u32 %v356_v17, %v354_v22  ;;  %v1715_v31 = vrot.slane %v1713_v23, 1  ;;  %v1722_v38 = vshrl.u32 %v5476_v28, 16  ;;  %v5506_v54 = vld [vmem:[%s5437_s28 + $0x28] sm:$0xff]   ;;  %v5512_v59 = vld [vmem:[%s5437_s28 + $0x30] sm:$0xff]   ;;  %v5536_v23 = vld [vmem:[%s5437_s28 + $0x38] sm:$0xff]  }
  0x17   : > { %v1718_v32 = vrot.slane %v1716_v24, 2  ;;  %v1707_v35 = vrot.slane %v1705_v25, 1  ;;  %v1710_v36 = vrot.slane %v1708_v26, 2  ;;  %v362_v37 = vrot.slane %v360_v27, 1  ;;  %v5517_v0 = vld [vmem:[%s5437_s28 + $0x30] sm:$0xff]  }
  0x18   : > { %v350_v29 = vor.u32 %v349_v21, %v345_v14  ;;  %v1725_v42 = vshll.u32 %v5476_v28, 16  ;;  %v364_v43 = vshrl.u32 %v5465_v19, 16  ;;  %v1724_v46 = vrot.slane %v1722_v38, 1 }
  0x19   : > { %v1719_v41 = vor.u32 %v1718_v32, %v1715_v31  ;;  %v1711_v44 = vor.u32 %v1710_v36, %v1707_v35  ;;  %v363_v45 = vsel %vm343_vm1, %v358_v30, %v362_v37  ;;  %v368_v47 = vshll.u32 %v5479_v33, 16  ;;  %v5545_v35 = vld [vmem:[%s5437_s28 + $0x38] sm:$0xff]  }
  0x1a   : > { %v355_v40 = vsel %vm343_vm1, %v350_v29, %v354_v22  ;;  %v1727_v50 = vrot.slane %v1725_v42, 2  ;;  %v366_v51 = vor.u32 %v364_v43, %v362_v37  ;;  %v1731_v52 = vshrl.u32 %v5482_v34, 16 }
  0x1b   : > { %4642 = vmatprep.mubr.msk.bf16.mxu1 %vm492_vm2, %v355_v40  ;;  %v1734_v53 = vshll.u32 %v5482_v34, 16  ;;  %v1720_v55 = vsel %vm1703_vm3, %v1711_v44, %v1719_v41  ;;  %v370_v56 = vrot.slane %v368_v47, 1  ;;  %v372_v57 = vshrl.u32 %v5479_v33, 16  ;;  %v5556_v44 = vld [vmem:[%s5437_s28 + $0x40] sm:$0xff]  }
  0x1c   : > { %4643 = vmatmul.mubr.msk.bf16.vlgmr.msra.gmra.mrb[0].mxu1 %vm492_vm2, %v363_v45  ;;  %v376_v58 = vshll.u32 %v5497_v48, 16  ;;  %4794 = vmatprep.mubr.msk.bf16.mxu0 %vm492_vm2, %v1720_v55  ;;  %v1728_v60 = vor.u32 %v1727_v50, %v1724_v46  ;;  %v1733_v61 = vrot.slane %v1731_v52, 1  ;;  %v1740_v63 = vshrl.u32 %v5500_v49, 16 }
  0x1d   : > { %4679 = vmatpush3.bf16.msra.mxu1 %v765_v12  ;;  %v1736_v62 = vrot.slane %v1734_v53, 2  ;;  %v371_v3 = vsel %vm343_vm1, %v366_v51, %v370_v56  ;;  %v374_v4 = vor.u32 %v372_v57, %v370_v56  ;;  %v1743_v7 = vshll.u32 %v5500_v49, 16  ;;  %v5561_v51 = vld [vmem:[%s5437_s28 + $0x40] sm:$0xff]  }
  0x1e   : > { %5274 = vmatprep.subr.msk.bf16.mxu1 %vm547_vm0, %v5488_v39  ;;  %v378_v5 = vrot.slane %v376_v58, 1  ;;  %v1729_v11 = vsel %vm1703_vm3, %v1719_v41, %v1728_v60  ;;  %4646 = vmatprep.mubr.msk.bf16.mxu1 %vm492_vm2, %v371_v3  ;;  %v1742_v14 = vrot.slane %v1740_v63, 1  ;;  %v380_v15 = vshrl.u32 %v5497_v48, 16  ;;  %v5572_v63 = vld [vmem:[%s5437_s28 + $0x48] sm:$0xff]  }
  0x1f   : > { %v1737_v12 = vor.u32 %v1736_v62, %v1733_v61  ;;  %4795 = vmatmul.mubr.msk.bf16.vlgmr.msra.gmra.mrb[0].mxu0 %vm492_vm2, %v1729_v11  ;;  %v1745_v17 = vrot.slane %v1743_v7, 2  ;;  %v384_v21 = vshll.u32 %v5506_v54, 16  ;;  %v1749_v22 = vshrl.u32 %v5512_v59, 16  ;;  %v5569_v62 = vld [vmem:[%s5437_s28 + $0x48] sm:$0xff]  }
  0x20   : > { %v379_v16 = vsel %vm343_vm1, %v374_v4, %v378_v5  ;;  %4831 = vmatpush3.bf16.msra.mxu0 %v5440_v6  ;;  %v382_v25 = vor.u32 %v380_v15, %v378_v5  ;;  %v1752_v26 = vshll.u32 %v5512_v59, 16  ;;  %v388_v27 = vshrl.u32 %v5506_v54, 16 }
  0x21   : > { %v1738_v24 = vsel %vm1703_vm3, %v1728_v60, %v1737_v12  ;;  %v1746_v29 = vor.u32 %v1745_v17, %v1742_v14  ;;  %v386_v30 = vrot.slane %v384_v21, 1  ;;  %v1751_v31 = vrot.slane %v1749_v22, 1  ;;  %5279 = vmatprep.subr.msk.bf16.mxu0 %vm547_vm0, %v5522_v1  ;;  %v5581_v14 = vld [vmem:[%s5437_s28 + $0x50] sm:$0xff]  }
  0x22   : > { %4798 = vmatprep.mubr.msk.bf16.mxu0 %vm492_vm2, %v1738_v24  ;;  %v392_v32 = vshll.u32 %v5517_v0, 16  ;;  %v1754_v6 = vrot.slane %v1752_v26, 2  ;;  %v1758_v36 = vshrl.u32 %v5536_v23, 16  ;;  %v1761_v37 = vshll.u32 %v5536_v23, 16 }
  0x23   : > { %v396_v38 = vshrl.u32 %v5517_v0, 16  ;;  %v1747_v40 = vsel %vm1703_vm3, %v1737_v12, %v1746_v29  ;;  %v387_v41 = vsel %vm343_vm1, %v382_v25, %v386_v30  ;;  %v390_v42 = vor.u32 %v388_v27, %v386_v30  ;;  %v5589_v25 = vld [vmem:[%s5437_s28 + $0x50] sm:$0xff]  }
  0x24   : > { %4647 = vmatmul.mubr.msk.bf16.gmra.mrb[4].mxu1 %vm492_vm2, %v379_v16  ;;  %v394_v43 = vrot.slane %v392_v32, 1  ;;  %v1755_v45 = vor.u32 %v1754_v6, %v1751_v31  ;;  %v1760_v46 = vrot.slane %v1758_v36, 1  ;;  %v1763_v47 = vrot.slane %v1761_v37, 2 }
  0x25   : > { %4650 = vmatprep.mubr.msk.bf16.mxu1 %vm492_vm2, %v387_v41  ;;  %v400_v50 = vshll.u32 %v5545_v35, 16  ;;  %v1767_v55 = vshrl.u32 %v5556_v44, 16  ;;  %v1770_v56 = vshll.u32 %v5556_v44, 16  ;;  %v404_v61 = vshrl.u32 %v5545_v35, 16  ;;  %v5599_v41 = vld [vmem:[%s5437_s28 + $0x58] sm:$0xff]  }
  0x26   : > { %v395_v52 = vsel %vm343_vm1, %v390_v42, %v394_v43  ;;  %v398_v53 = vor.u32 %v396_v38, %v394_v43  ;;  %v1756_v57 = vsel %vm1703_vm3, %v1746_v29, %v1755_v45  ;;  %v1764_v58 = vor.u32 %v1763_v47, %v1760_v46  ;;  %v5594_v29 = vld [vmem:[%s5437_s28 + $0x58] sm:$0xff]  }
  0x27   : > { %v402_v60 = vrot.slane %v400_v50, 1  ;;  %4799 = vmatmul.mubr.msk.bf16.gmra.mrb[4].mxu0 %vm492_vm2, %v1747_v40  ;;  %v1769_v3 = vrot.slane %v1767_v55, 1  ;;  %v1772_v4 = vrot.slane %v1770_v56, 2  ;;  %v408_v5 = vshll.u32 %v5561_v51, 16 }
  0x28   : > { %v412_v7 = vshrl.u32 %v5561_v51, 16  ;;  %4802 = vmatprep.mubr.msk.bf16.mxu0 %vm492_vm2, %v1756_v57  ;;  %v1776_v12 = vshrl.u32 %v5569_v62, 16  ;;  %v1779_v16 = vshll.u32 %v5569_v62, 16  ;;  %v416_v17 = vshll.u32 %v5572_v63, 16  ;;  %v2144_v57 = vld [vmem:[%s5437_s28 + $0x8] sm:$0xc] }
  0x29   : > { %v403_v11 = vsel %vm343_vm1, %v398_v53, %v402_v60  ;;  %v1773_v15 = vor.u32 %v1772_v4, %v1769_v3  ;;  %v410_v21 = vrot.slane %v408_v5, 1  ;;  %v1785_v22 = vshrl.u32 %v5581_v14, 16 }
  0x2a   : > { %v1788_v24 = vshll.u32 %v5581_v14, 16  ;;  %v1765_v26 = vsel %vm1703_vm3, %v1755_v45, %v1764_v58  ;;  %v406_v27 = vor.u32 %v404_v61, %v402_v60  ;;  %v1778_v30 = vrot.slane %v1776_v12, 1 }
  0x2b   : > { %v1781_v31 = vrot.slane %v1779_v16, 2  ;;  %v414_v32 = vor.u32 %v412_v7, %v410_v21  ;;  %v418_v6 = vrot.slane %v416_v17, 1  ;;  %v1774_v36 = vsel %vm1703_vm3, %v1764_v58, %v1773_v15  ;;  %v5613_v58 = vld [vmem:[%s5437_s28 + $0x60] sm:$0xff]  }
  0x2c   : > { %4651 = vmatmul.mubr.msk.bf16.gmra.mrb[8].mxu1 %vm492_vm2, %v395_v52  ;;  %v1787_v37 = vrot.slane %v1785_v22, 1  ;;  %v1790_v38 = vrot.slane %v1788_v24, 2  ;;  %v424_v40 = vshll.u32 %v5589_v25, 16  ;;  %v411_v42 = vsel %vm343_vm1, %v406_v27, %v410_v21 }
  0x2d   : > { %4654 = vmatprep.mubr.msk.bf16.mxu1 %vm492_vm2, %v403_v11  ;;  %v420_v43 = vshrl.u32 %v5572_v63, 16  ;;  %v1794_v45 = vshrl.u32 %v5594_v29, 16  ;;  %v1797_v46 = vshll.u32 %v5594_v29, 16  ;;  %v1782_v47 = vor.u32 %v1781_v31, %v1778_v30  ;;  %v5618_v11 = vld [vmem:[%s5437_s28 + $0x68] sm:$0xff]  }
  0x2e   : > { %v419_v50 = vsel %vm343_vm1, %v414_v32, %v418_v6  ;;  %v428_v52 = vshrl.u32 %v5589_v25, 16  ;;  %v432_v53 = vshll.u32 %v5599_v41, 16  ;;  %v1791_v55 = vor.u32 %v1790_v38, %v1787_v37  ;;  %v5635_v32 = vld [vmem:[%s5437_s28 + $0x70] sm:$0xff]  }
  0x2f   : > { %4803 = vmatmul.mubr.msk.bf16.gmra.mrb[8].mxu0 %vm492_vm2, %v1765_v26  ;;  %v426_v56 = vrot.slane %v424_v40, 1  ;;  %v422_v60 = vor.u32 %v420_v43, %v418_v6  ;;  %v1796_v61 = vrot.slane %v1794_v45, 1  ;;  %v1799_v3 = vrot.slane %v1797_v46, 2  ;;  %v5641_v40 = vld [vmem:[%s5437_s28 + $0x78] sm:$0xff]  }
  0x30   : > { %4806 = vmatprep.mubr.msk.bf16.mxu0 %vm492_vm2, %v1774_v36  ;;  %v1783_v4 = vsel %vm1703_vm3, %v1773_v15, %v1782_v47  ;;  %v434_v7 = vrot.slane %v432_v53, 1  ;;  %v1792_v12 = vsel %vm1703_vm3, %v1782_v47, %v1791_v55  ;;  %v4370_v16 = vcombine.low %v2144_v57, %v5455_v13 }
  0x31   : > { %v430_v5 = vor.u32 %v428_v52, %v426_v56  ;;  %v440_v17 = vshll.u32 %v5613_v58, 16  ;;  %v427_v21 = vsel %vm343_vm1, %v422_v60, %v426_v56  ;;  %v436_v22 = vshrl.u32 %v5599_v41, 16  ;;  %v5656_v56 = vld [vmem:[%s5437_s28 + $0x80] sm:$0xff]  }
  0x32   : > { %v5627_v15 = vor.u32 %v1799_v3, %v1796_v61  ;;  %v444_v26 = vshrl.u32 %v5613_v58, 16  ;;  %v448_v27 = vshll.u32 %v5618_v11, 16  ;;  %v2151_v13 = vrot.slane %v4370_v16, 2 }
  0x33   : > { %v435_v24 = vsel %vm343_vm1, %v430_v5, %v434_v7  ;;  %v2152_v30 = vrot.slane %v5462_v18, 2  ;;  %v442_v31 = vrot.slane %v440_v17, 1  ;;  %v438_v6 = vor.u32 %v436_v22, %v434_v7 }
  0x34   : > { %4655 = vmatmul.mubr.msk.bf16.gmra.mrb[12].mxu1 %vm492_vm2, %v411_v42  ;;  %v1801_v36 = vsel %vm1703_vm3, %v1791_v55, %v5627_v15  ;;  %v450_v38 = vrot.slane %v448_v27, 1  ;;  %v456_v18 = vshll.u32 %v5635_v32, 16  ;;  %v2154_v45 = vrot.slane %v5476_v28, 2  ;;  %v5686_v27 = vld [vmem:[%s5437_s28 + $0x90] ss:$0 sps:$4 sm:$0x11]  }
  0x35   : > { %4658 = vmatprep.mubr.msk.bf16.mxu1 %vm492_vm2, %v419_v50  ;;  %v446_v37 = vor.u32 %v444_v26, %v442_v31  ;;  %v2153_v42 = vsel %vm2150_vm4, %v2151_v13, %v2152_v30  ;;  %v443_v43 = vsel %vm343_vm1, %v438_v6, %v442_v31  ;;  %v452_v46 = vshrl.u32 %v5618_v11, 16 }
  0x36   : > { %v460_v50 = vshrl.u32 %v5635_v32, 16  ;;  %v464_v52 = vshll.u32 %v5641_v40, 16  ;;  %v2156_v53 = vrot.slane %v5482_v34, 2  ;;  %v458_v55 = vrot.slane %v456_v18, 1  ;;  %v5669_v34 = vld [vmem:[%s6638_s1 + $0xe] sm:$0x3] }
  0x37   : > { %4807 = vmatmul.mubr.msk.bf16.gmra.mrb[12].mxu0 %vm492_vm2, %v1783_v4  ;;  %v451_v47 = vsel %vm343_vm1, %v446_v37, %v450_v38  ;;  %v2682_v28 = vsel %vm547_vm0, %v5522_v1, 0  ;;  %v454_v57 = vor.u32 %v452_v46, %v450_v38  ;;  %v2155_v60 = vsel %vm2150_vm4, %v2152_v30, %v2154_v45  ;;  %v5663_v4 = vld [vmem:[%s5437_s28 + $0x88] sm:$0xff]  }
  0x38   : > { %4810 = vmatprep.mubr.msk.bf16.mxu0 %vm492_vm2, %v1792_v12  ;;  %v462_v61 = vor.u32 %v460_v50, %v458_v55  ;;  %v466_v3 = vrot.slane %v464_v52, 1  ;;  %v2157_v5 = vsel %vm2150_vm4, %v2154_v45, %v2156_v53  ;;  %v472_v7 = vshll.u32 %v5656_v56, 16 }
  0x39   : > { %v459_v1 = vsel %vm343_vm1, %v454_v57, %v458_v55  ;;  %v2158_v12 = vrot.slane %v5500_v49, 2  ;;  %v468_v16 = vshrl.u32 %v5641_v40, 16  ;;  %v480_v22 = vshll.u32 %v5663_v4, 16  ;;  %v5713_v55 = vld [vmem:[%s5437_s28 + $0x60] sm:$0xff]   ;;  %v5732_v57 = vld [vmem:[%s5437_s28 + $0x68] sm:$0xff]  }
  0x3a   : > { %v467_v17 = vsel %vm343_vm1, %v462_v61, %v466_v3  ;;  %v474_v26 = vrot.slane %v472_v7, 1  ;;  %v488_v37 = vshll.u32 %v5686_v27, 16  ;;  %v2162_v38 = vrot.slane %v5536_v23, 2  ;;  %v5750_v7 = vld [vmem:[%s5437_s28 + $0x78] sm:$0xff]  }
  0x3b   : > { %v470_v49 = vor.u32 %v468_v16, %v466_v3  ;;  %v2159_v13 = vsel %vm2150_vm4, %v2156_v53, %v2158_v12  ;;  %v482_v31 = vrot.slane %v480_v22, 1  ;;  %v2164_v18 = vrot.slane %v5556_v44, 2  ;;  %v5766_v22 = vld [vmem:[%s5437_s28 + $0x88] sm:$0xff]  }
  0x3c   : > { %4659 = vmatmul.mubr.msk.bf16.gmra.mrb[16].mxu1 %vm492_vm2, %v427_v21  ;;  %v476_v21 = vshrl.u32 %v5656_v56, 16  ;;  %v490_v45 = vrot.slane %v488_v37, 1  ;;  %v2166_v23 = vrot.slane %v5569_v62, 2  ;;  %v2168_v44 = vrot.slane %v5581_v14, 2 }
  0x3d   : > { %4662 = vmatprep.mubr.msk.bf16.mxu1 %vm492_vm2, %v435_v24  ;;  %v2160_v24 = vrot.slane %v5512_v59, 2  ;;  %v475_v59 = vsel %vm343_vm1, %v470_v49, %v474_v26  ;;  %v2170_v62 = vrot.slane %v5594_v29, 2  ;;  %v1043_v14 = vsel %vm547_vm0, %v5488_v39, 0 }
  0x3e   : > { %v478_v30 = vor.u32 %v476_v21, %v474_v26  ;;  %v2167_v52 = vsel %vm2150_vm4, %v2164_v18, %v2166_v23  ;;  %v2169_v53 = vsel %vm2150_vm4, %v2166_v23, %v2168_v44  ;;  %v2174_v61 = vrot.slane %v5732_v57, 2  ;;  %v5770_v26 = vld [vmem:[%s5437_s28 + $0x90] sm:$0xff]  }
  0x3f   : > { %4811 = vmatmul.mubr.msk.bf16.gmra.mrb[16].mxu0 %vm492_vm2, %v1801_v36  ;;  %v2161_v6 = vsel %vm2150_vm4, %v2158_v12, %v2160_v24  ;;  %v484_v36 = vshrl.u32 %v5663_v4, 16  ;;  %v2163_v46 = vsel %vm2150_vm4, %v2160_v24, %v2162_v38  ;;  %v2171_v29 = vsel %vm2150_vm4, %v2168_v44, %v2170_v62  ;;  %v5754_v12 = vld [vmem:[%s5437_s28 + $0x80] sm:$0xff]  }
  0x40   : > { %4832 = vmatprep.mubr.msk.bf16.mxu0 %vm492_vm2, %v2153_v42  ;;  %v483_v42 = vsel %vm343_vm1, %v478_v30, %v482_v31  ;;  %v2178_v16 = vrot.slane %v5750_v7, 2  ;;  %v2182_v49 = vrot.slane %v5766_v22, 2  ;;  %v2458_v30 = vld [vmem:[%s5437_s28 + $0x10] sm:$0xc] }
  0x44   : > { %4663 = vmatmul.mubr.msk.bf16.gmra.mrb[20].mxu1 %vm492_vm2, %v443_v43  ;;  %v486_v43 = vor.u32 %v484_v36, %v482_v31  ;;  %v5780_v31 = vld [vmem:[%s5437_s28 + $0x14] sm:$0xf] }
  0x45   : > { %4666 = vmatprep.mubr.msk.bf16.mxu1 %vm492_vm2, %v451_v47  ;;  %v2165_v47 = vsel %vm2150_vm4, %v2162_v38, %v2164_v18  ;;  %v5790_v37 = vcombine.low %v2458_v30, %v5780_v31  ;;  %v5793_v38 = vld [vmem:[%s5437_s28 + $0x18] sm:$0xff]  }
  0x46   : > { %v491_v50 = vsel %vm343_vm1, %v486_v43, %v490_v45  ;;  %v2591_v43 = vrot.slane %v5793_v38, 2 }
  0x47   : > { %4833 = vmatmul.mubr.msk.bf16.vlgmr.msra.gmra.mrb[0].mxu0 %vm492_vm2, %v2155_v60  ;;  %v5738_v60 = vld [vmem:[%s5437_s28 + $0x70] sm:$0xff]   ;;  %v2590_v18 = vrot.slane %v5790_v37, 2 }
  0x48   : > { %4869 = vmatpush3.bf16.msra.mxu0 %v2682_v28  ;;  %4836 = vmatprep.mubr.msk.bf16.mxu0 %vm492_vm2, %v2157_v5  ;;  %v2172_v28 = vrot.slane %v5713_v55, 2  ;;  %v2176_v3 = vrot.slane %v5738_v60, 2 }
  0x49   : > { %5280 = vmatprep.subr.msk.bf16.mxu0 %vm547_vm0, %v5669_v34 }
  0x4a   : > { %v2173_v39 = vsel %vm2150_vm4, %v2170_v62, %v2172_v28  ;;  %v2175_v5 = vsel %vm2150_vm4, %v2172_v28, %v2174_v61  ;;  %v2179_v21 = vsel %vm2150_vm4, %v2176_v3, %v2178_v16  ;;  %v3129_v62 = vsel %vm547_vm0, %v5669_v34, 0  ;;  %v5828_v28 = vld [vmem:[%s5437_s28 + $0x38] sm:$0xff]  }
  0x4c   : > { %4667 = vmatmul.mubr.msk.bf16.gmra.mrb[24].mxu1 %vm492_vm2, %v459_v1  ;;  %v2177_v1 = vsel %vm2150_vm4, %v2174_v61, %v2176_v3  ;;  %v2599_v61 = vrot.slane %v5828_v28, 2  ;;  %v5847_v3 = vld [vmem:[%s5437_s28 + $0x40] sm:$0xff]  }
  0x4d   : > { %4670 = vmatprep.mubr.msk.bf16.mxu1 %vm492_vm2, %v467_v17  ;;  %v2180_v17 = vrot.slane %v5754_v12, 2 }
  0x4f   : > { %4837 = vmatmul.mubr.msk.bf16.gmra.mrb[4].mxu0 %vm492_vm2, %v2159_v13  ;;  %v2181_v24 = vsel %vm2150_vm4, %v2178_v16, %v2180_v17  ;;  %v2184_v13 = vrot.slane %v5770_v26, 2  ;;  %v944_v16 = vld [vmem:[%s5437_s28] sm:$0xe] }
  0x50   : > { %4840 = vmatprep.mubr.msk.bf16.mxu0 %vm492_vm2, %v2161_v6  ;;  %v2183_v6 = vsel %vm2150_vm4, %v2180_v17, %v2182_v49  ;;  %v2601_v17 = vrot.slane %v5847_v3, 2 }
  0x51   : > { %v2185_v36 = vsel %vm2150_vm4, %v2182_v49, %v2184_v13 }
  0x52   : > { %v2602_v49 = vsel %vm2150_vm4, %v2599_v61, %v2601_v17 }
  0x54   : > { %4671 = vmatmul.mubr.msk.bf16.gmra.mrb[28].mxu1 %vm492_vm2, %v475_v59  ;;  %v5786_v59 = vld [vmem:[%s5437_s28 + $0x98] ss:$0 sps:$4 sm:$0x33]  }
  0x55   : > { %4674 = vmatprep.mubr.msk.bf16.mxu1 %vm492_vm2, %v483_v42  ;;  %v2186_v42 = vrot.slane %v5786_v59, 2 }
  0x57   : > { %4841 = vmatmul.mubr.msk.bf16.gmra.mrb[8].mxu0 %vm492_vm2, %v2163_v46  ;;  %v2187_v45 = vsel %vm2150_vm4, %v2184_v13, %v2186_v42  ;;  %v5806_v46 = vld [vmem:[%s5437_s28 + $0x20] sm:$0xff]   ;;  %v5865_v13 = vld [vmem:[%s5437_s28 + $0x50] sm:$0xff]  }
  0x58   : > { %4844 = vmatprep.mubr.msk.bf16.mxu0 %vm492_vm2, %v2165_v47  ;;  %v2592_v47 = vsel %vm2150_vm4, %v2590_v18, %v2591_v43  ;;  %v2593_v23 = vrot.slane %v5806_v46, 2  ;;  %v2605_v42 = vrot.slane %v5865_v13, 2 }
  0x5c   : > { %4675 = vmatmul.mubr.msk.bf16.gmra.mrb[32].mxu1 %vm492_vm2, %v491_v50  ;;  %v5810_v50 = vld [vmem:[%s5437_s28 + $0x28] sm:$0xff]  }
  0x5d   : > { %4680 = vmatprep.mubr.msk.bf16.mxu1 %vm492_vm2, %v5447_v9  ;;  %v5724_v9 = vld [vmem:[%s6638_s1 + $0x6] sm:$0x3]  ;;  %v2595_v44 = vrot.slane %v5810_v50, 2 }
  0x5f   : > { %4845 = vmatmul.mubr.msk.bf16.gmra.mrb[12].mxu0 %vm492_vm2, %v2167_v52  ;;  %v2594_v52 = vsel %vm2150_vm4, %v2591_v43, %v2593_v23 }
  0x60   : > { %4848 = vmatprep.mubr.msk.bf16.mxu0 %vm492_vm2, %v2169_v53  ;;  %v5822_v53 = vld [vmem:[%s5437_s28 + $0x30] sm:$0xff]  }
  0x64   : > { %4681 = vmatmul.mubr.msk.bf16.vlgmr.msra.gmra.mrb[0].mxu1 %vm492_vm2, %v5450_v10 }
  0x65   : > { %4684 = vmatprep.mubr.msk.bf16.mxu1 %vm492_vm2, %v5465_v19  ;;  %4717 = vmatpush3.bf16.msra.mxu1 %v1043_v14  ;;  %v2596_v14 = vsel %vm2150_vm4, %v2593_v23, %v2595_v44  ;;  %v956_v23 = vrot.slane %v5479_v33, 1 }
  0x66   : > { %5275 = vmatprep.subr.msk.bf16.mxu1 %vm547_vm0, %v5724_v9 }
  0x67   : > { %4849 = vmatmul.mubr.msk.bf16.gmra.mrb[16].mxu0 %vm492_vm2, %v2171_v29  ;;  %v5833_v29 = vld [vmem:[%s6638_s1 + $0x10] sm:$0x3] }
  0x68   : > { %4852 = vmatprep.mubr.msk.bf16.mxu0 %vm492_vm2, %v2173_v39  ;;  %v2597_v39 = vrot.slane %v5822_v53, 2 }
  0x6a   : > { %v2598_v34 = vsel %vm2150_vm4, %v2595_v44, %v2597_v39 }
  0x6c   : > { %4685 = vmatmul.mubr.msk.bf16.gmra.mrb[4].mxu1 %vm492_vm2, %v5479_v33 }
  0x6d   : > { %4688 = vmatprep.mubr.msk.bf16.mxu1 %vm492_vm2, %v5497_v48 }
  0x6f   : > { %4853 = vmatmul.mubr.msk.bf16.gmra.mrb[20].mxu0 %vm492_vm2, %v2175_v5  ;;  %v2600_v5 = vsel %vm2150_vm4, %v2597_v39, %v2599_v61  ;;  %v1482_v39 = vsel %vm547_vm0, %v5724_v9, 0  ;;  %v5376_v61 = vmov 0   ;;  %v5357_v9 = vld [vmem:[%s6638_s1 + $0x8] sm:$0x3] }
  0x70   : > { %4856 = vmatprep.mubr.msk.bf16.mxu0 %vm492_vm2, %v2177_v1  ;;  %v5851_v1 = vld [vmem:[%s5437_s28 + $0x48] sm:$0xff]   ;;  %5293 = vset.pattern.permute.xlu0 %v5376_v61 }
  0x71   : > { %5294 = vset.pattern.permute.xlu1 %v5376_v61  ;;  %v3664_v61 = vld [vmem:[%s6639_s2 + $0x30] sm:$0xff] }
  0x74   : > { %4689 = vmatmul.mubr.msk.bf16.gmra.mrb[8].mxu1 %vm492_vm2, %v5506_v54 }
  0x75   : > { %4692 = vmatprep.mubr.msk.bf16.mxu1 %vm492_vm2, %v5517_v0 }
  0x77   : > { %4857 = vmatmul.mubr.msk.bf16.gmra.mrb[24].mxu0 %vm492_vm2, %v2179_v21  ;;  %v4292_v21 = vcombine.low %v944_v16, %v5444_v8  ;;  %v5870_v8 = vld [vmem:[%s5437_s28 + $0x58] sm:$0xff]   ;;  %v5903_v16 = vld [vmem:[%s5437_s28 + $0x70] sm:$0xff]  }
  0x78   : > { %4860 = vmatprep.mubr.msk.bf16.mxu0 %vm492_vm2, %v2181_v24  ;;  %v2603_v24 = vrot.slane %v5851_v1, 2  ;;  %v2607_v43 = vrot.slane %v5870_v8, 2 }
  0x79   : > { %v951_v30 = vrot.slane %v4292_v21, 1 }
  0x7a   : > { %v2608_v44 = vsel %vm2150_vm4, %v2605_v42, %v2607_v43 }
  0x7c   : > { %4693 = vmatmul.mubr.msk.bf16.gmra.mrb[12].mxu1 %vm492_vm2, %v5545_v35 }
  0x7d   : > { %4696 = vmatprep.mubr.msk.bf16.mxu1 %vm492_vm2, %v5561_v51 }
  0x7f   : > { %4861 = vmatmul.mubr.msk.bf16.gmra.mrb[28].mxu0 %vm492_vm2, %v2183_v6  ;;  %v952_v6 = vrot.slane %v5450_v10, 1  ;;  %v954_v10 = vrot.slane %v5465_v19, 1 }
  0x80   : > { %4864 = vmatprep.mubr.msk.bf16.mxu0 %vm492_vm2, %v2185_v36  ;;  %v2604_v36 = vsel %vm2150_vm4, %v2601_v17, %v2603_v24  ;;  %v960_v17 = vrot.slane %v5506_v54, 1  ;;  %v3660_v54 = vld [vmem:[%s6639_s2 + $0x10] sm:$0xff] }
  0x81   : > { %v953_v18 = vsel %vm950_vm5, %v951_v30, %v952_v6  ;;  %v957_v19 = vsel %vm950_vm5, %v954_v10, %v956_v23  ;;  %v2613_v30 = vrot.slane %v5903_v16, 2  ;;  %3706 = vperm.xlu1 %5294, %v3660_v54   ;;  %v3666_v54 = vld [vmem:[%s6639_s2 + $0x40] sm:$0xff] }
  0x84   : > { %4697 = vmatmul.mubr.msk.bf16.gmra.mrb[16].mxu1 %vm492_vm2, %v5572_v63 }
  0x85   : > { %4700 = vmatprep.mubr.msk.bf16.mxu1 %vm492_vm2, %v5589_v25 }
  0x87   : > { %4865 = vmatmul.mubr.msk.bf16.gmra.mrb[32].mxu0 %vm492_vm2, %v2187_v45  ;;  %v2606_v45 = vsel %vm2150_vm4, %v2603_v24, %v2605_v42  ;;  %v5912_v24 = vld [vmem:[%s5437_s28 + $0x78] sm:$0xff]   ;;  %v3659_v42 = vld [vmem:[%s6639_s2 + $0x8] sm:$0xff] }
  0x88   : > { %4870 = vmatprep.mubr.msk.bf16.mxu0 %vm492_vm2, %v2592_v47  ;;  %v5883_v47 = vld [vmem:[%s5437_s28 + $0x60] sm:$0xff]  }
  0x8c   : > { %4701 = vmatmul.mubr.msk.bf16.gmra.mrb[20].mxu1 %vm492_vm2, %v5599_v41 }
  0x8d   : > { %4704 = vmatprep.mubr.msk.bf16.mxu1 %vm492_vm2, %v5613_v58 }
  0x8f   : > { %4871 = vmatmul.mubr.msk.bf16.vlgmr.msra.gmra.mrb[0].mxu0 %vm492_vm2, %v2594_v52  ;;  %v5888_v52 = vld [vmem:[%s5437_s28 + $0x68] sm:$0xff]  }
  0x90   : > { %4907 = vmatpush3.bf16.msra.mxu0 %v3129_v62  ;;  %4874 = vmatprep.mubr.msk.bf16.mxu0 %vm492_vm2, %v2596_v14  ;;  %v955_v62 = vsel %vm950_vm5, %v952_v6, %v954_v10  ;;  %v2609_v14 = vrot.slane %v5883_v47, 2  ;;  %v2611_v33 = vrot.slane %v5888_v52, 2  ;;  %v5934_v10 = vld [vmem:[%s5437_s28 + $0x80] sm:$0xff]  }
  0x91   : > { %5281 = vmatprep.subr.msk.bf16.mxu0 %vm547_vm0, %v5833_v29 }
  0x92   : > { %v2612_v21 = vsel %vm2150_vm4, %v2609_v14, %v2611_v33 }
  0x94   : > { %4705 = vmatmul.mubr.msk.bf16.gmra.mrb[24].mxu1 %vm492_vm2, %v5618_v11 }
  0x95   : > { %4708 = vmatprep.mubr.msk.bf16.mxu1 %vm492_vm2, %v5635_v32 }
  0x97   : > { %4875 = vmatmul.mubr.msk.bf16.gmra.mrb[4].mxu0 %vm492_vm2, %v2598_v34  ;;  %v958_v34 = vrot.slane %v5497_v48, 1 }
  0x98   : > { %4878 = vmatprep.mubr.msk.bf16.mxu0 %vm492_vm2, %v2600_v5  ;;  %v2610_v5 = vsel %vm2150_vm4, %v2607_v43, %v2609_v14  ;;  %v2614_v43 = vsel %vm2150_vm4, %v2611_v33, %v2613_v30  ;;  %v3662_v14 = vld [vmem:[%s6639_s2 + $0x20] sm:$0xff]  ;;  %v3663_v33 = vld [vmem:[%s6639_s2 + $0x28] sm:$0xff] }
  0x99   : > { %v959_v48 = vsel %vm950_vm5, %v956_v23, %v958_v34  ;;  %v961_v6 = vsel %vm950_vm5, %v958_v34, %v960_v17  ;;  %v966_v34 = vrot.slane %v5561_v51, 1  ;;  %v3665_v51 = vld [vmem:[%s6639_s2 + $0x38] sm:$0xff] }
  0x9c   : > { %4709 = vmatmul.mubr.msk.bf16.gmra.mrb[28].mxu1 %vm492_vm2, %v5641_v40 }
  0x9d   : > { %4712 = vmatprep.mubr.msk.bf16.mxu1 %vm492_vm2, %v5656_v56 }
  0x9f   : > { %4879 = vmatmul.mubr.msk.bf16.gmra.mrb[8].mxu0 %vm492_vm2, %v2602_v49  ;;  %v3658_v49 = vld [vmem:[%s6639_s2] sm:$0xff] }
  0xa0   : > { %4882 = vmatprep.mubr.msk.bf16.mxu0 %vm492_vm2, %v2604_v36  ;;  %3696 = vperm.xlu0 %5293, %v3658_v49   ;;  %v2615_v36 = vrot.slane %v5912_v24, 2 }
  0xa2   : > { %v2616_v23 = vsel %vm2150_vm4, %v2613_v30, %v2615_v36 }
  0xa4   : > { %4713 = vmatmul.mubr.msk.bf16.gmra.mrb[32].mxu1 %vm492_vm2, %v5663_v4  ;;  %3701 = vperm.xlu0 %5293, %v3659_v42   ;;  %v2908_v42 = vshll.u32 %v5790_v37, 16 }
  0xa5   : > { %4718 = vmatprep.mubr.msk.bf16.mxu1 %vm492_vm2, %v953_v18  ;;  %v962_v18 = vrot.slane %v5517_v0, 1  ;;  %v3661_v0 = vld [vmem:[%s6639_s2 + $0x18] sm:$0xff] }
  0xa6   : > { %3711 = vperm.xlu1 %5294, %v3661_v0  }
  0xa7   : > { %4883 = vmatmul.mubr.msk.bf16.gmra.mrb[12].mxu0 %vm492_vm2, %v2606_v45  ;;  %v964_v45 = vrot.slane %v5545_v35, 1  ;;  %v2617_v35 = vrot.slane %v5934_v10, 2 }
  0xa8   : > { %4886 = vmatprep.mubr.msk.bf16.mxu0 %vm492_vm2, %v2608_v44  ;;  %v5939_v44 = vld [vmem:[%s5437_s28 + $0x88] sm:$0xff]   ;;  %3716 = vperm.xlu0 %5293, %v3662_v14   ;;  %v5353_v14 = vld [vmem:[%s5437_s28 + $0xa0] ss:$0 sps:$4 sm:$0x33]  }
  0xa9   : > { %v967_v49 = vsel %vm950_vm5, %v964_v45, %v966_v34 }
  0xaa   : > { %3721 = vperm.xlu1 %5294, %v3663_v33   ;;  %v2910_v33 = vrot.slane %v2908_v42, 3  ;;  %v3672_v42 = vld [vmem:[%s6639_s2 + $0x70] sm:$0xff] }
  0xac   : > { %4719 = vmatmul.mubr.msk.bf16.vlgmr.msra.gmra.mrb[0].mxu1 %vm492_vm2, %v955_v62  ;;  %v963_v62 = vsel %vm950_vm5, %v960_v17, %v962_v18  ;;  %v5964_v17 = vld [vmem:[%s5437_s28 + $0x90] sm:$0xff]   ;;  %3726 = vperm.xlu0 %5293, %v3664_v61  }
  0xad   : > { %4722 = vmatprep.mubr.msk.bf16.mxu1 %vm492_vm2, %v957_v19  ;;  %4755 = vmatpush3.bf16.msra.mxu1 %v1482_v39  ;;  %v965_v19 = vsel %vm950_vm5, %v962_v18, %v964_v45  ;;  %v2619_v39 = vrot.slane %v5939_v44, 2  ;;  %v2913_v18 = vshrl.u32 %v5793_v38, 16  ;;  %v3667_v45 = vld [vmem:[%s6639_s2 + $0x48] sm:$0xff] }
  0xae   : > { %5277 = vmatprep.subr.msk.bf16.mxu1 %vm547_vm0, %v5357_v9  ;;  %v968_v9 = vrot.slane %v5572_v63, 1  ;;  %v2621_v63 = vrot.slane %v5964_v17, 2  ;;  %3731 = vperm.xlu1 %5294, %v3665_v51   ;;  %v2925_v51 = vshll.u32 %v5806_v46, 16 }
  0xaf   : > { %4887 = vmatmul.mubr.msk.bf16.gmra.mrb[16].mxu0 %vm492_vm2, %v2610_v5  ;;  %v2618_v5 = vsel %vm2150_vm4, %v2615_v36, %v2617_v35  ;;  %v2905_v36 = vshrl.u32 %v5790_v37, 16  ;;  %v2915_v61 = vrot.slane %v2913_v18, 2  ;;  %v974_v18 = vrot.slane %v5613_v58, 1  ;;  %v3673_v58 = vld [vmem:[%s6639_s2 + $0x78] sm:$0xff] }
  0xb0   : > { %4890 = vmatprep.mubr.msk.bf16.mxu0 %vm492_vm2, %v2612_v21  ;;  %v5968_v21 = vld [vmem:[%s5437_s28 + $0x98] sm:$0xff]   ;;  %v969_v30 = vsel %vm950_vm5, %v966_v34, %v968_v9  ;;  %3736 = vperm.xlu0 %5293, %v3666_v54   ;;  %v2622_v37 = vsel %vm2150_vm4, %v2619_v39, %v2621_v63 }
  0xb2   : > { %3741 = vperm.xlu1 %5294, %v3667_v45  }
  0xb4   : > { %4723 = vmatmul.mubr.msk.bf16.gmra.mrb[4].mxu1 %vm492_vm2, %v959_v48  ;;  %v2620_v48 = vsel %vm2150_vm4, %v2617_v35, %v2619_v39  ;;  %v972_v35 = vrot.slane %v5599_v41, 1  ;;  %v3670_v39 = vld [vmem:[%s6639_s2 + $0x60] sm:$0xff]  ;;  %v2625_v41 = vrot.slane %v5353_v14, 2 }
  0xb5   : > { %4726 = vmatprep.mubr.msk.bf16.mxu1 %vm492_vm2, %v961_v6  ;;  %v2623_v6 = vrot.slane %v5968_v21, 2 }
  0xb7   : > { %4891 = vmatmul.mubr.msk.bf16.gmra.mrb[20].mxu0 %vm492_vm2, %v2614_v43  ;;  %v2916_v43 = vshll.u32 %v5793_v38, 16  ;;  %v2624_v0 = vsel %vm2150_vm4, %v2621_v63, %v2623_v6  ;;  %v2931_v63 = vshrl.u32 %v5810_v50, 16 }
  0xb8   : > { %4894 = vmatprep.mubr.msk.bf16.mxu0 %vm492_vm2, %v2616_v23  ;;  %v3668_v23 = vld [vmem:[%s6639_s2 + $0x50] sm:$0xff] }
  0xb9   : > { %v2918_v34 = vrot.slane %v2916_v43, 3  ;;  %3746 = vperm.xlu0 %5293, %v3668_v23   ;;  %v2626_v43 = vsel %vm2150_vm4, %v2623_v6, %v2625_v41  ;;  %v2927_v23 = vrot.slane %v2925_v51, 3  ;;  %v3674_v6 = vld [vmem:[%s6639_s2 + $0x80] sm:$0xff]  ;;  %v3676_v41 = vld [vmem:[%s6639_s2 + $0x90] sm:$0xff] }
  0xbc   : > { %4727 = vmatmul.mubr.msk.bf16.gmra.mrb[8].mxu1 %vm492_vm2, %v963_v62  ;;  %v970_v62 = vrot.slane %v5589_v25, 1  ;;  %v3669_v25 = vld [vmem:[%s6639_s2 + $0x58] sm:$0xff] }
  0xbd   : > { %4730 = vmatprep.mubr.msk.bf16.mxu1 %vm492_vm2, %v965_v19  ;;  %v2907_v19 = vrot.slane %v2905_v36, 2  ;;  %3751 = vperm.xlu1 %5294, %v3669_v25   ;;  %v3671_v36 = vld [vmem:[%s6639_s2 + $0x68] sm:$0xff]  ;;  %v2952_v25 = vshll.u32 %v5828_v28, 16 }
  0xbe   : > { %3756 = vperm.xlu0 %5293, %v3670_v39   ;;  %v3675_v39 = vld [vmem:[%s6639_s2 + $0x88] sm:$0xff] }
  0xbf   : > { %4895 = vmatmul.mubr.msk.bf16.gmra.mrb[24].mxu0 %vm492_vm2, %v2618_v5  ;;  %v971_v5 = vsel %vm950_vm5, %v968_v9, %v970_v62  ;;  %v2911_v54 = vor.u32 %v2910_v33, %v2907_v19  ;;  %v2919_v9 = vor.u32 %v2918_v34, %v2915_v61  ;;  %v975_v19 = vsel %vm950_vm5, %v972_v35, %v974_v18 }
  0xc0   : > { %4898 = vmatprep.mubr.msk.bf16.mxu0 %vm492_vm2, %v2620_v48  ;;  %v973_v48 = vsel %vm950_vm5, %v970_v62, %v972_v35  ;;  %v976_v62 = vrot.slane %v5618_v11, 1  ;;  %v2940_v61 = vshrl.u32 %v5822_v53, 16  ;;  %v2943_v34 = vshll.u32 %v5822_v53, 16 }
  0xc1   : > { %3761 = vperm.xlu1 %5294, %v3671_v36   ;;  %v2949_v35 = vshrl.u32 %v5828_v28, 16 }
  0xc2   : > { %3766 = vperm.xlu0 %5293, %v3672_v42   ;;  %v977_v33 = vsel %vm950_vm5, %v974_v18, %v976_v62  ;;  %v2942_v51 = vrot.slane %v2940_v61, 2  ;;  %v2954_v18 = vrot.slane %v2952_v25, 3  ;;  %v984_v61 = vrot.slane %v5663_v4, 1 }
  0xc3   : > { %v2951_v42 = vrot.slane %v2949_v35, 2 }
  0xc4   : > { %4731 = vmatmul.mubr.msk.bf16.gmra.mrb[12].mxu1 %vm492_vm2, %v967_v49  ;;  %v2922_v49 = vshrl.u32 %v5806_v46, 16 }
  0xc5   : > { %4734 = vmatprep.mubr.msk.bf16.mxu1 %vm492_vm2, %v969_v30  ;;  %v2934_v30 = vshll.u32 %v5810_v50, 16  ;;  %3771 = vperm.xlu1 %5294, %v3673_v58   ;;  %v982_v58 = vrot.slane %v5656_v56, 1  ;;  %v3681_v56 = vld [vmem:[%s6639_s2 + $0xb8] sm:$0xff] }
  0xc6   : > { %v2924_v45 = vrot.slane %v2922_v49, 2  ;;  %3776 = vperm.xlu0 %5293, %v3674_v6  }
  0xc7   : > { %4899 = vmatmul.mubr.msk.bf16.gmra.mrb[28].mxu0 %vm492_vm2, %v2622_v37  ;;  %v2920_v37 = vsel %vm2903_vm6, %v2911_v54, %v2919_v9  ;;  %v2936_v14 = vrot.slane %v2934_v30, 3  ;;  %v2945_v54 = vrot.slane %v2943_v34, 3  ;;  %v3443_v30 = vsel %vm547_vm0, %v5833_v29, 0  ;;  %v3678_v29 = vld [vmem:[%s6639_s2 + $0xa0] sm:$0xff] }
  0xc8   : > { %4902 = vmatprep.mubr.msk.bf16.mxu0 %vm492_vm2, %v2624_v0  ;;  %v2933_v0 = vrot.slane %v2931_v63, 2  ;;  %v2928_v11 = vor.u32 %v2927_v23, %v2924_v45  ;;  %v980_v63 = vrot.slane %v5641_v40, 1  ;;  %v3677_v40 = vld [vmem:[%s6639_s2 + $0x98] sm:$0xff]  ;;  %v985_v4 = vsel %vm950_vm5, %v982_v58, %v984_v61 }
  0xc9   : > { %3781 = vperm.xlu1 %5294, %v3675_v39   ;;  %v2946_v45 = vor.u32 %v2945_v54, %v2942_v51  ;;  %v2985_v54 = vshrl.u32 %v5870_v8, 16 }
  0xca   : > { %v2929_v49 = vsel %vm2903_vm6, %v2919_v9, %v2928_v11  ;;  %3786 = vperm.xlu0 %5293, %v3676_v41   ;;  %v2961_v9 = vshll.u32 %v5847_v3, 16  ;;  %v983_v39 = vsel %vm950_vm5, %v980_v63, %v982_v58  ;;  %v2997_v58 = vshll.u32 %v5883_v47, 16 }
  0xcc   : > { %4735 = vmatmul.mubr.msk.bf16.gmra.mrb[16].mxu1 %vm492_vm2, %v971_v5  ;;  %v2937_v5 = vor.u32 %v2936_v14, %v2933_v0  ;;  %v2970_v0 = vshll.u32 %v5851_v1, 16  ;;  %v3679_v14 = vld [vmem:[%s6639_s2 + $0xa8] sm:$0xff] }
  0xcd   : > { %4738 = vmatprep.mubr.msk.bf16.mxu1 %vm492_vm2, %v973_v48  ;;  %v978_v48 = vrot.slane %v5635_v32, 1  ;;  %v2958_v32 = vshrl.u32 %v5847_v3, 16  ;;  %3791 = vperm.xlu1 %5294, %v3677_v40   ;;  %v5358_v40 = vld [vmem:[%s5437_s28 + $0x10] sm:$0xff]  }
  0xce   : > { %v2938_v36 = vsel %vm2903_vm6, %v2928_v11, %v2937_v5  ;;  %3796 = vperm.xlu0 %5293, %v3678_v29   ;;  %v2963_v11 = vrot.slane %v2961_v9, 3  ;;  %v2972_v25 = vrot.slane %v2970_v0, 3  ;;  %v1390_v9 = vrot.slane %v5468_v20, 1 }
  0xcf   : > { %4903 = vmatmul.mubr.msk.bf16.gmra.mrb[32].mxu0 %vm492_vm2, %v2626_v43  ;;  %v979_v43 = vsel %vm950_vm5, %v976_v62, %v978_v48  ;;  %v981_v23 = vsel %vm950_vm5, %v978_v48, %v980_v63  ;;  %v2967_v62 = vshrl.u32 %v5851_v1, 16  ;;  %v2960_v6 = vrot.slane %v2958_v32, 2 }
  0xd0   : > { %4908 = vmatprep.mubr.msk.bf16.mxu0 %vm492_vm2, %v2920_v37  ;;  %v2955_v37 = vor.u32 %v2954_v18, %v2951_v42  ;;  %v2976_v48 = vshrl.u32 %v5865_v13, 16  ;;  %v2988_v63 = vshll.u32 %v5870_v8, 16  ;;  %v986_v18 = vrot.slane %v5686_v27, 1  ;;  %v3686_v27 = vld [vmem:[%s6639_s2 + $0xe0] sm:$0xff] }
  0xd1   : > { %v2969_v35 = vrot.slane %v2967_v62, 2  ;;  %3801 = vperm.xlu1 %5294, %v3679_v14   ;;  %v2964_v41 = vor.u32 %v2963_v11, %v2960_v6  ;;  %v1391_v29 = vrot.slane %v5358_v40, 1  ;;  %v3003_v11 = vshrl.u32 %v5888_v52, 16 }
  0xd2   : > { %v2956_v34 = vsel %vm2903_vm6, %v2946_v45, %v2955_v37  ;;  %v2990_v62 = vrot.slane %v2988_v63, 3  ;;  %v987_v20 = vsel %vm950_vm5, %v984_v61, %v986_v18  ;;  %v3687_v61 = vld [vmem:[%s6639_s2 + $0xe8] sm:$0xff]  ;;  %v3689_v63 = vld [vmem:[%s6639_s2 + $0xf8] sm:$0xff]  ;;  %v3012_v18 = vshrl.u32 %v5903_v16, 16 }
  0xd3   : > { %v2973_v51 = vor.u32 %v2972_v25, %v2969_v35  ;;  %v2965_v42 = vsel %vm2903_vm6, %v2955_v37, %v2964_v41  ;;  %v3685_v37 = vld [vmem:[%s6639_s2 + $0xd8] sm:$0xff]  ;;  %v1392_v14 = vsel %vm950_vm5, %v1390_v9, %v1391_v29  ;;  %v3021_v9 = vshrl.u32 %v5912_v24, 16 }
  0xd4   : > { %4739 = vmatmul.mubr.msk.bf16.gmra.mrb[20].mxu1 %vm492_vm2, %v975_v19  ;;  %v3680_v19 = vld [vmem:[%s6639_s2 + $0xb0] sm:$0xff]  ;;  %v5359_v35 = vld [vmem:[%s5437_s28 + $0x18] sm:$0xff]   ;;  %v3024_v40 = vshll.u32 %v5912_v24, 16 }
  0xd5   : > { %4742 = vmatprep.mubr.msk.bf16.mxu1 %vm492_vm2, %v977_v33  ;;  %v2947_v33 = vsel %vm2903_vm6, %v2937_v5, %v2946_v45  ;;  %3806 = vperm.xlu0 %5293, %v3680_v19   ;;  %v3682_v5 = vld [vmem:[%s6639_s2 + $0xc0] sm:$0xff]  ;;  %v2974_v45 = vsel %vm2903_vm6, %v2964_v41, %v2973_v51  ;;  %v2994_v19 = vshrl.u32 %v5883_v47, 16  ;;  %v1393_v25 = vrot.slane %v5359_v35, 1 }
  0xd6   : > { %3811 = vperm.xlu1 %5294, %v3681_v56   ;;  %v2999_v56 = vrot.slane %v2997_v58, 3  ;;  %v3023_v58 = vrot.slane %v3021_v9, 2  ;;  %v3033_v35 = vshll.u32 %v5934_v10, 16  ;;  %v3051_v9 = vshll.u32 %v5964_v17, 16 }
  0xd7   : > { %4909 = vmatmul.mubr.msk.bf16.vlgmr.msra.gmra.mrb[0].mxu0 %vm492_vm2, %v2929_v49  ;;  %v2979_v49 = vshll.u32 %v5865_v13, 16  ;;  %v2996_v41 = vrot.slane %v2994_v19, 2 }
  0xd8   : > { %4945 = vmatpush3.bf16.msra.mxu0 %v3443_v30  ;;  %4912 = vmatprep.mubr.msk.bf16.mxu0 %vm492_vm2, %v2938_v36  ;;  %v3683_v30 = vld [vmem:[%s6639_s2 + $0xc8] sm:$0xff]  ;;  %v3684_v36 = vld [vmem:[%s6639_s2 + $0xd0] sm:$0xff] }
  0xd9   : > { %3816 = vperm.xlu0 %5293, %v3682_v5   ;;  %v2981_v32 = vrot.slane %v2979_v49, 3  ;;  %v5360_v5 = vld [vmem:[%s5437_s28 + $0x20] sm:$0xff]   ;;  %v3005_v49 = vrot.slane %v3003_v11, 2  ;;  %v3026_v11 = vrot.slane %v3024_v40, 3 }
  0xda   : > { %3821 = vperm.xlu1 %5294, %v3683_v30   ;;  %v3690_v30 = vld [vmem:[%s6639_s2 + $0x100] sm:$0xff] }
  0xdc   : > { %4743 = vmatmul.mubr.msk.bf16.gmra.mrb[24].mxu1 %vm492_vm2, %v979_v43  ;;  %v2978_v43 = vrot.slane %v2976_v48, 2 }
  0xdd   : > { %4746 = vmatprep.mubr.msk.bf16.mxu1 %vm492_vm2, %v981_v23  ;;  %v2987_v23 = vrot.slane %v2985_v54, 2  ;;  %3826 = vperm.xlu0 %5293, %v3684_v36   ;;  %v3000_v36 = vor.u32 %v2999_v56, %v2996_v41  ;;  %v3042_v41 = vshll.u32 %v5939_v44, 16  ;;  %v5363_v56 = vld [vmem:[%s5437_s28 + $0x38] sm:$0xff]  }
  0xde   : > { %v2982_v0 = vor.u32 %v2981_v32, %v2978_v43  ;;  %3831 = vperm.xlu1 %5294, %v3685_v37   ;;  %v3015_v43 = vshll.u32 %v5903_v16, 16 }
  0xdf   : > { %4913 = vmatmul.mubr.msk.bf16.gmra.mrb[4].mxu0 %vm492_vm2, %v2947_v33  ;;  %v2991_v6 = vor.u32 %v2990_v62, %v2987_v23  ;;  %v3006_v33 = vshll.u32 %v5888_v52, 16  ;;  %v5361_v23 = vld [vmem:[%s5437_s28 + $0x28] sm:$0xff]  }
  0xe0   : > { %4916 = vmatprep.mubr.msk.bf16.mxu0 %vm492_vm2, %v2956_v34  ;;  %v3688_v34 = vld [vmem:[%s6639_s2 + $0xf0] sm:$0xff]  ;;  %v1397_v62 = vrot.slane %v5361_v23, 1  ;;  %v5365_v23 = vld [vmem:[%s5437_s28 + $0x48] sm:$0xff]  }
  0xe1   : > { %3836 = vperm.xlu0 %5293, %v3686_v27   ;;  %v2992_v48 = vsel %vm2903_vm6, %v2982_v0, %v2991_v6  ;;  %v3008_v54 = vrot.slane %v3006_v33, 3  ;;  %v3001_v37 = vsel %vm2903_vm6, %v2991_v6, %v3000_v36  ;;  %v3014_v27 = vrot.slane %v3012_v18, 2  ;;  %v3693_v33 = vld [vmem:[%s6639_s2 + $0x118] sm:$0xff] }
  0xe2   : > { %3841 = vperm.xlu1 %5294, %v3687_v61  }
  0xe3   : > { %v3009_v32 = vor.u32 %v3008_v54, %v3005_v49  ;;  %v3035_v49 = vrot.slane %v3033_v35, 3  ;;  %v5364_v54 = vld [vmem:[%s5437_s28 + $0x40] sm:$0xff]  }
  0xe4   : > { %4747 = vmatmul.mubr.msk.bf16.gmra.mrb[28].mxu1 %vm492_vm2, %v983_v39  ;;  %v2983_v39 = vsel %vm2903_vm6, %v2973_v51, %v2982_v0  ;;  %v1394_v51 = vsel %vm950_vm5, %v1391_v29, %v1393_v25  ;;  %v3691_v29 = vld [vmem:[%s6639_s2 + $0x108] sm:$0xff]  ;;  %v5362_v0 = vld [vmem:[%s5437_s28 + $0x30] sm:$0xff]  }
  0xe5   : > { %4750 = vmatprep.mubr.msk.bf16.mxu1 %vm492_vm2, %v985_v4  ;;  %v1395_v4 = vrot.slane %v5360_v5, 1  ;;  %3846 = vperm.xlu0 %5293, %v3688_v34   ;;  %v3010_v19 = vsel %vm2903_vm6, %v3000_v36, %v3009_v32  ;;  %v3030_v34 = vshrl.u32 %v5934_v10, 16  ;;  %v1401_v5 = vrot.slane %v5363_v56, 1 }
  0xe6   : > { %3851 = vperm.xlu1 %5294, %v3689_v63   ;;  %v1403_v63 = vrot.slane %v5364_v54, 1  ;;  %v3044_v36 = vrot.slane %v3042_v41, 3  ;;  %v5367_v41 = vld [vmem:[%s5437_s28 + $0x58] sm:$0xff]  }
  0xe7   : > { %4917 = vmatmul.mubr.msk.bf16.gmra.mrb[8].mxu0 %vm492_vm2, %v2965_v42  ;;  %v1396_v42 = vsel %vm950_vm5, %v1393_v25, %v1395_v4  ;;  %v3027_v25 = vor.u32 %v3026_v11, %v3023_v58  ;;  %v1409_v56 = vrot.slane %v5367_v41, 1  ;;  %v1812_v41 = vshrl.u32 %v5732_v57, 16 }
  0xe8   : > { %4920 = vmatprep.mubr.msk.bf16.mxu0 %vm492_vm2, %v2974_v45  ;;  %v3692_v45 = vld [vmem:[%s6639_s2 + $0x110] sm:$0xff] }
  0xe9   : > { %3856 = vperm.xlu0 %5293, %v3690_v30  }
  0xea   : > { %3861 = vperm.xlu1 %5294, %v3691_v29   ;;  %v3057_v29 = vshrl.u32 %v5968_v21, 16 }
  0xec   : > { %4751 = vmatmul.mubr.msk.bf16.gmra.mrb[32].mxu1 %vm492_vm2, %v987_v20  ;;  %v3017_v20 = vrot.slane %v3015_v43, 3  ;;  %v1404_v43 = vsel %vm950_vm5, %v1401_v5, %v1403_v63  ;;  %v3059_v11 = vrot.slane %v3057_v29, 2 }
  0xed   : > { %4756 = vmatprep.mubr.msk.bf16.mxu1 %vm492_vm2, %v1392_v14  ;;  %v1399_v14 = vrot.slane %v5362_v0, 1  ;;  %3866 = vperm.xlu0 %5293, %v3692_v45   ;;  %v3060_v45 = vshll.u32 %v5968_v21, 16  ;;  %v5366_v0 = vld [vmem:[%s5437_s28 + $0x50] sm:$0xff]  }
  0xee   : > { %v3018_v6 = vor.u32 %v3017_v20, %v3014_v27  ;;  %3871 = vperm.xlu1 %5294, %v3693_v33   ;;  %v3053_v20 = vrot.slane %v3051_v9, 3 }
  0xef   : > { %4921 = vmatmul.mubr.msk.bf16.gmra.mrb[12].mxu0 %vm492_vm2, %v2983_v39  ;;  %v1400_v61 = vsel %vm950_vm5, %v1397_v62, %v1399_v14  ;;  %v3039_v39 = vshrl.u32 %v5939_v44, 16  ;;  %v3062_v33 = vrot.slane %v3060_v45, 3  ;;  %v3356_v45 = vrot.slane %v5810_v50, 3 }
  0xf0   : > { %4924 = vmatprep.mubr.msk.bf16.mxu0 %vm492_vm2, %v2992_v48  ;;  %v3032_v48 = vrot.slane %v3030_v34, 2  ;;  %v3028_v30 = vsel %vm2903_vm6, %v3018_v6, %v3027_v25  ;;  %v3358_v50 = vrot.slane %v5822_v53, 3 }
  0xf2   : > { %v3036_v18 = vor.u32 %v3035_v49, %v3032_v48  ;;  %v1411_v49 = vrot.slane %v5713_v55, 1 }
  0xf4   : > { %4757 = vmatmul.mubr.msk.bf16.vlgmr.msra.gmra.mrb[0].mxu1 %vm492_vm2, %v1394_v51  ;;  %v3041_v51 = vrot.slane %v3039_v39, 2  ;;  %v3344_v39 = vld [vmem:[%s5437_s28 + $0x10] sm:$0x8] }
  0xf5   : > { %4760 = vmatprep.mubr.msk.bf16.mxu1 %vm492_vm2, %v1396_v42  ;;  %4983 = vmatpush3.bf16.msra.mxu1 %v5419_v2  ;;  %v1398_v2 = vsel %vm950_vm5, %v1395_v4, %v1397_v62  ;;  %v3019_v4 = vsel %vm2903_vm6, %v3009_v32, %v3018_v6  ;;  %v1402_v42 = vsel %vm950_vm5, %v1399_v14, %v1401_v5  ;;  %v3048_v32 = vshrl.u32 %v5964_v17, 16 }
  0xf6   : > { %v3045_v40 = vor.u32 %v3044_v36, %v3041_v51  ;;  %v1405_v62 = vrot.slane %v5365_v23, 1  ;;  %v1407_v14 = vrot.slane %v5366_v0, 1  ;;  %v1412_v36 = vsel %vm950_vm5, %v1409_v56, %v1411_v49 }
  0xf7   : > { %4925 = vmatmul.mubr.msk.bf16.gmra.mrb[16].mxu0 %vm492_vm2, %v3001_v37  ;;  %v3037_v37 = vsel %vm2903_vm6, %v3027_v25, %v3036_v18  ;;  %v3050_v27 = vrot.slane %v3048_v32, 2  ;;  %v3063_v25 = vor.u32 %v3062_v33, %v3059_v11  ;;  %v1415_v32 = vrot.slane %v5738_v60, 1 }
  0xf8   : > { %4928 = vmatprep.mubr.msk.bf16.mxu0 %vm492_vm2, %v3010_v19  ;;  %v6191_v19 = vld [vmem:[%s5437_s28 + $0xa0] ss:$0 sps:$4 sm:$0x77]   ;;  %v3046_v58 = vsel %vm2903_vm6, %v3036_v18, %v3045_v40  ;;  %v3352_v18 = vrot.slane %v5793_v38, 3  ;;  %v3354_v38 = vrot.slane %v5806_v46, 3  ;;  %v1417_v23 = vrot.slane %v5750_v7, 1 }
  0xf9   : > { %v3054_v6 = vor.u32 %v3053_v20, %v3050_v27  ;;  %v3066_v34 = vshrl.u32 %v6191_v19, 16  ;;  %v3069_v35 = vshll.u32 %v6191_v19, 16  ;;  %v3360_v0 = vrot.slane %v5828_v28, 3 }
  0xfa   : > { %v3357_v27 = vsel %vm3350_vm7, %v3354_v38, %v3356_v45  ;;  %v1418_v46 = vsel %vm950_vm5, %v1415_v32, %v1417_v23  ;;  %v1423_v11 = vrot.slane %v5770_v26, 1  ;;  %v1803_v33 = vshrl.u32 %v5713_v55, 16 }
  0xfb   : > { %v3055_v5 = vsel %vm2903_vm6, %v3045_v40, %v3054_v6  ;;  %v3071_v48 = vrot.slane %v3069_v35, 3  ;;  %v3064_v54 = vsel %vm2903_vm6, %v3054_v6, %v3063_v25  ;;  %v3361_v53 = vsel %vm3350_vm7, %v3358_v50, %v3360_v0  ;;  %v5356_v6 = vld [vmem:[%s5437_s28 + $0x98] ss:$0 sps:$4 sm:$0x11]   ;;  %s5283_s28 = smul.u32 288, %s6643_s16 }
  0xfc   : > { %4761 = vmatmul.mubr.msk.bf16.gmra.mrb[4].mxu1 %vm492_vm2, %v1398_v2  ;;  %v1406_v2 = vsel %vm950_vm5, %v1403_v63, %v1405_v62  ;;  %v4448_v63 = vcombine.low %v3344_v39, %v5780_v31  ;;  %v1805_v35 = vrot.slane %v1803_v33, 1  ;;  %v3364_v39 = vrot.slane %v5851_v1, 3 }
  0xfd   : > { %4764 = vmatprep.mubr.msk.bf16.mxu1 %vm492_vm2, %v1400_v61  ;;  %v1408_v61 = vsel %vm950_vm5, %v1405_v62, %v1407_v14  ;;  %v3355_v62 = vsel %vm3350_vm7, %v3352_v18, %v3354_v38  ;;  %s6372_s22 = scalar_lea.vmem %s6640_s3, %s5283_s28 }
  0xff   : > { %4929 = vmatmul.mubr.msk.bf16.gmra.mrb[20].mxu0 %vm492_vm2, %v3019_v4  ;;  %v3068_v4 = vrot.slane %v3066_v34, 2 }
 0x100   : > { %4932 = vmatprep.mubr.msk.bf16.mxu0 %vm492_vm2, %v3028_v30  ;;  %v1410_v30 = vsel %vm950_vm5, %v1407_v14, %v1409_v56  ;;  %v1421_v14 = vrot.slane %v5766_v22, 1  ;;  %v1815_v56 = vshll.u32 %v5732_v57, 16 }
 0x101   : > { %v3072_v51 = vor.u32 %v3071_v48, %v3068_v4  ;;  %v1824_v48 = vshll.u32 %v5738_v60, 16 }
 0x102   : > { %v1424_v34 = vsel %vm950_vm5, %v1421_v14, %v1423_v11 }
 0x103   : > { %v3073_v31 = vsel %vm2903_vm6, %v3063_v25, %v3072_v51 }
 0x104   : > { %4765 = vmatmul.mubr.msk.bf16.gmra.mrb[8].mxu1 %vm492_vm2, %v1402_v42  ;;  %v3351_v42 = vrot.slane %v4448_v63, 3  ;;  %v1817_v63 = vrot.slane %v1815_v56, 2 }
 0x105   : > { %4768 = vmatprep.mubr.msk.bf16.mxu1 %vm492_vm2, %v1404_v43  ;;  %v1413_v43 = vrot.slane %v5732_v57, 1 }
 0x106   : > { %v3353_v9 = vsel %vm3350_vm7, %v3351_v42, %v3352_v18  ;;  %v3368_v42 = vrot.slane %v5870_v8, 3  ;;  %v1830_v18 = vshrl.u32 %v5750_v7, 16 }
 0x107   : > { %4933 = vmatmul.mubr.msk.bf16.gmra.mrb[24].mxu0 %vm492_vm2, %v3037_v37  ;;  %v1414_v40 = vsel %vm950_vm5, %v1411_v49, %v1413_v43  ;;  %v1416_v29 = vsel %vm950_vm5, %v1413_v43, %v1415_v32  ;;  %v1419_v37 = vrot.slane %v5754_v12, 1  ;;  %v1833_v43 = vshll.u32 %v5750_v7, 16 }
 0x108   : > { %4936 = vmatprep.mubr.msk.bf16.mxu0 %vm492_vm2, %v3046_v58  ;;  %v3359_v58 = vsel %vm3350_vm7, %v3356_v45, %v3358_v50 }
 0x109   : > { %v1420_v20 = vsel %vm950_vm5, %v1417_v23, %v1419_v37  ;;  %v1422_v28 = vsel %vm950_vm5, %v1419_v37, %v1421_v14  ;;  %v1835_v38 = vrot.slane %v1833_v43, 2  ;;  %v1848_v37 = vshrl.u32 %v5766_v22, 16 }
 0x10b   : > { %v1850_v14 = vrot.slane %v1848_v37, 1 }
 0x10c   : > { %4769 = vmatmul.mubr.msk.bf16.gmra.mrb[12].mxu1 %vm492_vm2, %v1406_v2  ;;  %v1806_v2 = vshll.u32 %v5713_v55, 16  ;;  %v1425_v55 = vrot.slane %v5356_v6, 1  ;;  %v1869_v6 = vshll.u32 %v5786_v59, 16 }
 0x10d   : > { %4772 = vmatprep.mubr.msk.bf16.mxu1 %vm492_vm2, %v1408_v61  ;;  %v3362_v61 = vrot.slane %v5847_v3, 3  ;;  %v1821_v3 = vshrl.u32 %v5738_v60, 16 }
 0x10e   : > { %v1808_v25 = vrot.slane %v1806_v2, 2  ;;  %v1426_v1 = vsel %vm950_vm5, %v1423_v11, %v1425_v55  ;;  %v3374_v11 = vrot.slane %v5903_v16, 3 }
 0x10f   : > { %4937 = vmatmul.mubr.msk.bf16.gmra.mrb[28].mxu0 %vm492_vm2, %v3055_v5  ;;  %v3363_v5 = vsel %vm3350_vm7, %v3360_v0, %v3362_v61  ;;  %v3365_v49 = vsel %vm3350_vm7, %v3362_v61, %v3364_v39  ;;  %v1823_v51 = vrot.slane %v1821_v3, 1  ;;  %v3384_v3 = vrot.slane %v5968_v21, 3 }
 0x110   : > { %4940 = vmatprep.mubr.msk.bf16.mxu0 %vm492_vm2, %v3064_v54  ;;  %v1809_v4 = vor.u32 %v1808_v25, %v1805_v35  ;;  %v1814_v54 = vrot.slane %v1812_v41, 1  ;;  %v3380_v41 = vrot.slane %v5939_v44, 3 }
 0x112   : > { %v1810_v57 = vsel %vm1703_vm3, %v5627_v15, %v1809_v4  ;;  %v1818_v60 = vor.u32 %v1817_v63, %v1814_v54  ;;  %v1842_v15 = vshll.u32 %v5754_v12, 16 }
 0x114   : > { %4773 = vmatmul.mubr.msk.bf16.gmra.mrb[16].mxu1 %vm492_vm2, %v1410_v30  ;;  %v3366_v30 = vrot.slane %v5865_v13, 3  ;;  %v1839_v13 = vshrl.u32 %v5754_v12, 16  ;;  %v1819_v8 = vsel %vm1703_vm3, %v1809_v4, %v1818_v60  ;;  %v1844_v23 = vrot.slane %v1842_v15, 2 }
 0x115   : > { %4776 = vmatprep.mubr.msk.bf16.mxu1 %vm492_vm2, %v1412_v36  ;;  %v1826_v36 = vrot.slane %v1824_v48, 2 }
 0x116   : > { %v1841_v45 = vrot.slane %v1839_v13, 1 }
 0x117   : > { %4941 = vmatmul.mubr.msk.bf16.gmra.mrb[32].mxu0 %vm492_vm2, %v3073_v31  ;;  %v3367_v31 = vsel %vm3350_vm7, %v3364_v39, %v3366_v30  ;;  %v1827_v32 = vor.u32 %v1826_v36, %v1823_v51  ;;  %v3378_v39 = vrot.slane %v5934_v10, 3  ;;  %v3382_v10 = vrot.slane %v5964_v17, 3 }
 0x118   : > { %4946 = vmatprep.mubr.msk.bf16.mxu0 %vm492_vm2, %v3353_v9  ;;  %v3369_v9 = vsel %vm3350_vm7, %v3366_v30, %v3368_v42  ;;  %v1845_v50 = vor.u32 %v1844_v23, %v1841_v45 }
 0x119   : > { %v1828_v7 = vsel %vm1703_vm3, %v1818_v60, %v1827_v32  ;;  %v3383_v44 = vsel %vm3350_vm7, %v3380_v41, %v3382_v10  ;;  %v3385_v48 = vsel %vm3350_vm7, %v3382_v10, %v3384_v3 }
 0x11c   : > { %4777 = vmatmul.mubr.msk.bf16.gmra.mrb[20].mxu1 %vm492_vm2, %v1414_v40  ;;  %v1832_v40 = vrot.slane %v1830_v18, 1 }
 0x11d   : > { %4780 = vmatprep.mubr.msk.bf16.mxu1 %vm492_vm2, %v1416_v29  ;;  %v3370_v29 = vrot.slane %v5883_v47, 3  ;;  %v1857_v47 = vshrl.u32 %v5770_v26, 16 }
 0x11e   : > { %v1836_v12 = vor.u32 %v1835_v38, %v1832_v40 }
 0x11f   : > { %4947 = vmatmul.mubr.msk.bf16.vlgmr.msra.gmra.mrb[0].mxu0 %vm492_vm2, %v3355_v62  ;;  %v3372_v62 = vrot.slane %v5888_v52, 3  ;;  %v1859_v33 = vrot.slane %v1857_v47, 1 }
 0x120   : > { %4950 = vmatprep.mubr.msk.bf16.mxu0 %vm492_vm2, %v3357_v27  ;;  %v1851_v27 = vshll.u32 %v5766_v22, 16  ;;  %v1837_v52 = vsel %vm1703_vm3, %v1827_v32, %v1836_v12  ;;  %v1846_v22 = vsel %vm1703_vm3, %v1836_v12, %v1845_v50 }
 0x121   : > { %v3373_v0 = vsel %vm3350_vm7, %v3370_v29, %v3372_v62  ;;  %v3375_v61 = vsel %vm3350_vm7, %v3372_v62, %v3374_v11 }
 0x124   : > { %4781 = vmatmul.mubr.msk.bf16.gmra.mrb[24].mxu1 %vm492_vm2, %v1418_v46  ;;  %v3371_v46 = vsel %vm3350_vm7, %v3368_v42, %v3370_v29  ;;  %v3707_v42 = vpop.permute.xlu1 %3706 }
 0x125   : > { %4784 = vmatprep.mubr.msk.bf16.mxu1 %vm492_vm2, %v1420_v20  ;;  %v1860_v20 = vshll.u32 %v5770_v26, 16 }
 0x127   : > { %4951 = vmatmul.mubr.msk.bf16.gmra.mrb[4].mxu0 %vm492_vm2, %v3359_v58  ;;  %v1853_v58 = vrot.slane %v1851_v27, 2  ;;  %v1862_v2 = vrot.slane %v1860_v20, 2 }
 0x128   : > { %4954 = vmatprep.mubr.msk.bf16.mxu0 %vm492_vm2, %v3361_v53  ;;  %v3376_v53 = vrot.slane %v5912_v24, 3  ;;  %v1871_v24 = vrot.slane %v1869_v6, 2 }
 0x129   : > { %v1854_v26 = vor.u32 %v1853_v58, %v1850_v14 }
 0x12a   : > { %v3377_v16 = vsel %vm3350_vm7, %v3374_v11, %v3376_v53  ;;  %v3379_v56 = vsel %vm3350_vm7, %v3376_v53, %v3378_v39 }
 0x12b   : > { %v1855_v35 = vsel %vm1703_vm3, %v1845_v50, %v1854_v26 }
 0x12c   : > { %4785 = vmatmul.mubr.msk.bf16.gmra.mrb[28].mxu1 %vm492_vm2, %v1422_v28  ;;  %v1866_v28 = vshrl.u32 %v5786_v59, 16 }
 0x12d   : > { %4788 = vmatprep.mubr.msk.bf16.mxu1 %vm492_vm2, %v1424_v34  ;;  %v1863_v34 = vor.u32 %v1862_v2, %v1859_v33 }
 0x12e   : > { %v1868_v25 = vrot.slane %v1866_v28, 1 }
 0x12f   : > { %4955 = vmatmul.mubr.msk.bf16.gmra.mrb[8].mxu0 %vm492_vm2, %v3363_v5  ;;  %v1864_v55 = vsel %vm1703_vm3, %v1854_v26, %v1863_v34  ;;  %v3381_v5 = vsel %vm3350_vm7, %v3378_v39, %v3380_v41 }
 0x130   : > { %4958 = vmatprep.mubr.msk.bf16.mxu0 %vm492_vm2, %v3365_v49  ;;  %v1872_v59 = vor.u32 %v1871_v24, %v1868_v25  ;;  %v3386_v49 = vrot.slane %v6191_v19, 3  ;;  %v3712_v19 = vpop.permute.xlu1 %3711 }
 0x132   : > { %v1873_v4 = vsel %vm1703_vm3, %v1863_v34, %v1872_v59 }
 0x134   : > { %4789 = vmatmul.mubr.msk.bf16.gmra.mrb[32].mxu1 %vm492_vm2, %v1426_v1  ;;  %v3387_v1 = vsel %vm3350_vm7, %v3384_v3, %v3386_v49 }
 0x135   : > { %4814 = vmatprep.mubr.msk.bf16.mxu1 %vm492_vm2, %v1810_v57  ;;  %v3697_v57 = vpop.permute.xlu0 %3696 }
 0x137   : > { %4959 = vmatmul.mubr.msk.bf16.gmra.mrb[12].mxu0 %vm492_vm2, %v3367_v31 }
 0x138   : > { %4962 = vmatprep.mubr.msk.bf16.mxu0 %vm492_vm2, %v3369_v9  ;;  %v6336_v9 = vpop.permute.xlu1 %3721 }
 0x139   : > { %v3702_v18 = vpop.permute.xlu0 %3701 }
 0x13c   : > { %4815 = vmatmul.mubr.msk.bf16.vlgmr.msra.gmra.mrb[20].mxu1 %vm492_vm2, %v1819_v8  ;;  %v6346_v45 = vpop.permute.xlu1 %3731 }
 0x13d   : > { %4818 = vmatprep.mubr.msk.bf16.mxu1 %vm492_vm2, %v1828_v7  ;;  %v3717_v15 = vpop.permute.xlu0 %3716 }
 0x13f   : > { %4963 = vmatmul.mubr.msk.bf16.gmra.mrb[16].mxu0 %vm492_vm2, %v3371_v46 }
 0x140   : > { %4966 = vmatprep.mubr.msk.bf16.mxu0 %vm492_vm2, %v3373_v0  ;;  %v6356_v27 = vpop.permute.xlu1 %3741 }
 0x141   : > { %v3727_v29 = vpop.permute.xlu0 %3726 }
 0x144   : > { %4819 = vmatmul.mubr.msk.bf16.gmra.mrb[24].mxu1 %vm492_vm2, %v1837_v52  ;;  %v6362_v47 = vpop.permute.xlu1 %3751 }
 0x145   : > { %4822 = vmatprep.mubr.msk.bf16.mxu1 %vm492_vm2, %v1846_v22  ;;  %v6350_v62 = vpop.permute.xlu0 %3736 }
 0x147   : > { %4967 = vmatmul.mubr.msk.bf16.gmra.mrb[20].mxu0 %vm492_vm2, %v3375_v61 }
 0x148   : > { %4970 = vmatprep.mubr.msk.bf16.mxu0 %vm492_vm2, %v3377_v16  ;;  %v6367_v58 = vpop.permute.xlu1 %3761 }
 0x149   : > { %v6360_v50 = vpop.permute.xlu0 %3746 }
 0x14c   : > { %4823 = vmatmul.mubr.msk.bf16.gmra.mrb[28].mxu1 %vm492_vm2, %v1855_v35  ;;  %v6382_v35 = vpop.permute.xlu1 %3771 }
 0x14d   : > { %4826 = vmatprep.mubr.msk.bf16.mxu1 %vm492_vm2, %v1864_v55  ;;  %v6365_v20 = vpop.permute.xlu0 %3756 }
 0x14f   : > { %4971 = vmatmul.mubr.msk.bf16.gmra.mrb[24].mxu0 %vm492_vm2, %v3379_v56 }
 0x150   : > { %4974 = vmatprep.mubr.msk.bf16.mxu0 %vm492_vm2, %v3381_v5 }
 0x151   : > { %v6376_v61 = vpop.permute.xlu0 %3766 }
 0x154   : > { %4827 = vmatmul.mubr.msk.bf16.gmra.mrb[32].mxu1 %vm492_vm2, %v1873_v4 }
 0x157   : > { %4975 = vmatmul.mubr.msk.bf16.gmra.mrb[28].mxu0 %vm492_vm2, %v3383_v44 }
 0x158   : > { %4978 = vmatprep.mubr.msk.bf16.mxu0 %vm492_vm2, %v3385_v48 }
 0x15f   : > { %4979 = vmatmul.mubr.msk.bf16.gmra.mrb[32].mxu0 %vm492_vm2, %v3387_v1 }
 0x1c7   : > { %v4758_v54 = vpop.f32.mrb[0].mxu1 }
 0x1c8   : > { %v1518_v17 = vpop.f32.mrb[1].mxu1 }
 0x1c9   : > { %v4759_v63 = vpop.f32.mrb[2].mxu1 }
 0x1ca   : > { %v1521_v21 = vpop.f32.mrb[3].mxu1 }
 0x1cf   : > { %v4762_v30 = vpop.f32.mrb[4].mxu1 }
 0x1d0   : > { %v1534_v51 = vpop.f32.mrb[5].mxu1 }
 0x1d1   : > { %v6324_v36 = vpop.f32.mrb[6].mxu1 }
 0x1d2   : > { %v6326_v60 = vpop.f32.mrb[7].mxu1 }
 0x1d7   : > { %v6328_v43 = vpop.f32.mrb[8].mxu1 }
 0x1d8   : > { %v6330_v31 = vpop.f32.mrb[9].mxu1 }
 0x1d9   : > { %v6332_v32 = vpop.f32.mrb[10].mxu1 }
 0x1da   : > { %v6334_v13 = vpop.f32.mrb[11].mxu1 }
 0x1df   : > { %v6338_v8 = vpop.f32.mrb[12].mxu1 }
 0x1e0   : > { %v6340_v40 = vpop.f32.mrb[13].mxu1 }
 0x1e1   : > { %v6342_v38 = vpop.f32.mrb[14].mxu1 }
 0x1e2   : > { %v6344_v7 = vpop.f32.mrb[15].mxu1 }
 0x1e7   : > { %v6348_v23 = vpop.f32.mrb[16].mxu1 }
 0x1e8   : > { %v6352_v12 = vpop.f32.mrb[17].mxu1 }
 0x1e9   : > { %v6354_v37 = vpop.f32.mrb[18].mxu1 }
 0x1ea   : > { %v6358_v46 = vpop.f32.mrb[19].mxu1 }
 0x1f2   : > { %v4948_v0 = vpop.f32.mrb[0].mxu0 }
 0x1f3   : > { %v4984_v52 = vadd.f32 %v4948_v0, %v4758_v54  ;;  %v3479_v14 = vpop.f32.mrb[1].mxu0 }
 0x1f4   : > { %v4985_v11 = vadd.f32 %v3479_v14, %v1518_v17  ;;  %v4949_v22 = vpop.f32.mrb[2].mxu0 }
 0x1f5   : > { %v3876_v33 = vmul.f32 %v4984_v52, %v3707_v42  ;;  %v4986_v2 = vadd.f32 %v4949_v22, %v4759_v63  ;;  %v3482_v53 = vpop.f32.mrb[3].mxu0  ;;  %v6400_v52 = vpop.permute.xlu1 %3781 }
 0x1f6   : > { %v3874_v26 = vmul.f32 %v4985_v11, %v3697_v57  ;;  %v4987_v28 = vadd.f32 %v3482_v53, %v1521_v21  ;;  %v6392_v57 = vpop.permute.xlu0 %3776 }
 0x1f7   : > { %3913 = vst.msk [vmem:[%s6372_s22 + $0x10] sm:$0xff] %vm3910_vm8, %v3876_v33  ;;  %v3877_v6 = vmul.f32 %v4986_v2, %v3712_v19  ;;  %v4026_v25 = vmul.f32 %v3876_v33, %v3876_v33  ;;  %v3950_v10 = vsel %vm3910_vm8, %v3876_v33, 0.0 }
 0x1f8   : > { %3911 = vst.msk [vmem:[%s6372_s22] sm:$0xff] %vm3910_vm8, %v3874_v26  ;;  %v4024_v34 = vmul.f32 %v3874_v26, %v3874_v26  ;;  %v3875_v16 = vmul.f32 %v4987_v28, %v3702_v18  ;;  %v3947_v24 = vsel %vm3910_vm8, %v3874_v26, 0.0 }
 0x1f9   : > { %3914 = vst.msk [vmem:[%s6372_s22 + $0x18] sm:$0xff] %vm3910_vm8, %v3877_v6  ;;  %v4027_v59 = vmul.f32 %v3877_v6, %v3877_v6  ;;  %v3952_v42 = vsel %vm3910_vm8, %v3877_v6, 0.0 }
 0x1fa   : > { %3912 = vst.msk [vmem:[%s6372_s22 + $0x8] sm:$0xff] %vm3910_vm8, %v3875_v16  ;;  %v3948_v39 = vsel %vm3910_vm8, %v3875_v16, 0.0  ;;  %v4025_v55 = vmul.f32 %v3875_v16, %v3875_v16  ;;  %v4952_v41 = vpop.f32.mrb[4].mxu0  ;;  %v4060_v3 = vsel %vm3910_vm8, %v4024_v34, 0.0 }
 0x1fb   : > { %v3949_v56 = vadd.f32 %v3948_v39, %v3947_v24  ;;  %v4988_v5 = vadd.f32 %v4952_v41, %v4762_v30  ;;  %v3495_v4 = vpop.f32.mrb[5].mxu0  ;;  %v4063_v30 = vsel %vm3910_vm8, %v4026_v25, 0.0  ;;  %v6414_v25 = vpop.permute.xlu0 %3786 }
 0x1fc   : > { %v4061_v44 = vsel %vm3910_vm8, %v4025_v55, 0.0  ;;  %v4989_v48 = vadd.f32 %v3495_v4, %v1534_v51  ;;  %v4953_v49 = vpop.f32.mrb[6].mxu0  ;;  %v4065_v51 = vsel %vm3910_vm8, %v4027_v59, 0.0 }
 0x1fd   : > { %v3951_v1 = vadd.f32 %v3950_v10, %v3949_v56  ;;  %v4062_v54 = vadd.f32 %v4061_v44, %v4060_v3  ;;  %v3880_v17 = vmul.f32 %v4988_v5, %v3727_v29  ;;  %v4990_v63 = vadd.f32 %v4953_v49, %v6324_v36  ;;  %v3498_v21 = vpop.f32.mrb[7].mxu0 }
 0x1fe   : > { %v3878_v18 = vmul.f32 %v4989_v48, %v3717_v15  ;;  %v4991_v19 = vadd.f32 %v3498_v21, %v6326_v60 }
 0x1ff   : > { %v4064_v0 = vadd.f32 %v4063_v30, %v4062_v54  ;;  %3917 = vst.msk [vmem:[%s6372_s22 + $0x30] sm:$0xff] %vm3910_vm8, %v3880_v17  ;;  %v3953_v29 = vadd.f32 %v3952_v42, %v3951_v1  ;;  %v3881_v11 = vmul.f32 %v4990_v63, %v6346_v45  ;;  %v4030_v33 = vmul.f32 %v3880_v17, %v3880_v17 }
 0x200   : > { %3915 = vst.msk [vmem:[%s6372_s22 + $0x20] sm:$0xff] %vm3910_vm8, %v3878_v18  ;;  %v3954_v36 = vsel %vm3910_vm8, %v3878_v18, 0.0  ;;  %v4028_v14 = vmul.f32 %v3878_v18, %v3878_v18  ;;  %v3879_v15 = vmul.f32 %v4991_v19, %v6336_v9  ;;  %v3958_v9 = vsel %vm3910_vm8, %v3880_v17, 0.0 }
 0x201   : > { %v3955_v22 = vadd.f32 %v3954_v36, %v3953_v29  ;;  %v4066_v60 = vadd.f32 %v4065_v51, %v4064_v0  ;;  %3918 = vst.msk [vmem:[%s6372_s22 + $0x38] sm:$0xff] %vm3910_vm8, %v3881_v11  ;;  %v4031_v24 = vmul.f32 %v3881_v11, %v3881_v11  ;;  %v3960_v10 = vsel %vm3910_vm8, %v3881_v11, 0.0 }
 0x202   : > { %v4067_v2 = vsel %vm3910_vm8, %v4028_v14, 0.0  ;;  %3916 = vst.msk [vmem:[%s6372_s22 + $0x28] sm:$0xff] %vm3910_vm8, %v3879_v15  ;;  %v3956_v53 = vsel %vm3910_vm8, %v3879_v15, 0.0  ;;  %v4956_v26 = vpop.f32.mrb[8].mxu0  ;;  %v4029_v34 = vmul.f32 %v3879_v15, %v3879_v15  ;;  %v4071_v48 = vsel %vm3910_vm8, %v4030_v33, 0.0 }
 0x203   : > { %v4068_v28 = vadd.f32 %v4067_v2, %v4066_v60  ;;  %v3957_v6 = vadd.f32 %v3956_v53, %v3955_v22  ;;  %v4992_v16 = vadd.f32 %v4956_v26, %v6328_v43  ;;  %v3511_v45 = vpop.f32.mrb[9].mxu0  ;;  %v6421_v43 = vpop.permute.xlu1 %3791 }
 0x204   : > { %v4993_v39 = vadd.f32 %v3511_v45, %v6330_v31  ;;  %v4957_v55 = vpop.f32.mrb[10].mxu0  ;;  %v4069_v59 = vsel %vm3910_vm8, %v4029_v34, 0.0 }
 0x205   : > { %v3959_v41 = vadd.f32 %v3958_v9, %v3957_v6  ;;  %v3884_v56 = vmul.f32 %v4992_v16, %v6360_v50  ;;  %v4994_v5 = vadd.f32 %v4957_v55, %v6332_v32  ;;  %v3514_v4 = vpop.f32.mrb[11].mxu0  ;;  %v4070_v3 = vadd.f32 %v4069_v59, %v4068_v28 }
 0x206   : > { %v3882_v44 = vmul.f32 %v4993_v39, %v6350_v62  ;;  %v4995_v31 = vadd.f32 %v3514_v4, %v6334_v13  ;;  %v4073_v62 = vsel %vm3910_vm8, %v4031_v24, 0.0  ;;  %v6437_v13 = vpop.permute.xlu0 %3796 }
 0x207   : > { %3921 = vst.msk [vmem:[%s6372_s22 + $0x50] sm:$0xff] %vm3910_vm8, %v3884_v56  ;;  %v3961_v49 = vadd.f32 %v3960_v10, %v3959_v41  ;;  %v3885_v50 = vmul.f32 %v4994_v5, %v6362_v47  ;;  %v4072_v32 = vadd.f32 %v4071_v48, %v4070_v3  ;;  %v4034_v19 = vmul.f32 %v3884_v56, %v3884_v56  ;;  %v6444_v29 = vpop.permute.xlu1 %3801 }
 0x208   : > { %3919 = vst.msk [vmem:[%s6372_s22 + $0x40] sm:$0xff] %vm3910_vm8, %v3882_v44  ;;  %v3962_v1 = vsel %vm3910_vm8, %v3882_v44, 0.0  ;;  %v4032_v54 = vmul.f32 %v3882_v44, %v3882_v44  ;;  %v3883_v17 = vmul.f32 %v4995_v31, %v6356_v27  ;;  %v3966_v36 = vsel %vm3910_vm8, %v3884_v56, 0.0 }
 0x209   : > { %v3963_v63 = vadd.f32 %v3962_v1, %v3961_v49  ;;  %3922 = vst.msk [vmem:[%s6372_s22 + $0x58] sm:$0xff] %vm3910_vm8, %v3885_v50  ;;  %v4074_v21 = vadd.f32 %v4073_v62, %v4072_v32  ;;  %v4035_v60 = vmul.f32 %v3885_v50, %v3885_v50  ;;  %v3968_v28 = vsel %vm3910_vm8, %v3885_v50, 0.0 }
 0x20a   : > { %v4075_v30 = vsel %vm3910_vm8, %v4032_v54, 0.0  ;;  %3920 = vst.msk [vmem:[%s6372_s22 + $0x48] sm:$0xff] %vm3910_vm8, %v3883_v17  ;;  %v3964_v47 = vsel %vm3910_vm8, %v3883_v17, 0.0  ;;  %v4033_v42 = vmul.f32 %v3883_v17, %v3883_v17  ;;  %v4960_v18 = vpop.f32.mrb[12].mxu0  ;;  %v4079_v45 = vsel %vm3910_vm8, %v4034_v19, 0.0  ;;  %v6464_v24 = vpop.permute.xlu0 %3806 }
 0x20b   : > { %v3965_v51 = vadd.f32 %v3964_v47, %v3963_v63  ;;  %v4996_v27 = vadd.f32 %v4960_v18, %v6338_v8  ;;  %v3527_v0 = vpop.f32.mrb[13].mxu0  ;;  %v4076_v14 = vadd.f32 %v4075_v30, %v4074_v21  ;;  %v4081_v59 = vsel %vm3910_vm8, %v4035_v60, 0.0 }
 0x20c   : > { %v4077_v11 = vsel %vm3910_vm8, %v4033_v42, 0.0  ;;  %v4997_v15 = vadd.f32 %v3527_v0, %v6340_v40  ;;  %v4961_v22 = vpop.f32.mrb[14].mxu0 }
 0x20d   : > { %v3967_v33 = vadd.f32 %v3966_v36, %v3965_v51  ;;  %v3888_v2 = vmul.f32 %v4996_v27, %v6376_v61  ;;  %v4998_v53 = vadd.f32 %v4961_v22, %v6342_v38  ;;  %v3530_v8 = vpop.f32.mrb[15].mxu0  ;;  %v4078_v6 = vadd.f32 %v4077_v11, %v4076_v14 }
 0x20e   : > { %v3886_v34 = vmul.f32 %v4997_v15, %v6365_v20  ;;  %v4999_v16 = vadd.f32 %v3530_v8, %v6344_v7 }
 0x20f   : > { %v6451_v26 = vpop.f32.mrb[20].mxu1  ;;  %3925 = vst.msk [vmem:[%s6372_s22 + $0x70] sm:$0xff] %vm3910_vm8, %v3888_v2  ;;  %v3969_v61 = vadd.f32 %v3968_v28, %v3967_v33  ;;  %v3889_v38 = vmul.f32 %v4998_v53, %v6382_v35  ;;  %v4080_v39 = vadd.f32 %v4079_v45, %v4078_v6  ;;  %v6475_v35 = vpop.permute.xlu1 %3811  ;;  %v4038_v31 = vmul.f32 %v3888_v2, %v3888_v2 }
 0x210   : > { %v6456_v40 = vpop.f32.mrb[21].mxu1  ;;  %3923 = vst.msk [vmem:[%s6372_s22 + $0x60] sm:$0xff] %vm3910_vm8, %v3886_v34  ;;  %v3970_v7 = vsel %vm3910_vm8, %v3886_v34, 0.0  ;;  %v4036_v20 = vmul.f32 %v3886_v34, %v3886_v34  ;;  %v3887_v55 = vmul.f32 %v4999_v16, %v6367_v58  ;;  %v3974_v50 = vsel %vm3910_vm8, %v3888_v2, 0.0 }
 0x211   : > { %v6462_v9 = vpop.f32.mrb[22].mxu1  ;;  %v3971_v56 = vadd.f32 %v3970_v7, %v3969_v61  ;;  %3926 = vst.msk [vmem:[%s6372_s22 + $0x78] sm:$0xff] %vm3910_vm8, %v3889_v38  ;;  %v4082_v5 = vadd.f32 %v4081_v59, %v4080_v39  ;;  %v4039_v62 = vmul.f32 %v3889_v38, %v3889_v38  ;;  %v3976_v18 = vsel %vm3910_vm8, %v3889_v38, 0.0 }
 0x212   : > { %v6470_v41 = vpop.f32.mrb[23].mxu1  ;;  %v4083_v4 = vsel %vm3910_vm8, %v4036_v20, 0.0  ;;  %3924 = vst.msk [vmem:[%s6372_s22 + $0x68] sm:$0xff] %vm3910_vm8, %v3887_v55  ;;  %v3972_v10 = vsel %vm3910_vm8, %v3887_v55, 0.0  ;;  %v4037_v3 = vmul.f32 %v3887_v55, %v3887_v55  ;;  %v4964_v44 = vpop.f32.mrb[16].mxu0 }
 0x213   : > { %v3973_v58 = vadd.f32 %v3972_v10, %v3971_v56  ;;  %v5000_v48 = vadd.f32 %v4964_v44, %v6348_v23  ;;  %v3543_v49 = vpop.f32.mrb[17].mxu0  ;;  %v4084_v32 = vadd.f32 %v4083_v4, %v4082_v5  ;;  %v6489_v23 = vpop.permute.xlu0 %3816  ;;  %v4089_v60 = vsel %vm3910_vm8, %v4039_v62, 0.0 }
 0x214   : > { %v4085_v1 = vsel %vm3910_vm8, %v4037_v3, 0.0  ;;  %v5001_v54 = vadd.f32 %v3543_v49, %v6352_v12  ;;  %v4965_v17 = vpop.f32.mrb[18].mxu0  ;;  %v6502_v14 = vpop.permute.xlu1 %3821 }
 0x215   : > { %v3975_v63 = vadd.f32 %v3974_v50, %v3973_v58  ;;  %v3892_v21 = vmul.f32 %v5000_v48, %v6414_v25  ;;  %v5002_v30 = vadd.f32 %v4965_v17, %v6354_v37  ;;  %v3546_v47 = vpop.f32.mrb[19].mxu0  ;;  %v4086_v19 = vadd.f32 %v4085_v1, %v4084_v32 }
 0x216   : > { %v3890_v51 = vmul.f32 %v5001_v54, %v6392_v57  ;;  %v5003_v12 = vadd.f32 %v3546_v47, %v6358_v46  ;;  %v4087_v25 = vsel %vm3910_vm8, %v4038_v31, 0.0 }
 0x217   : > { %v6487_v42 = vpop.f32.mrb[24].mxu1  ;;  %3929 = vst.msk [vmem:[%s6372_s22 + $0x90] sm:$0xff] %vm3910_vm8, %v3892_v21  ;;  %v3977_v37 = vadd.f32 %v3976_v18, %v3975_v63  ;;  %v3893_v0 = vmul.f32 %v5002_v30, %v6421_v43  ;;  %v4088_v11 = vadd.f32 %v4087_v25, %v4086_v19  ;;  %v4042_v6 = vmul.f32 %v3892_v21, %v3892_v21  ;;  %v3827_v45 = vpop.permute.xlu0 %3826 }
 0x218   : > { %v6494_v27 = vpop.f32.mrb[25].mxu1  ;;  %3927 = vst.msk [vmem:[%s6372_s22 + $0x80] sm:$0xff] %vm3910_vm8, %v3890_v51  ;;  %v3978_v46 = vsel %vm3910_vm8, %v3890_v51, 0.0  ;;  %v4040_v57 = vmul.f32 %v3890_v51, %v3890_v51  ;;  %v3891_v15 = vmul.f32 %v5003_v12, %v6400_v52  ;;  %v3982_v61 = vsel %vm3910_vm8, %v3892_v21, 0.0  ;;  %v3832_v10 = vpop.permute.xlu1 %3831 }
 0x219   : > { %v6500_v36 = vpop.f32.mrb[26].mxu1  ;;  %v3979_v33 = vadd.f32 %v3978_v46, %v3977_v37  ;;  %3930 = vst.msk [vmem:[%s6372_s22 + $0x98] sm:$0xff] %vm3910_vm8, %v3893_v0  ;;  %v4090_v43 = vadd.f32 %v4089_v60, %v4088_v11  ;;  %v4043_v55 = vmul.f32 %v3893_v0, %v3893_v0  ;;  %v3984_v3 = vsel %vm3910_vm8, %v3893_v0, 0.0 }
 0x21a   : > { %v6508_v22 = vpop.f32.mrb[27].mxu1  ;;  %v4091_v2 = vsel %vm3910_vm8, %v4040_v57, 0.0  ;;  %3928 = vst.msk [vmem:[%s6372_s22 + $0x88] sm:$0xff] %vm3910_vm8, %v3891_v15  ;;  %v3980_v53 = vsel %vm3910_vm8, %v3891_v15, 0.0  ;;  %v4041_v8 = vmul.f32 %v3891_v15, %v3891_v15  ;;  %v4968_v28 = vpop.f32.mrb[20].mxu0  ;;  %v4095_v48 = vsel %vm3910_vm8, %v4042_v6, 0.0 }
 0x21b   : > { %v3981_v34 = vadd.f32 %v3980_v53, %v3979_v33  ;;  %v5004_v52 = vadd.f32 %v4968_v28, %v6451_v26  ;;  %v3559_v16 = vpop.f32.mrb[21].mxu0  ;;  %v4092_v38 = vadd.f32 %v4091_v2, %v4090_v43  ;;  %v4097_v54 = vsel %vm3910_vm8, %v4043_v55, 0.0  ;;  %v6545_v62 = vpop.permute.xlu0 %3836 }
 0x21c   : > { %v4093_v39 = vsel %vm3910_vm8, %v4041_v8, 0.0  ;;  %v5005_v7 = vadd.f32 %v3559_v16, %v6456_v40  ;;  %v4969_v20 = vpop.f32.mrb[22].mxu0  ;;  %v6552_v12 = vpop.permute.xlu1 %3841 }
 0x21d   : > { %v3983_v59 = vadd.f32 %v3982_v61, %v3981_v34  ;;  %v3896_v56 = vmul.f32 %v5004_v52, %v6464_v24  ;;  %v5006_v5 = vadd.f32 %v4969_v20, %v6462_v9  ;;  %v3562_v4 = vpop.f32.mrb[23].mxu0  ;;  %v4094_v44 = vadd.f32 %v4093_v39, %v4092_v38 }
 0x21e   : > { %v3894_v31 = vmul.f32 %v5005_v7, %v6437_v13  ;;  %v5007_v40 = vadd.f32 %v3562_v4, %v6470_v41 }
 0x21f   : > { %v6523_v26 = vpop.f32.mrb[28].mxu1  ;;  %3933 = vst.msk [vmem:[%s6372_s22 + $0xb0] sm:$0xff] %vm3910_vm8, %v3896_v56  ;;  %v3985_v9 = vadd.f32 %v3984_v3, %v3983_v59  ;;  %v3897_v24 = vmul.f32 %v5006_v5, %v6475_v35  ;;  %v4096_v50 = vadd.f32 %v4095_v48, %v4094_v44  ;;  %v4046_v18 = vmul.f32 %v3896_v56, %v3896_v56  ;;  %v3847_v16 = vpop.permute.xlu0 %3846 }
 0x220   : > { %v6528_v58 = vpop.f32.mrb[29].mxu1  ;;  %3931 = vst.msk [vmem:[%s6372_s22 + $0xa0] sm:$0xff] %vm3910_vm8, %v3894_v31  ;;  %v3986_v13 = vsel %vm3910_vm8, %v3894_v31, 0.0  ;;  %v4044_v32 = vmul.f32 %v3894_v31, %v3894_v31  ;;  %v3895_v41 = vmul.f32 %v5007_v40, %v6444_v29  ;;  %v3990_v25 = vsel %vm3910_vm8, %v3896_v56, 0.0  ;;  %v3852_v20 = vpop.permute.xlu1 %3851 }
 0x221   : > { %v6534_v49 = vpop.f32.mrb[30].mxu1  ;;  %v3987_v17 = vadd.f32 %v3986_v13, %v3985_v9  ;;  %3934 = vst.msk [vmem:[%s6372_s22 + $0xb8] sm:$0xff] %vm3910_vm8, %v3897_v24  ;;  %v4098_v35 = vadd.f32 %v4097_v54, %v4096_v50  ;;  %v4047_v57 = vmul.f32 %v3897_v24, %v3897_v24  ;;  %v3992_v2 = vsel %vm3910_vm8, %v3897_v24, 0.0 }
 0x222   : > { %v6540_v1 = vpop.f32.mrb[31].mxu1  ;;  %v4099_v63 = vsel %vm3910_vm8, %v4044_v32, 0.0  ;;  %3932 = vst.msk [vmem:[%s6372_s22 + $0xa8] sm:$0xff] %vm3910_vm8, %v3895_v41  ;;  %v3988_v21 = vsel %vm3910_vm8, %v3895_v41, 0.0  ;;  %v4045_v30 = vmul.f32 %v3895_v41, %v3895_v41  ;;  %v4972_v47 = vpop.f32.mrb[24].mxu0 }
 0x223   : > { %v3989_v29 = vadd.f32 %v3988_v21, %v3987_v17  ;;  %v5008_v19 = vadd.f32 %v4972_v47, %v6487_v42  ;;  %v3575_v51 = vpop.f32.mrb[25].mxu0  ;;  %v4100_v37 = vadd.f32 %v4099_v63, %v4098_v35  ;;  %v4105_v39 = vsel %vm3910_vm8, %v4047_v57, 0.0  ;;  %v3857_v17 = vpop.permute.xlu0 %3856 }
 0x224   : > { %v4101_v0 = vsel %vm3910_vm8, %v4045_v30, 0.0  ;;  %v5009_v11 = vadd.f32 %v3575_v51, %v6494_v27  ;;  %v4973_v46 = vpop.f32.mrb[26].mxu0  ;;  %v4103_v27 = vsel %vm3910_vm8, %v4046_v18, 0.0  ;;  %v3862_v18 = vpop.permute.xlu1 %3861 }
 0x225   : > { %v3991_v15 = vadd.f32 %v3990_v25, %v3989_v29  ;;  %v3900_v60 = vmul.f32 %v5008_v19, %v3827_v45  ;;  %v5010_v33 = vadd.f32 %v4973_v46, %v6500_v36  ;;  %v3578_v43 = vpop.f32.mrb[27].mxu0  ;;  %v4102_v53 = vadd.f32 %v4101_v0, %v4100_v37 }
 0x226   : > { %v3898_v8 = vmul.f32 %v5009_v11, %v6489_v23  ;;  %v5011_v28 = vadd.f32 %v3578_v43, %v6508_v22 }
 0x227   : > { %v6558_v42 = vpop.f32.mrb[32].mxu1  ;;  %3937 = vst.msk [vmem:[%s6372_s22 + $0xd0] sm:$0xff] %vm3910_vm8, %v3900_v60  ;;  %v3993_v34 = vadd.f32 %v3992_v2, %v3991_v15  ;;  %v3901_v36 = vmul.f32 %v5010_v33, %v3832_v10  ;;  %v4104_v45 = vadd.f32 %v4103_v27, %v4102_v53  ;;  %v4050_v10 = vmul.f32 %v3900_v60, %v3900_v60 }
 0x228   : > { %v6563_v6 = vpop.f32.mrb[33].mxu1  ;;  %3935 = vst.msk [vmem:[%s6372_s22 + $0xc0] sm:$0xff] %vm3910_vm8, %v3898_v8  ;;  %v3994_v23 = vsel %vm3910_vm8, %v3898_v8, 0.0  ;;  %v4048_v61 = vmul.f32 %v3898_v8, %v3898_v8  ;;  %v3899_v22 = vmul.f32 %v5011_v28, %v6502_v14  ;;  %v3998_v31 = vsel %vm3910_vm8, %v3900_v60, 0.0 }
 0x229   : > { %v6568_v52 = vpop.f32.mrb[34].mxu1  ;;  %v3995_v7 = vadd.f32 %v3994_v23, %v3993_v34  ;;  %3938 = vst.msk [vmem:[%s6372_s22 + $0xd8] sm:$0xff] %vm3910_vm8, %v3901_v36  ;;  %v4106_v55 = vadd.f32 %v4105_v39, %v4104_v45  ;;  %v4051_v50 = vmul.f32 %v3901_v36, %v3901_v36  ;;  %v3872_v23 = vpop.permute.xlu1 %3871 }
 0x22a   : > { %v6574_v38 = vpop.f32.mrb[35].mxu1  ;;  %v4107_v59 = vsel %vm3910_vm8, %v4048_v61, 0.0  ;;  %3936 = vst.msk [vmem:[%s6372_s22 + $0xc8] sm:$0xff] %vm3910_vm8, %v3899_v22  ;;  %v3996_v56 = vsel %vm3910_vm8, %v3899_v22, 0.0  ;;  %v4049_v5 = vmul.f32 %v3899_v22, %v3899_v22  ;;  %v4976_v4 = vpop.f32.mrb[28].mxu0 }
 0x22b   : > { %v3997_v3 = vadd.f32 %v3996_v56, %v3995_v7  ;;  %v5012_v14 = vadd.f32 %v4976_v4, %v6523_v26  ;;  %v3591_v44 = vpop.f32.mrb[29].mxu0  ;;  %v4108_v40 = vadd.f32 %v4107_v59, %v4106_v55  ;;  %v4000_v26 = vsel %vm3910_vm8, %v3901_v36, 0.0 }
 0x22c   : > { %v4109_v48 = vsel %vm3910_vm8, %v4049_v5, 0.0  ;;  %v5013_v9 = vadd.f32 %v3591_v44, %v6528_v58  ;;  %v4977_v24 = vpop.f32.mrb[30].mxu0  ;;  %v4111_v58 = vsel %vm3910_vm8, %v4050_v10, 0.0 }
 0x22d   : > { %v3999_v13 = vadd.f32 %v3998_v31, %v3997_v3  ;;  %v3904_v32 = vmul.f32 %v5012_v14, %v3847_v16  ;;  %v5014_v41 = vadd.f32 %v4977_v24, %v6534_v49  ;;  %v3594_v54 = vpop.f32.mrb[31].mxu0  ;;  %v4110_v35 = vadd.f32 %v4109_v48, %v4108_v40 }
 0x22e   : > { %v3902_v63 = vmul.f32 %v5013_v9, %v6545_v62  ;;  %v5015_v21 = vadd.f32 %v3594_v54, %v6540_v1  ;;  %v4113_v62 = vsel %vm3910_vm8, %v4051_v50, 0.0 }
 0x22f   : > { %3941 = vst.msk [vmem:[%s6372_s22 + $0xf0] sm:$0xff] %vm3910_vm8, %v3904_v32  ;;  %v4001_v30 = vadd.f32 %v4000_v26, %v3999_v13  ;;  %v3905_v47 = vmul.f32 %v5014_v41, %v3852_v20  ;;  %v4112_v29 = vadd.f32 %v4111_v58, %v4110_v35  ;;  %v4054_v57 = vmul.f32 %v3904_v32, %v3904_v32 }
 0x230   : > { %3939 = vst.msk [vmem:[%s6372_s22 + $0xe0] sm:$0xff] %vm3910_vm8, %v3902_v63  ;;  %v4002_v49 = vsel %vm3910_vm8, %v3902_v63, 0.0  ;;  %v4052_v19 = vmul.f32 %v3902_v63, %v3902_v63  ;;  %v3903_v51 = vmul.f32 %v5015_v21, %v6552_v12  ;;  %v3867_v12 = vpop.permute.xlu0 %3866  ;;  %v4006_v43 = vsel %vm3910_vm8, %v3904_v32, 0.0 }
 0x231   : > { %v4003_v25 = vadd.f32 %v4002_v49, %v4001_v30  ;;  %3942 = vst.msk [vmem:[%s6372_s22 + $0xf8] sm:$0xff] %vm3910_vm8, %v3905_v47  ;;  %v4114_v1 = vadd.f32 %v4113_v62, %v4112_v29  ;;  %v4055_v27 = vmul.f32 %v3905_v47, %v3905_v47  ;;  %v4119_v7 = vsel %vm3910_vm8, %v4054_v57, 0.0 }
 0x232   : > { %v4115_v37 = vsel %vm3910_vm8, %v4052_v19, 0.0  ;;  %3940 = vst.msk [vmem:[%s6372_s22 + $0xe8] sm:$0xff] %vm3910_vm8, %v3903_v51  ;;  %v4004_v0 = vsel %vm3910_vm8, %v3903_v51, 0.0  ;;  %v4053_v11 = vmul.f32 %v3903_v51, %v3903_v51  ;;  %v4980_v46 = vpop.f32.mrb[32].mxu0 }
 0x233   : > { %v4005_v15 = vadd.f32 %v4004_v0, %v4003_v25  ;;  %v5016_v60 = vadd.f32 %v4980_v46, %v6558_v42  ;;  %v3607_v33 = vpop.f32.mrb[33].mxu0  ;;  %v4116_v2 = vadd.f32 %v4115_v37, %v4114_v1  ;;  %v4008_v42 = vsel %vm3910_vm8, %v3905_v47, 0.0 }
 0x234   : > { %v4117_v53 = vsel %vm3910_vm8, %v4053_v11, 0.0  ;;  %v5017_v8 = vadd.f32 %v3607_v33, %v6563_v6  ;;  %v4981_v28 = vpop.f32.mrb[34].mxu0  ;;  %v4121_v5 = vsel %vm3910_vm8, %v4055_v27, 0.0 }
 0x235   : > { %v4007_v34 = vadd.f32 %v4006_v43, %v4005_v15  ;;  %v3908_v36 = vmul.f32 %v5016_v60, %v3867_v12  ;;  %v5018_v16 = vadd.f32 %v4981_v28, %v6568_v52  ;;  %v3610_v45 = vpop.f32.mrb[35].mxu0  ;;  %v4118_v61 = vadd.f32 %v4117_v53, %v4116_v2 }
 0x236   : > { %v3906_v22 = vmul.f32 %v5017_v8, %v3857_v17  ;;  %v5019_v39 = vadd.f32 %v3610_v45, %v6574_v38 }
 0x237   : > { %3945 = vst.msk [vmem:[%s6372_s22 + $0x110] sm:$0xff] %vm3910_vm8, %v3908_v36  ;;  %v4009_v6 = vadd.f32 %v4008_v42, %v4007_v34  ;;  %v3909_v20 = vmul.f32 %v5018_v16, %v3872_v23  ;;  %v4120_v55 = vadd.f32 %v4119_v7, %v4118_v61  ;;  %v4058_v44 = vmul.f32 %v3908_v36, %v3908_v36 }
 0x238   : > { %3943 = vst.msk [vmem:[%s6372_s22 + $0x100] sm:$0xff] %vm3910_vm8, %v3906_v22  ;;  %v4010_v52 = vsel %vm3910_vm8, %v3906_v22, 0.0  ;;  %v4056_v59 = vmul.f32 %v3906_v22, %v3906_v22  ;;  %v3907_v56 = vmul.f32 %v5019_v39, %v3862_v18  ;;  %v4014_v40 = vsel %vm3910_vm8, %v3908_v36, 0.0 }
 0x239   : > { %v4011_v4 = vadd.f32 %v4010_v52, %v4009_v6  ;;  %3946 = vst.msk [vmem:[%s6372_s22 + $0x118] sm:$0xff] %vm3910_vm8, %v3909_v20  ;;  %v4122_v10 = vadd.f32 %v4121_v5, %v4120_v55  ;;  %v4059_v24 = vmul.f32 %v3909_v20, %v3909_v20  ;;  %v4016_v13 = vsel %vm3910_vm8, %v3909_v20, 0.0 }
 0x23a   : > { %v4123_v38 = vsel %vm3910_vm8, %v4056_v59, 0.0  ;;  %3944 = vst.msk [vmem:[%s6372_s22 + $0x108] sm:$0xff] %vm3910_vm8, %v3907_v56  ;;  %v4012_v3 = vsel %vm3910_vm8, %v3907_v56, 0.0  ;;  %v4057_v14 = vmul.f32 %v3907_v56, %v3907_v56  ;;  %v4127_v41 = vsel %vm3910_vm8, %v4058_v44, 0.0 }
 0x23b   : > { %v4013_v31 = vadd.f32 %v4012_v3, %v4011_v4  ;;  %v4124_v48 = vadd.f32 %v4123_v38, %v4122_v10  ;;  %v4129_v26 = vsel %vm3910_vm8, %v4059_v24, 0.0 }
 0x23c   : > { %v4125_v9 = vsel %vm3910_vm8, %v4057_v14, 0.0 }
 0x23d   : > { %v4015_v50 = vadd.f32 %v4014_v40, %v4013_v31  ;;  %v4126_v32 = vadd.f32 %v4125_v9, %v4124_v48 }
 0x23f   : > { %v4017_v54 = vadd.f32 %v4016_v13, %v4015_v50  ;;  %v4128_v17 = vadd.f32 %v4127_v41, %v4126_v32 }
 0x241   : > { %v4018_v35 = vrot.slane %v4017_v54, 4  ;;  %v4130_v63 = vadd.f32 %v4129_v26, %v4128_v17 }
 0x243   : > { %v4019_v21 = vadd.f32 %v4018_v35, %v4017_v54  ;;  %v4131_v58 = vrot.slane %v4130_v63, 4 }
 0x245   : > { %v4020_v30 = vrot.slane %v4019_v21, 2  ;;  %v4132_v47 = vadd.f32 %v4131_v58, %v4130_v63 }
 0x247   : > { %v4021_v18 = vadd.f32 %v4020_v30, %v4019_v21  ;;  %v4133_v29 = vrot.slane %v4132_v47, 2 }
 0x249   : > { %v4022_v49 = vrot.slane %v4021_v18, 1  ;;  %v4134_v19 = vadd.f32 %v4133_v29, %v4132_v47 }
 0x24b   : > { %v4135_v51 = vrot.slane %v4134_v19, 1  ;;  %v4023_v62 = vadd.f32 %v4022_v49, %v4021_v18 }
 0x24d   : > { %v4136_v25 = vadd.f32 %v4135_v51, %v4134_v19 }
 0x24f   : > { %v4138_v1 = vsel %vm4137_vm9, %v4023_v62, %v4136_v25 }
 0x250   : > { %4140 = vst.msk [vmem:[%s208_s26] sm:$0x3] %vm4139_vm10, %v4138_v1 }
 0x251 PF: > { %s15_s15 = sadd.s32 1, %s5374_s15  }
 0x252   : > { %p12_p4 = scmp.ge.s32.totalorder %s15_s15, 4  }
 0x254   :  { %14 = sbr.rel (!%p12_p4) target bundleno = 1 (0x1), region = 82 }

// kernel: conv_block_forward.6
= control target key start
LH: loop header
LB: loop body
LE: loop exit
PB: predicated region body
PF: predicated region fallthrough
CT: control target
= control target key end

     0   :  { %s5401_s15 = smov 0   ;;  %s6636_s0 = inlined_call_operand.vmem [shape: bf16[2,342,8], index: 0, kind: input, shape index: {}]   ;;  %s6637_s1 = inlined_call_operand.vmem [shape: bf16[9,8,8], index: 1, kind: input, shape index: {}]   ;;  %s6638_s2 = inlined_call_operand.vmem [shape: f32[288,1], index: 2, kind: input, shape index: {}]   ;;  %s6639_s3 = inlined_call_operand.vmem [shape: f32[2,288,8], index: 3, kind: output, shape index: {0}]   ;;  %s6640_s4 = inlined_call_operand.vmem [shape: f32[2,2,8], index: 4, kind: output, shape index: {1}]  }
   0x1 LB: > { %s4226_s16 = sadd.s32 4294967295, %s5373_s15   ;;  %p4230_p0 = scmp.ge.s32.totalorder %s5373_s15, 1  ;;  %s5373_s15 = sphi %s5401_s15, %s15_s15  }
   0x2   : > { %p165_p1 = scmp.lt.s32.totalorder %s5373_s15, 3 }
   0x4   : > { %p166_p2 = pnand %p4230_p0, %p165_p1 }
   0x5   : > { %vm547_vm0 = vcmask (!%p166_p2), 1043456   ;;  %v4348_v0 = vld [vmem:[%s6637_s1 + $0x10] sm:$0xf] (!%p166_p2)  ;;  %v4234_v1 = vld [vmem:[%s6637_s1 + $0x4] sm:$0xf] (!%p166_p2)  ;;  %p195_p3 = scmp.lt.s32.totalorder (!%p166_p2), %s4226_s16, 1 }
   0x6   : > { %169 = sbr.rel (%p166_p2) target bundleno = 593 (0x251), region = 32  ;;  %5275 = vmatprep.subr.msk.bf16.mxu0 (!%p166_p2), %vm547_vm0, %v4348_v0  ;;  %5271 = vmatprep.subr.msk.bf16.mxu1 (!%p166_p2), %vm547_vm0, %v4234_v1  ;;  %v5418_v2 = vsel (!%p166_p2), %vm547_vm0, %v4348_v0, 0  ;;  %v549_v3 = vsel (!%p166_p2), %vm547_vm0, %v4234_v1, 0  ;;  %v4368_v4 = vld [vmem:[%s6637_s1 + $0x14] sm:$0xf] (!%p166_p2)  ;;  %vm492_vm2 = vcmask (!%p166_p2), 64512  }
   0x7   : > { %4792 = vmatpush3.bf16.msra.mxu0 (!%p166_p2), %v5418_v2  ;;  %4640 = vmatpush3.bf16.msra.mxu1 (!%p166_p2), %v549_v3  ;;  %v246_v5 = vld [vmem:[%s6637_s1] sm:$0xf] (!%p166_p2)  ;;  %vm343_vm1 = vsmask.f32 (!%p166_p2), 7424  ;;  %v5439_v6 = vsel (!%p166_p2), %vm547_vm0, %v4368_v4, 0  ;;  %vm2150_vm4 = vcmask (!%p166_p2), 1045504  }
   0x8   : > { %5277 = vmatprep.subr.msk.bf16.mxu0 (!%p166_p2), %vm547_vm0, %v4368_v4  ;;  %5272 = vmatprep.subr.msk.bf16.mxu1 (!%p166_p2), %vm547_vm0, %v246_v5  ;;  %vm1703_vm3 = vsmask.f32 (!%p166_p2), 6400  ;;  %v765_v12 = vsel (!%p166_p2), %vm547_vm0, %v246_v5, 0  ;;  %v5487_v39 = vld [vmem:[%s6637_s1 + $0x8] sm:$0xf] (!%p166_p2)  ;;  %vm950_vm5 = vcmask (!%p166_p2), 1046528  }
   0x9   : > { %v5521_v1 = vld [vmem:[%s6637_s1 + $0x18] sm:$0xf] (!%p166_p2)  ;;  %vm2903_vm6 = vsmask.f32 (!%p166_p2), 5376  ;;  %vm3350_vm7 = vcmask (!%p166_p2), 1044480   ;;  %vm4136_vm8 = vcmask (!%p166_p2), 1040384  }
   0xa   : > { %vm4138_vm9 = vcmask (!%p166_p2), 58368  }
   0xd   : > { %s6642_s16 = smov (!%p195_p3, %s4226_s16), 1 }
   0xe   : > { %s5281_s25 = smul.u32 172, %s6642_s16  ;;  %s4233_s23 = sshll.u32 %s6642_s16, 1 }
   0xf   : > { %s208_s26 = scalar_lea.vmem %s6640_s4, %s4233_s23 }
  0x10   : > { %s5436_s28 = scalar_lea.vmem %s6636_s0, %s5281_s25 }
  0x11   : > { %v210_v7 = vld [vmem:[%s5436_s28] sm:$0xf]  ;;  %v5443_v8 = vld [vmem:[%s5436_s28 + $0x4] sm:$0xf]  ;;  %v5449_v10 = vld [vmem:[%s5436_s28 + $0x8] sm:$0xff]  }
  0x12   : > { %v5446_v9 = vcombine.low %v210_v7, %v5443_v8  ;;  %v1258_v11 = vld [vmem:[%s5436_s28 + $0x8] sm:$0xe]  ;;  %v5454_v13 = vld [vmem:[%s5436_s28 + $0xc] sm:$0xf]  ;;  %v352_v16 = vshll.u32 %v5449_v10, 16  ;;  %v356_v17 = vshrl.u32 %v5449_v10, 16 }
  0x13   : > { %v5461_v18 = vld [vmem:[%s5436_s28 + $0x10] sm:$0xff]   ;;  %v5467_v20 = vcombine.low %v1258_v11, %v5454_v13  ;;  %v5475_v28 = vld [vmem:[%s5436_s28 + $0x18] sm:$0xff]   ;;  %v5481_v34 = vld [vmem:[%s5436_s28 + $0x20] sm:$0xff]  }
  0x14   : > { %v345_v14 = vshrl.u32 %v5446_v9, 16  ;;  %v347_v15 = vshll.u32 %v5446_v9, 16  ;;  %v5464_v19 = vld [vmem:[%s5436_s28 + $0x10] sm:$0xff]   ;;  %v354_v22 = vrot.slane %v352_v16, 1  ;;  %v1713_v23 = vshrl.u32 %v5461_v18, 16  ;;  %v5478_v33 = vld [vmem:[%s5436_s28 + $0x18] sm:$0xff]  }
  0x15   : > { %v1716_v24 = vshll.u32 %v5461_v18, 16  ;;  %v1705_v25 = vshrl.u32 %v5467_v20, 16  ;;  %v1708_v26 = vshll.u32 %v5467_v20, 16  ;;  %v360_v27 = vshll.u32 %v5464_v19, 16  ;;  %v5496_v48 = vld [vmem:[%s5436_s28 + $0x20] sm:$0xff]   ;;  %v5499_v49 = vld [vmem:[%s5436_s28 + $0x28] sm:$0xff]  }
  0x16   : > { %v349_v21 = vrot.slane %v347_v15, 1  ;;  %v358_v30 = vor.u32 %v356_v17, %v354_v22  ;;  %v1715_v31 = vrot.slane %v1713_v23, 1  ;;  %v1722_v38 = vshrl.u32 %v5475_v28, 16  ;;  %v5505_v54 = vld [vmem:[%s5436_s28 + $0x28] sm:$0xff]   ;;  %v5511_v59 = vld [vmem:[%s5436_s28 + $0x30] sm:$0xff]   ;;  %v5535_v23 = vld [vmem:[%s5436_s28 + $0x38] sm:$0xff]  }
  0x17   : > { %v1718_v32 = vrot.slane %v1716_v24, 2  ;;  %v1707_v35 = vrot.slane %v1705_v25, 1  ;;  %v1710_v36 = vrot.slane %v1708_v26, 2  ;;  %v362_v37 = vrot.slane %v360_v27, 1  ;;  %v5516_v0 = vld [vmem:[%s5436_s28 + $0x30] sm:$0xff]  }
  0x18   : > { %v350_v29 = vor.u32 %v349_v21, %v345_v14  ;;  %v1725_v42 = vshll.u32 %v5475_v28, 16  ;;  %v364_v43 = vshrl.u32 %v5464_v19, 16  ;;  %v1724_v46 = vrot.slane %v1722_v38, 1 }
  0x19   : > { %v1719_v41 = vor.u32 %v1718_v32, %v1715_v31  ;;  %v1711_v44 = vor.u32 %v1710_v36, %v1707_v35  ;;  %v363_v45 = vsel %vm343_vm1, %v358_v30, %v362_v37  ;;  %v368_v47 = vshll.u32 %v5478_v33, 16  ;;  %v5544_v35 = vld [vmem:[%s5436_s28 + $0x38] sm:$0xff]  }
  0x1a   : > { %v355_v40 = vsel %vm343_vm1, %v350_v29, %v354_v22  ;;  %v1727_v50 = vrot.slane %v1725_v42, 2  ;;  %v366_v51 = vor.u32 %v364_v43, %v362_v37  ;;  %v1731_v52 = vshrl.u32 %v5481_v34, 16 }
  0x1b   : > { %4641 = vmatprep.mubr.msk.bf16.mxu1 %vm492_vm2, %v355_v40  ;;  %v1734_v53 = vshll.u32 %v5481_v34, 16  ;;  %v1720_v55 = vsel %vm1703_vm3, %v1711_v44, %v1719_v41  ;;  %v370_v56 = vrot.slane %v368_v47, 1  ;;  %v372_v57 = vshrl.u32 %v5478_v33, 16  ;;  %v5555_v44 = vld [vmem:[%s5436_s28 + $0x40] sm:$0xff]  }
  0x1c   : > { %4642 = vmatmul.mubr.msk.bf16.vlgmr.msra.gmra.mrb[0].mxu1 %vm492_vm2, %v363_v45  ;;  %v376_v58 = vshll.u32 %v5496_v48, 16  ;;  %4793 = vmatprep.mubr.msk.bf16.mxu0 %vm492_vm2, %v1720_v55  ;;  %v1728_v60 = vor.u32 %v1727_v50, %v1724_v46  ;;  %v1733_v61 = vrot.slane %v1731_v52, 1  ;;  %v1740_v63 = vshrl.u32 %v5499_v49, 16 }
  0x1d   : > { %4678 = vmatpush3.bf16.msra.mxu1 %v765_v12  ;;  %v1736_v62 = vrot.slane %v1734_v53, 2  ;;  %v371_v3 = vsel %vm343_vm1, %v366_v51, %v370_v56  ;;  %v374_v4 = vor.u32 %v372_v57, %v370_v56  ;;  %v1743_v7 = vshll.u32 %v5499_v49, 16  ;;  %v5560_v51 = vld [vmem:[%s5436_s28 + $0x40] sm:$0xff]  }
  0x1e   : > { %5273 = vmatprep.subr.msk.bf16.mxu1 %vm547_vm0, %v5487_v39  ;;  %v378_v5 = vrot.slane %v376_v58, 1  ;;  %v1729_v11 = vsel %vm1703_vm3, %v1719_v41, %v1728_v60  ;;  %4645 = vmatprep.mubr.msk.bf16.mxu1 %vm492_vm2, %v371_v3  ;;  %v1742_v14 = vrot.slane %v1740_v63, 1  ;;  %v380_v15 = vshrl.u32 %v5496_v48, 16  ;;  %v5571_v63 = vld [vmem:[%s5436_s28 + $0x48] sm:$0xff]  }
  0x1f   : > { %v1737_v12 = vor.u32 %v1736_v62, %v1733_v61  ;;  %4794 = vmatmul.mubr.msk.bf16.vlgmr.msra.gmra.mrb[0].mxu0 %vm492_vm2, %v1729_v11  ;;  %v1745_v17 = vrot.slane %v1743_v7, 2  ;;  %v384_v21 = vshll.u32 %v5505_v54, 16  ;;  %v1749_v22 = vshrl.u32 %v5511_v59, 16  ;;  %v5568_v62 = vld [vmem:[%s5436_s28 + $0x48] sm:$0xff]  }
  0x20   : > { %v379_v16 = vsel %vm343_vm1, %v374_v4, %v378_v5  ;;  %4830 = vmatpush3.bf16.msra.mxu0 %v5439_v6  ;;  %v382_v25 = vor.u32 %v380_v15, %v378_v5  ;;  %v1752_v26 = vshll.u32 %v5511_v59, 16  ;;  %v388_v27 = vshrl.u32 %v5505_v54, 16 }
  0x21   : > { %v1738_v24 = vsel %vm1703_vm3, %v1728_v60, %v1737_v12  ;;  %v1746_v29 = vor.u32 %v1745_v17, %v1742_v14  ;;  %v386_v30 = vrot.slane %v384_v21, 1  ;;  %v1751_v31 = vrot.slane %v1749_v22, 1  ;;  %5278 = vmatprep.subr.msk.bf16.mxu0 %vm547_vm0, %v5521_v1  ;;  %v5580_v14 = vld [vmem:[%s5436_s28 + $0x50] sm:$0xff]  }
  0x22   : > { %4797 = vmatprep.mubr.msk.bf16.mxu0 %vm492_vm2, %v1738_v24  ;;  %v392_v32 = vshll.u32 %v5516_v0, 16  ;;  %v1754_v6 = vrot.slane %v1752_v26, 2  ;;  %v1758_v36 = vshrl.u32 %v5535_v23, 16  ;;  %v1761_v37 = vshll.u32 %v5535_v23, 16 }
  0x23   : > { %v396_v38 = vshrl.u32 %v5516_v0, 16  ;;  %v1747_v40 = vsel %vm1703_vm3, %v1737_v12, %v1746_v29  ;;  %v387_v41 = vsel %vm343_vm1, %v382_v25, %v386_v30  ;;  %v390_v42 = vor.u32 %v388_v27, %v386_v30  ;;  %v5588_v25 = vld [vmem:[%s5436_s28 + $0x50] sm:$0xff]  }
  0x24   : > { %4646 = vmatmul.mubr.msk.bf16.gmra.mrb[4].mxu1 %vm492_vm2, %v379_v16  ;;  %v394_v43 = vrot.slane %v392_v32, 1  ;;  %v1755_v45 = vor.u32 %v1754_v6, %v1751_v31  ;;  %v1760_v46 = vrot.slane %v1758_v36, 1  ;;  %v1763_v47 = vrot.slane %v1761_v37, 2 }
  0x25   : > { %4649 = vmatprep.mubr.msk.bf16.mxu1 %vm492_vm2, %v387_v41  ;;  %v400_v50 = vshll.u32 %v5544_v35, 16  ;;  %v1767_v55 = vshrl.u32 %v5555_v44, 16  ;;  %v1770_v56 = vshll.u32 %v5555_v44, 16  ;;  %v404_v61 = vshrl.u32 %v5544_v35, 16  ;;  %v5598_v41 = vld [vmem:[%s5436_s28 + $0x58] sm:$0xff]  }
  0x26   : > { %v395_v52 = vsel %vm343_vm1, %v390_v42, %v394_v43  ;;  %v398_v53 = vor.u32 %v396_v38, %v394_v43  ;;  %v1756_v57 = vsel %vm1703_vm3, %v1746_v29, %v1755_v45  ;;  %v1764_v58 = vor.u32 %v1763_v47, %v1760_v46  ;;  %v5593_v29 = vld [vmem:[%s5436_s28 + $0x58] sm:$0xff]  }
  0x27   : > { %v402_v60 = vrot.slane %v400_v50, 1  ;;  %4798 = vmatmul.mubr.msk.bf16.gmra.mrb[4].mxu0 %vm492_vm2, %v1747_v40  ;;  %v1769_v3 = vrot.slane %v1767_v55, 1  ;;  %v1772_v4 = vrot.slane %v1770_v56, 2  ;;  %v408_v5 = vshll.u32 %v5560_v51, 16 }
  0x28   : > { %v412_v7 = vshrl.u32 %v5560_v51, 16  ;;  %4801 = vmatprep.mubr.msk.bf16.mxu0 %vm492_vm2, %v1756_v57  ;;  %v1776_v12 = vshrl.u32 %v5568_v62, 16  ;;  %v1779_v16 = vshll.u32 %v5568_v62, 16  ;;  %v416_v17 = vshll.u32 %v5571_v63, 16  ;;  %v2144_v57 = vld [vmem:[%s5436_s28 + $0x8] sm:$0xc] }
  0x29   : > { %v403_v11 = vsel %vm343_vm1, %v398_v53, %v402_v60  ;;  %v1773_v15 = vor.u32 %v1772_v4, %v1769_v3  ;;  %v410_v21 = vrot.slane %v408_v5, 1  ;;  %v1785_v22 = vshrl.u32 %v5580_v14, 16 }
  0x2a   : > { %v1788_v24 = vshll.u32 %v5580_v14, 16  ;;  %v1765_v26 = vsel %vm1703_vm3, %v1755_v45, %v1764_v58  ;;  %v406_v27 = vor.u32 %v404_v61, %v402_v60  ;;  %v1778_v30 = vrot.slane %v1776_v12, 1 }
  0x2b   : > { %v1781_v31 = vrot.slane %v1779_v16, 2  ;;  %v414_v32 = vor.u32 %v412_v7, %v410_v21  ;;  %v418_v6 = vrot.slane %v416_v17, 1  ;;  %v1774_v36 = vsel %vm1703_vm3, %v1764_v58, %v1773_v15  ;;  %v5612_v58 = vld [vmem:[%s5436_s28 + $0x60] sm:$0xff]  }
  0x2c   : > { %4650 = vmatmul.mubr.msk.bf16.gmra.mrb[8].mxu1 %vm492_vm2, %v395_v52  ;;  %v1787_v37 = vrot.slane %v1785_v22, 1  ;;  %v1790_v38 = vrot.slane %v1788_v24, 2  ;;  %v424_v40 = vshll.u32 %v5588_v25, 16  ;;  %v411_v42 = vsel %vm343_vm1, %v406_v27, %v410_v21 }
  0x2d   : > { %4653 = vmatprep.mubr.msk.bf16.mxu1 %vm492_vm2, %v403_v11  ;;  %v420_v43 = vshrl.u32 %v5571_v63, 16  ;;  %v1794_v45 = vshrl.u32 %v5593_v29, 16  ;;  %v1797_v46 = vshll.u32 %v5593_v29, 16  ;;  %v1782_v47 = vor.u32 %v1781_v31, %v1778_v30  ;;  %v5617_v11 = vld [vmem:[%s5436_s28 + $0x68] sm:$0xff]  }
  0x2e   : > { %v419_v50 = vsel %vm343_vm1, %v414_v32, %v418_v6  ;;  %v428_v52 = vshrl.u32 %v5588_v25, 16  ;;  %v432_v53 = vshll.u32 %v5598_v41, 16  ;;  %v1791_v55 = vor.u32 %v1790_v38, %v1787_v37  ;;  %v5634_v32 = vld [vmem:[%s5436_s28 + $0x70] sm:$0xff]  }
  0x2f   : > { %4802 = vmatmul.mubr.msk.bf16.gmra.mrb[8].mxu0 %vm492_vm2, %v1765_v26  ;;  %v426_v56 = vrot.slane %v424_v40, 1  ;;  %v422_v60 = vor.u32 %v420_v43, %v418_v6  ;;  %v1796_v61 = vrot.slane %v1794_v45, 1  ;;  %v1799_v3 = vrot.slane %v1797_v46, 2  ;;  %v5640_v40 = vld [vmem:[%s5436_s28 + $0x78] sm:$0xff]  }
  0x30   : > { %4805 = vmatprep.mubr.msk.bf16.mxu0 %vm492_vm2, %v1774_v36  ;;  %v1783_v4 = vsel %vm1703_vm3, %v1773_v15, %v1782_v47  ;;  %v434_v7 = vrot.slane %v432_v53, 1  ;;  %v1792_v12 = vsel %vm1703_vm3, %v1782_v47, %v1791_v55  ;;  %v4369_v16 = vcombine.low %v2144_v57, %v5454_v13 }
  0x31   : > { %v430_v5 = vor.u32 %v428_v52, %v426_v56  ;;  %v440_v17 = vshll.u32 %v5612_v58, 16  ;;  %v427_v21 = vsel %vm343_vm1, %v422_v60, %v426_v56  ;;  %v436_v22 = vshrl.u32 %v5598_v41, 16  ;;  %v5655_v56 = vld [vmem:[%s5436_s28 + $0x80] sm:$0xff]  }
  0x32   : > { %v5626_v15 = vor.u32 %v1799_v3, %v1796_v61  ;;  %v444_v26 = vshrl.u32 %v5612_v58, 16  ;;  %v448_v27 = vshll.u32 %v5617_v11, 16  ;;  %v2151_v13 = vrot.slane %v4369_v16, 2 }
  0x33   : > { %v435_v24 = vsel %vm343_vm1, %v430_v5, %v434_v7  ;;  %v2152_v30 = vrot.slane %v5461_v18, 2  ;;  %v442_v31 = vrot.slane %v440_v17, 1  ;;  %v438_v6 = vor.u32 %v436_v22, %v434_v7 }
  0x34   : > { %4654 = vmatmul.mubr.msk.bf16.gmra.mrb[12].mxu1 %vm492_vm2, %v411_v42  ;;  %v1801_v36 = vsel %vm1703_vm3, %v1791_v55, %v5626_v15  ;;  %v450_v38 = vrot.slane %v448_v27, 1  ;;  %v456_v18 = vshll.u32 %v5634_v32, 16  ;;  %v2154_v45 = vrot.slane %v5475_v28, 2  ;;  %v5685_v27 = vld [vmem:[%s5436_s28 + $0x90] ss:$0 sps:$4 sm:$0x11]  }
  0x35   : > { %4657 = vmatprep.mubr.msk.bf16.mxu1 %vm492_vm2, %v419_v50  ;;  %v446_v37 = vor.u32 %v444_v26, %v442_v31  ;;  %v2153_v42 = vsel %vm2150_vm4, %v2151_v13, %v2152_v30  ;;  %v443_v43 = vsel %vm343_vm1, %v438_v6, %v442_v31  ;;  %v452_v46 = vshrl.u32 %v5617_v11, 16 }
  0x36   : > { %v460_v50 = vshrl.u32 %v5634_v32, 16  ;;  %v464_v52 = vshll.u32 %v5640_v40, 16  ;;  %v2156_v53 = vrot.slane %v5481_v34, 2  ;;  %v458_v55 = vrot.slane %v456_v18, 1  ;;  %v5668_v34 = vld [vmem:[%s6637_s1 + $0x1c] sm:$0xf] }
  0x37   : > { %4806 = vmatmul.mubr.msk.bf16.gmra.mrb[12].mxu0 %vm492_vm2, %v1783_v4  ;;  %v451_v47 = vsel %vm343_vm1, %v446_v37, %v450_v38  ;;  %v2682_v28 = vsel %vm547_vm0, %v5521_v1, 0  ;;  %v454_v57 = vor.u32 %v452_v46, %v450_v38  ;;  %v2155_v60 = vsel %vm2150_vm4, %v2152_v30, %v2154_v45  ;;  %v5662_v4 = vld [vmem:[%s5436_s28 + $0x88] sm:$0xff]  }
  0x38   : > { %4809 = vmatprep.mubr.msk.bf16.mxu0 %vm492_vm2, %v1792_v12  ;;  %v462_v61 = vor.u32 %v460_v50, %v458_v55  ;;  %v466_v3 = vrot.slane %v464_v52, 1  ;;  %v2157_v5 = vsel %vm2150_vm4, %v2154_v45, %v2156_v53  ;;  %v472_v7 = vshll.u32 %v5655_v56, 16 }
  0x39   : > { %v459_v1 = vsel %vm343_vm1, %v454_v57, %v458_v55  ;;  %v2158_v12 = vrot.slane %v5499_v49, 2  ;;  %v468_v16 = vshrl.u32 %v5640_v40, 16  ;;  %v480_v22 = vshll.u32 %v5662_v4, 16  ;;  %v5712_v55 = vld [vmem:[%s5436_s28 + $0x60] sm:$0xff]   ;;  %v5731_v57 = vld [vmem:[%s5436_s28 + $0x68] sm:$0xff]  }
  0x3a   : > { %v467_v17 = vsel %vm343_vm1, %v462_v61, %v466_v3  ;;  %v474_v26 = vrot.slane %v472_v7, 1  ;;  %v488_v37 = vshll.u32 %v5685_v27, 16  ;;  %v2162_v38 = vrot.slane %v5535_v23, 2  ;;  %v5749_v7 = vld [vmem:[%s5436_s28 + $0x78] sm:$0xff]  }
  0x3b   : > { %v470_v49 = vor.u32 %v468_v16, %v466_v3  ;;  %v2159_v13 = vsel %vm2150_vm4, %v2156_v53, %v2158_v12  ;;  %v482_v31 = vrot.slane %v480_v22, 1  ;;  %v2164_v18 = vrot.slane %v5555_v44, 2  ;;  %v5765_v22 = vld [vmem:[%s5436_s28 + $0x88] sm:$0xff]  }
  0x3c   : > { %4658 = vmatmul.mubr.msk.bf16.gmra.mrb[16].mxu1 %vm492_vm2, %v427_v21  ;;  %v476_v21 = vshrl.u32 %v5655_v56, 16  ;;  %v490_v45 = vrot.slane %v488_v37, 1  ;;  %v2166_v23 = vrot.slane %v5568_v62, 2  ;;  %v2168_v44 = vrot.slane %v5580_v14, 2 }
  0x3d   : > { %4661 = vmatprep.mubr.msk.bf16.mxu1 %vm492_vm2, %v435_v24  ;;  %v2160_v24 = vrot.slane %v5511_v59, 2  ;;  %v475_v59 = vsel %vm343_vm1, %v470_v49, %v474_v26  ;;  %v2170_v62 = vrot.slane %v5593_v29, 2  ;;  %v1043_v14 = vsel %vm547_vm0, %v5487_v39, 0 }
  0x3e   : > { %v478_v30 = vor.u32 %v476_v21, %v474_v26  ;;  %v2167_v52 = vsel %vm2150_vm4, %v2164_v18, %v2166_v23  ;;  %v2169_v53 = vsel %vm2150_vm4, %v2166_v23, %v2168_v44  ;;  %v2174_v61 = vrot.slane %v5731_v57, 2  ;;  %v5769_v26 = vld [vmem:[%s5436_s28 + $0x90] sm:$0xff]  }
  0x3f   : > { %4810 = vmatmul.mubr.msk.bf16.gmra.mrb[16].mxu0 %vm492_vm2, %v1801_v36  ;;  %v2161_v6 = vsel %vm2150_vm4, %v2158_v12, %v2160_v24  ;;  %v484_v36 = vshrl.u32 %v5662_v4, 16  ;;  %v2163_v46 = vsel %vm2150_vm4, %v2160_v24, %v2162_v38  ;;  %v2171_v29 = vsel %vm2150_vm4, %v2168_v44, %v2170_v62  ;;  %v5753_v12 = vld [vmem:[%s5436_s28 + $0x80] sm:$0xff]  }
  0x40   : > { %4831 = vmatprep.mubr.msk.bf16.mxu0 %vm492_vm2, %v2153_v42  ;;  %v483_v42 = vsel %vm343_vm1, %v478_v30, %v482_v31  ;;  %v2178_v16 = vrot.slane %v5749_v7, 2  ;;  %v2182_v49 = vrot.slane %v5765_v22, 2  ;;  %v2458_v30 = vld [vmem:[%s5436_s28 + $0x10] sm:$0xc] }
  0x44   : > { %4662 = vmatmul.mubr.msk.bf16.gmra.mrb[20].mxu1 %vm492_vm2, %v443_v43  ;;  %v486_v43 = vor.u32 %v484_v36, %v482_v31  ;;  %v5779_v31 = vld [vmem:[%s5436_s28 + $0x14] sm:$0xf] }
  0x45   : > { %4665 = vmatprep.mubr.msk.bf16.mxu1 %vm492_vm2, %v451_v47  ;;  %v2165_v47 = vsel %vm2150_vm4, %v2162_v38, %v2164_v18  ;;  %v5789_v37 = vcombine.low %v2458_v30, %v5779_v31  ;;  %v5792_v38 = vld [vmem:[%s5436_s28 + $0x18] sm:$0xff]  }
  0x46   : > { %v491_v50 = vsel %vm343_vm1, %v486_v43, %v490_v45  ;;  %v2591_v43 = vrot.slane %v5792_v38, 2 }
  0x47   : > { %4832 = vmatmul.mubr.msk.bf16.vlgmr.msra.gmra.mrb[0].mxu0 %vm492_vm2, %v2155_v60  ;;  %v5737_v60 = vld [vmem:[%s5436_s28 + $0x70] sm:$0xff]   ;;  %v2590_v18 = vrot.slane %v5789_v37, 2 }
  0x48   : > { %4868 = vmatpush3.bf16.msra.mxu0 %v2682_v28  ;;  %4835 = vmatprep.mubr.msk.bf16.mxu0 %vm492_vm2, %v2157_v5  ;;  %v2172_v28 = vrot.slane %v5712_v55, 2  ;;  %v2176_v3 = vrot.slane %v5737_v60, 2 }
  0x49   : > { %5279 = vmatprep.subr.msk.bf16.mxu0 %vm547_vm0, %v5668_v34 }
  0x4a   : > { %v2173_v39 = vsel %vm2150_vm4, %v2170_v62, %v2172_v28  ;;  %v2175_v5 = vsel %vm2150_vm4, %v2172_v28, %v2174_v61  ;;  %v2179_v21 = vsel %vm2150_vm4, %v2176_v3, %v2178_v16  ;;  %v3129_v62 = vsel %vm547_vm0, %v5668_v34, 0  ;;  %v5827_v28 = vld [vmem:[%s5436_s28 + $0x38] sm:$0xff]  }
  0x4c   : > { %4666 = vmatmul.mubr.msk.bf16.gmra.mrb[24].mxu1 %vm492_vm2, %v459_v1  ;;  %v2177_v1 = vsel %vm2150_vm4, %v2174_v61, %v2176_v3  ;;  %v2599_v61 = vrot.slane %v5827_v28, 2  ;;  %v5846_v3 = vld [vmem:[%s5436_s28 + $0x40] sm:$0xff]  }
  0x4d   : > { %4669 = vmatprep.mubr.msk.bf16.mxu1 %vm492_vm2, %v467_v17  ;;  %v2180_v17 = vrot.slane %v5753_v12, 2 }
  0x4f   : > { %4836 = vmatmul.mubr.msk.bf16.gmra.mrb[4].mxu0 %vm492_vm2, %v2159_v13  ;;  %v2181_v24 = vsel %vm2150_vm4, %v2178_v16, %v2180_v17  ;;  %v2184_v13 = vrot.slane %v5769_v26, 2  ;;  %v944_v16 = vld [vmem:[%s5436_s28] sm:$0xe] }
  0x50   : > { %4839 = vmatprep.mubr.msk.bf16.mxu0 %vm492_vm2, %v2161_v6  ;;  %v2183_v6 = vsel %vm2150_vm4, %v2180_v17, %v2182_v49  ;;  %v2601_v17 = vrot.slane %v5846_v3, 2 }
  0x51   : > { %v2185_v36 = vsel %vm2150_vm4, %v2182_v49, %v2184_v13 }
  0x52   : > { %v2602_v49 = vsel %vm2150_vm4, %v2599_v61, %v2601_v17 }
  0x54   : > { %4670 = vmatmul.mubr.msk.bf16.gmra.mrb[28].mxu1 %vm492_vm2, %v475_v59  ;;  %v5785_v59 = vld [vmem:[%s5436_s28 + $0x98] ss:$0 sps:$4 sm:$0x33]  }
  0x55   : > { %4673 = vmatprep.mubr.msk.bf16.mxu1 %vm492_vm2, %v483_v42  ;;  %v2186_v42 = vrot.slane %v5785_v59, 2 }
  0x57   : > { %4840 = vmatmul.mubr.msk.bf16.gmra.mrb[8].mxu0 %vm492_vm2, %v2163_v46  ;;  %v2187_v45 = vsel %vm2150_vm4, %v2184_v13, %v2186_v42  ;;  %v5805_v46 = vld [vmem:[%s5436_s28 + $0x20] sm:$0xff]   ;;  %v5864_v13 = vld [vmem:[%s5436_s28 + $0x50] sm:$0xff]  }
  0x58   : > { %4843 = vmatprep.mubr.msk.bf16.mxu0 %vm492_vm2, %v2165_v47  ;;  %v2592_v47 = vsel %vm2150_vm4, %v2590_v18, %v2591_v43  ;;  %v2593_v23 = vrot.slane %v5805_v46, 2  ;;  %v2605_v42 = vrot.slane %v5864_v13, 2 }
  0x5c   : > { %4674 = vmatmul.mubr.msk.bf16.gmra.mrb[32].mxu1 %vm492_vm2, %v491_v50  ;;  %v5809_v50 = vld [vmem:[%s5436_s28 + $0x28] sm:$0xff]  }
  0x5d   : > { %4679 = vmatprep.mubr.msk.bf16.mxu1 %vm492_vm2, %v5446_v9  ;;  %v5723_v9 = vld [vmem:[%s6637_s1 + $0xc] sm:$0xf]  ;;  %v2595_v44 = vrot.slane %v5809_v50, 2 }
  0x5f   : > { %4844 = vmatmul.mubr.msk.bf16.gmra.mrb[12].mxu0 %vm492_vm2, %v2167_v52  ;;  %v2594_v52 = vsel %vm2150_vm4, %v2591_v43, %v2593_v23 }
  0x60   : > { %4847 = vmatprep.mubr.msk.bf16.mxu0 %vm492_vm2, %v2169_v53  ;;  %v5821_v53 = vld [vmem:[%s5436_s28 + $0x30] sm:$0xff]  }
  0x64   : > { %4680 = vmatmul.mubr.msk.bf16.vlgmr.msra.gmra.mrb[0].mxu1 %vm492_vm2, %v5449_v10 }
  0x65   : > { %4683 = vmatprep.mubr.msk.bf16.mxu1 %vm492_vm2, %v5464_v19  ;;  %4716 = vmatpush3.bf16.msra.mxu1 %v1043_v14  ;;  %v2596_v14 = vsel %vm2150_vm4, %v2593_v23, %v2595_v44  ;;  %v956_v23 = vrot.slane %v5478_v33, 1 }
  0x66   : > { %5274 = vmatprep.subr.msk.bf16.mxu1 %vm547_vm0, %v5723_v9 }
  0x67   : > { %4848 = vmatmul.mubr.msk.bf16.gmra.mrb[16].mxu0 %vm492_vm2, %v2171_v29  ;;  %v5832_v29 = vld [vmem:[%s6637_s1 + $0x20] sm:$0xf] }
  0x68   : > { %4851 = vmatprep.mubr.msk.bf16.mxu0 %vm492_vm2, %v2173_v39  ;;  %v2597_v39 = vrot.slane %v5821_v53, 2 }
  0x6a   : > { %v2598_v34 = vsel %vm2150_vm4, %v2595_v44, %v2597_v39 }
  0x6c   : > { %4684 = vmatmul.mubr.msk.bf16.gmra.mrb[4].mxu1 %vm492_vm2, %v5478_v33 }
  0x6d   : > { %4687 = vmatprep.mubr.msk.bf16.mxu1 %vm492_vm2, %v5496_v48 }
  0x6f   : > { %4852 = vmatmul.mubr.msk.bf16.gmra.mrb[20].mxu0 %vm492_vm2, %v2175_v5  ;;  %v2600_v5 = vsel %vm2150_vm4, %v2597_v39, %v2599_v61  ;;  %v1482_v39 = vsel %vm547_vm0, %v5723_v9, 0  ;;  %v5375_v61 = vmov 0   ;;  %v5356_v9 = vld [vmem:[%s6637_s1 + $0x10] sm:$0xf] }
  0x70   : > { %4855 = vmatprep.mubr.msk.bf16.mxu0 %vm492_vm2, %v2177_v1  ;;  %v5850_v1 = vld [vmem:[%s5436_s28 + $0x48] sm:$0xff]   ;;  %5292 = vset.pattern.permute.xlu0 %v5375_v61 }
  0x71   : > { %5293 = vset.pattern.permute.xlu1 %v5375_v61  ;;  %v3664_v61 = vld [vmem:[%s6638_s2 + $0x30] sm:$0xff] }
  0x74   : > { %4688 = vmatmul.mubr.msk.bf16.gmra.mrb[8].mxu1 %vm492_vm2, %v5505_v54 }
  0x75   : > { %4691 = vmatprep.mubr.msk.bf16.mxu1 %vm492_vm2, %v5516_v0 }
  0x77   : > { %4856 = vmatmul.mubr.msk.bf16.gmra.mrb[24].mxu0 %vm492_vm2, %v2179_v21  ;;  %v4291_v21 = vcombine.low %v944_v16, %v5443_v8  ;;  %v5869_v8 = vld [vmem:[%s5436_s28 + $0x58] sm:$0xff]   ;;  %v5902_v16 = vld [vmem:[%s5436_s28 + $0x70] sm:$0xff]  }
  0x78   : > { %4859 = vmatprep.mubr.msk.bf16.mxu0 %vm492_vm2, %v2181_v24  ;;  %v2603_v24 = vrot.slane %v5850_v1, 2  ;;  %v2607_v43 = vrot.slane %v5869_v8, 2 }
  0x79   : > { %v951_v30 = vrot.slane %v4291_v21, 1 }
  0x7a   : > { %v2608_v44 = vsel %vm2150_vm4, %v2605_v42, %v2607_v43 }
  0x7c   : > { %4692 = vmatmul.mubr.msk.bf16.gmra.mrb[12].mxu1 %vm492_vm2, %v5544_v35 }
  0x7d   : > { %4695 = vmatprep.mubr.msk.bf16.mxu1 %vm492_vm2, %v5560_v51 }
  0x7f   : > { %4860 = vmatmul.mubr.msk.bf16.gmra.mrb[28].mxu0 %vm492_vm2, %v2183_v6  ;;  %v952_v6 = vrot.slane %v5449_v10, 1  ;;  %v954_v10 = vrot.slane %v5464_v19, 1 }
  0x80   : > { %4863 = vmatprep.mubr.msk.bf16.mxu0 %vm492_vm2, %v2185_v36  ;;  %v2604_v36 = vsel %vm2150_vm4, %v2601_v17, %v2603_v24  ;;  %v960_v17 = vrot.slane %v5505_v54, 1  ;;  %v3660_v54 = vld [vmem:[%s6638_s2 + $0x10] sm:$0xff] }
  0x81   : > { %v953_v18 = vsel %vm950_vm5, %v951_v30, %v952_v6  ;;  %v957_v19 = vsel %vm950_vm5, %v954_v10, %v956_v23  ;;  %v2613_v30 = vrot.slane %v5902_v16, 2  ;;  %3706 = vperm.xlu1 %5293, %v3660_v54   ;;  %v3666_v54 = vld [vmem:[%s6638_s2 + $0x40] sm:$0xff] }
  0x84   : > { %4696 = vmatmul.mubr.msk.bf16.gmra.mrb[16].mxu1 %vm492_vm2, %v5571_v63 }
  0x85   : > { %4699 = vmatprep.mubr.msk.bf16.mxu1 %vm492_vm2, %v5588_v25 }
  0x87   : > { %4864 = vmatmul.mubr.msk.bf16.gmra.mrb[32].mxu0 %vm492_vm2, %v2187_v45  ;;  %v2606_v45 = vsel %vm2150_vm4, %v2603_v24, %v2605_v42  ;;  %v5911_v24 = vld [vmem:[%s5436_s28 + $0x78] sm:$0xff]   ;;  %v3659_v42 = vld [vmem:[%s6638_s2 + $0x8] sm:$0xff] }
  0x88   : > { %4869 = vmatprep.mubr.msk.bf16.mxu0 %vm492_vm2, %v2592_v47  ;;  %v5882_v47 = vld [vmem:[%s5436_s28 + $0x60] sm:$0xff]  }
  0x8c   : > { %4700 = vmatmul.mubr.msk.bf16.gmra.mrb[20].mxu1 %vm492_vm2, %v5598_v41 }
  0x8d   : > { %4703 = vmatprep.mubr.msk.bf16.mxu1 %vm492_vm2, %v5612_v58 }
  0x8f   : > { %4870 = vmatmul.mubr.msk.bf16.vlgmr.msra.gmra.mrb[0].mxu0 %vm492_vm2, %v2594_v52  ;;  %v5887_v52 = vld [vmem:[%s5436_s28 + $0x68] sm:$0xff]  }
  0x90   : > { %4906 = vmatpush3.bf16.msra.mxu0 %v3129_v62  ;;  %4873 = vmatprep.mubr.msk.bf16.mxu0 %vm492_vm2, %v2596_v14  ;;  %v955_v62 = vsel %vm950_vm5, %v952_v6, %v954_v10  ;;  %v2609_v14 = vrot.slane %v5882_v47, 2  ;;  %v2611_v33 = vrot.slane %v5887_v52, 2  ;;  %v5933_v10 = vld [vmem:[%s5436_s28 + $0x80] sm:$0xff]  }
  0x91   : > { %5280 = vmatprep.subr.msk.bf16.mxu0 %vm547_vm0, %v5832_v29 }
  0x92   : > { %v2612_v21 = vsel %vm2150_vm4, %v2609_v14, %v2611_v33 }
  0x94   : > { %4704 = vmatmul.mubr.msk.bf16.gmra.mrb[24].mxu1 %vm492_vm2, %v5617_v11 }
  0x95   : > { %4707 = vmatprep.mubr.msk.bf16.mxu1 %vm492_vm2, %v5634_v32 }
  0x97   : > { %4874 = vmatmul.mubr.msk.bf16.gmra.mrb[4].mxu0 %vm492_vm2, %v2598_v34  ;;  %v958_v34 = vrot.slane %v5496_v48, 1 }
  0x98   : > { %4877 = vmatprep.mubr.msk.bf16.mxu0 %vm492_vm2, %v2600_v5  ;;  %v2610_v5 = vsel %vm2150_vm4, %v2607_v43, %v2609_v14  ;;  %v2614_v43 = vsel %vm2150_vm4, %v2611_v33, %v2613_v30  ;;  %v3662_v14 = vld [vmem:[%s6638_s2 + $0x20] sm:$0xff]  ;;  %v3663_v33 = vld [vmem:[%s6638_s2 + $0x28] sm:$0xff] }
  0x99   : > { %v959_v48 = vsel %vm950_vm5, %v956_v23, %v958_v34  ;;  %v961_v6 = vsel %vm950_vm5, %v958_v34, %v960_v17  ;;  %v966_v34 = vrot.slane %v5560_v51, 1  ;;  %v3665_v51 = vld [vmem:[%s6638_s2 + $0x38] sm:$0xff] }
  0x9c   : > { %4708 = vmatmul.mubr.msk.bf16.gmra.mrb[28].mxu1 %vm492_vm2, %v5640_v40 }
  0x9d   : > { %4711 = vmatprep.mubr.msk.bf16.mxu1 %vm492_vm2, %v5655_v56 }
  0x9f   : > { %4878 = vmatmul.mubr.msk.bf16.gmra.mrb[8].mxu0 %vm492_vm2, %v2602_v49  ;;  %v3658_v49 = vld [vmem:[%s6638_s2] sm:$0xff] }
  0xa0   : > { %4881 = vmatprep.mubr.msk.bf16.mxu0 %vm492_vm2, %v2604_v36  ;;  %3696 = vperm.xlu0 %5292, %v3658_v49   ;;  %v2615_v36 = vrot.slane %v5911_v24, 2 }
  0xa2   : > { %v2616_v23 = vsel %vm2150_vm4, %v2613_v30, %v2615_v36 }
  0xa4   : > { %4712 = vmatmul.mubr.msk.bf16.gmra.mrb[32].mxu1 %vm492_vm2, %v5662_v4  ;;  %3701 = vperm.xlu0 %5292, %v3659_v42   ;;  %v2908_v42 = vshll.u32 %v5789_v37, 16 }
  0xa5   : > { %4717 = vmatprep.mubr.msk.bf16.mxu1 %vm492_vm2, %v953_v18  ;;  %v962_v18 = vrot.slane %v5516_v0, 1  ;;  %v3661_v0 = vld [vmem:[%s6638_s2 + $0x18] sm:$0xff] }
  0xa6   : > { %3711 = vperm.xlu1 %5293, %v3661_v0  }
  0xa7   : > { %4882 = vmatmul.mubr.msk.bf16.gmra.mrb[12].mxu0 %vm492_vm2, %v2606_v45  ;;  %v964_v45 = vrot.slane %v5544_v35, 1  ;;  %v2617_v35 = vrot.slane %v5933_v10, 2 }
  0xa8   : > { %4885 = vmatprep.mubr.msk.bf16.mxu0 %vm492_vm2, %v2608_v44  ;;  %v5938_v44 = vld [vmem:[%s5436_s28 + $0x88] sm:$0xff]   ;;  %3716 = vperm.xlu0 %5292, %v3662_v14   ;;  %v5352_v14 = vld [vmem:[%s5436_s28 + $0xa0] ss:$0 sps:$4 sm:$0x33]  }
  0xa9   : > { %v967_v49 = vsel %vm950_vm5, %v964_v45, %v966_v34 }
  0xaa   : > { %3721 = vperm.xlu1 %5293, %v3663_v33   ;;  %v2910_v33 = vrot.slane %v2908_v42, 3  ;;  %v3672_v42 = vld [vmem:[%s6638_s2 + $0x70] sm:$0xff] }
  0xac   : > { %4718 = vmatmul.mubr.msk.bf16.vlgmr.msra.gmra.mrb[0].mxu1 %vm492_vm2, %v955_v62  ;;  %v963_v62 = vsel %vm950_vm5, %v960_v17, %v962_v18  ;;  %v5963_v17 = vld [vmem:[%s5436_s28 + $0x90] sm:$0xff]   ;;  %3726 = vperm.xlu0 %5292, %v3664_v61  }
  0xad   : > { %4721 = vmatprep.mubr.msk.bf16.mxu1 %vm492_vm2, %v957_v19  ;;  %4754 = vmatpush3.bf16.msra.mxu1 %v1482_v39  ;;  %v965_v19 = vsel %vm950_vm5, %v962_v18, %v964_v45  ;;  %v2619_v39 = vrot.slane %v5938_v44, 2  ;;  %v2913_v18 = vshrl.u32 %v5792_v38, 16  ;;  %v3667_v45 = vld [vmem:[%s6638_s2 + $0x48] sm:$0xff] }
  0xae   : > { %5276 = vmatprep.subr.msk.bf16.mxu1 %vm547_vm0, %v5356_v9  ;;  %v968_v9 = vrot.slane %v5571_v63, 1  ;;  %v2621_v63 = vrot.slane %v5963_v17, 2  ;;  %3731 = vperm.xlu1 %5293, %v3665_v51   ;;  %v2925_v51 = vshll.u32 %v5805_v46, 16 }
  0xaf   : > { %4886 = vmatmul.mubr.msk.bf16.gmra.mrb[16].mxu0 %vm492_vm2, %v2610_v5  ;;  %v2618_v5 = vsel %vm2150_vm4, %v2615_v36, %v2617_v35  ;;  %v2905_v36 = vshrl.u32 %v5789_v37, 16  ;;  %v2915_v61 = vrot.slane %v2913_v18, 2  ;;  %v974_v18 = vrot.slane %v5612_v58, 1  ;;  %v3673_v58 = vld [vmem:[%s6638_s2 + $0x78] sm:$0xff] }
  0xb0   : > { %4889 = vmatprep.mubr.msk.bf16.mxu0 %vm492_vm2, %v2612_v21  ;;  %v5967_v21 = vld [vmem:[%s5436_s28 + $0x98] sm:$0xff]   ;;  %v969_v30 = vsel %vm950_vm5, %v966_v34, %v968_v9  ;;  %3736 = vperm.xlu0 %5292, %v3666_v54   ;;  %v2622_v37 = vsel %vm2150_vm4, %v2619_v39, %v2621_v63 }
  0xb2   : > { %3741 = vperm.xlu1 %5293, %v3667_v45  }
  0xb4   : > { %4722 = vmatmul.mubr.msk.bf16.gmra.mrb[4].mxu1 %vm492_vm2, %v959_v48  ;;  %v2620_v48 = vsel %vm2150_vm4, %v2617_v35, %v2619_v39  ;;  %v972_v35 = vrot.slane %v5598_v41, 1  ;;  %v3670_v39 = vld [vmem:[%s6638_s2 + $0x60] sm:$0xff]  ;;  %v2625_v41 = vrot.slane %v5352_v14, 2 }
  0xb5   : > { %4725 = vmatprep.mubr.msk.bf16.mxu1 %vm492_vm2, %v961_v6  ;;  %v2623_v6 = vrot.slane %v5967_v21, 2 }
  0xb7   : > { %4890 = vmatmul.mubr.msk.bf16.gmra.mrb[20].mxu0 %vm492_vm2, %v2614_v43  ;;  %v2916_v43 = vshll.u32 %v5792_v38, 16  ;;  %v2624_v0 = vsel %vm2150_vm4, %v2621_v63, %v2623_v6  ;;  %v2931_v63 = vshrl.u32 %v5809_v50, 16 }
  0xb8   : > { %4893 = vmatprep.mubr.msk.bf16.mxu0 %vm492_vm2, %v2616_v23  ;;  %v3668_v23 = vld [vmem:[%s6638_s2 + $0x50] sm:$0xff] }
  0xb9   : > { %v2918_v34 = vrot.slane %v2916_v43, 3  ;;  %3746 = vperm.xlu0 %5292, %v3668_v23   ;;  %v2626_v43 = vsel %vm2150_vm4, %v2623_v6, %v2625_v41  ;;  %v2927_v23 = vrot.slane %v2925_v51, 3  ;;  %v3674_v6 = vld [vmem:[%s6638_s2 + $0x80] sm:$0xff]  ;;  %v3676_v41 = vld [vmem:[%s6638_s2 + $0x90] sm:$0xff] }
  0xbc   : > { %4726 = vmatmul.mubr.msk.bf16.gmra.mrb[8].mxu1 %vm492_vm2, %v963_v62  ;;  %v970_v62 = vrot.slane %v5588_v25, 1  ;;  %v3669_v25 = vld [vmem:[%s6638_s2 + $0x58] sm:$0xff] }
  0xbd   : > { %4729 = vmatprep.mubr.msk.bf16.mxu1 %vm492_vm2, %v965_v19  ;;  %v2907_v19 = vrot.slane %v2905_v36, 2  ;;  %3751 = vperm.xlu1 %5293, %v3669_v25   ;;  %v3671_v36 = vld [vmem:[%s6638_s2 + $0x68] sm:$0xff]  ;;  %v2952_v25 = vshll.u32 %v5827_v28, 16 }
  0xbe   : > { %3756 = vperm.xlu0 %5292, %v3670_v39   ;;  %v3675_v39 = vld [vmem:[%s6638_s2 + $0x88] sm:$0xff] }
  0xbf   : > { %4894 = vmatmul.mubr.msk.bf16.gmra.mrb[24].mxu0 %vm492_vm2, %v2618_v5  ;;  %v971_v5 = vsel %vm950_vm5, %v968_v9, %v970_v62  ;;  %v2911_v54 = vor.u32 %v2910_v33, %v2907_v19  ;;  %v2919_v9 = vor.u32 %v2918_v34, %v2915_v61  ;;  %v975_v19 = vsel %vm950_vm5, %v972_v35, %v974_v18 }
  0xc0   : > { %4897 = vmatprep.mubr.msk.bf16.mxu0 %vm492_vm2, %v2620_v48  ;;  %v973_v48 = vsel %vm950_vm5, %v970_v62, %v972_v35  ;;  %v976_v62 = vrot.slane %v5617_v11, 1  ;;  %v2940_v61 = vshrl.u32 %v5821_v53, 16  ;;  %v2943_v34 = vshll.u32 %v5821_v53, 16 }
  0xc1   : > { %3761 = vperm.xlu1 %5293, %v3671_v36   ;;  %v2949_v35 = vshrl.u32 %v5827_v28, 16 }
  0xc2   : > { %3766 = vperm.xlu0 %5292, %v3672_v42   ;;  %v977_v33 = vsel %vm950_vm5, %v974_v18, %v976_v62  ;;  %v2942_v51 = vrot.slane %v2940_v61, 2  ;;  %v2954_v18 = vrot.slane %v2952_v25, 3  ;;  %v984_v61 = vrot.slane %v5662_v4, 1 }
  0xc3   : > { %v2951_v42 = vrot.slane %v2949_v35, 2 }
  0xc4   : > { %4730 = vmatmul.mubr.msk.bf16.gmra.mrb[12].mxu1 %vm492_vm2, %v967_v49  ;;  %v2922_v49 = vshrl.u32 %v5805_v46, 16 }
  0xc5   : > { %4733 = vmatprep.mubr.msk.bf16.mxu1 %vm492_vm2, %v969_v30  ;;  %v2934_v30 = vshll.u32 %v5809_v50, 16  ;;  %3771 = vperm.xlu1 %5293, %v3673_v58   ;;  %v982_v58 = vrot.slane %v5655_v56, 1  ;;  %v3681_v56 = vld [vmem:[%s6638_s2 + $0xb8] sm:$0xff] }
  0xc6   : > { %v2924_v45 = vrot.slane %v2922_v49, 2  ;;  %3776 = vperm.xlu0 %5292, %v3674_v6  }
  0xc7   : > { %4898 = vmatmul.mubr.msk.bf16.gmra.mrb[28].mxu0 %vm492_vm2, %v2622_v37  ;;  %v2920_v37 = vsel %vm2903_vm6, %v2911_v54, %v2919_v9  ;;  %v2936_v14 = vrot.slane %v2934_v30, 3  ;;  %v2945_v54 = vrot.slane %v2943_v34, 3  ;;  %v3443_v30 = vsel %vm547_vm0, %v5832_v29, 0  ;;  %v3678_v29 = vld [vmem:[%s6638_s2 + $0xa0] sm:$0xff] }
  0xc8   : > { %4901 = vmatprep.mubr.msk.bf16.mxu0 %vm492_vm2, %v2624_v0  ;;  %v2933_v0 = vrot.slane %v2931_v63, 2  ;;  %v2928_v11 = vor.u32 %v2927_v23, %v2924_v45  ;;  %v980_v63 = vrot.slane %v5640_v40, 1  ;;  %v3677_v40 = vld [vmem:[%s6638_s2 + $0x98] sm:$0xff]  ;;  %v985_v4 = vsel %vm950_vm5, %v982_v58, %v984_v61 }
  0xc9   : > { %3781 = vperm.xlu1 %5293, %v3675_v39   ;;  %v2946_v45 = vor.u32 %v2945_v54, %v2942_v51  ;;  %v2985_v54 = vshrl.u32 %v5869_v8, 16 }
  0xca   : > { %v2929_v49 = vsel %vm2903_vm6, %v2919_v9, %v2928_v11  ;;  %3786 = vperm.xlu0 %5292, %v3676_v41   ;;  %v2961_v9 = vshll.u32 %v5846_v3, 16  ;;  %v983_v39 = vsel %vm950_vm5, %v980_v63, %v982_v58  ;;  %v2997_v58 = vshll.u32 %v5882_v47, 16 }
  0xcc   : > { %4734 = vmatmul.mubr.msk.bf16.gmra.mrb[16].mxu1 %vm492_vm2, %v971_v5  ;;  %v2937_v5 = vor.u32 %v2936_v14, %v2933_v0  ;;  %v2970_v0 = vshll.u32 %v5850_v1, 16  ;;  %v3679_v14 = vld [vmem:[%s6638_s2 + $0xa8] sm:$0xff] }
  0xcd   : > { %4737 = vmatprep.mubr.msk.bf16.mxu1 %vm492_vm2, %v973_v48  ;;  %v978_v48 = vrot.slane %v5634_v32, 1  ;;  %v2958_v32 = vshrl.u32 %v5846_v3, 16  ;;  %3791 = vperm.xlu1 %5293, %v3677_v40   ;;  %v5357_v40 = vld [vmem:[%s5436_s28 + $0x10] sm:$0xff]  }
  0xce   : > { %v2938_v36 = vsel %vm2903_vm6, %v2928_v11, %v2937_v5  ;;  %3796 = vperm.xlu0 %5292, %v3678_v29   ;;  %v2963_v11 = vrot.slane %v2961_v9, 3  ;;  %v2972_v25 = vrot.slane %v2970_v0, 3  ;;  %v1390_v9 = vrot.slane %v5467_v20, 1 }
  0xcf   : > { %4902 = vmatmul.mubr.msk.bf16.gmra.mrb[32].mxu0 %vm492_vm2, %v2626_v43  ;;  %v979_v43 = vsel %vm950_vm5, %v976_v62, %v978_v48  ;;  %v981_v23 = vsel %vm950_vm5, %v978_v48, %v980_v63  ;;  %v2967_v62 = vshrl.u32 %v5850_v1, 16  ;;  %v2960_v6 = vrot.slane %v2958_v32, 2 }
  0xd0   : > { %4907 = vmatprep.mubr.msk.bf16.mxu0 %vm492_vm2, %v2920_v37  ;;  %v2955_v37 = vor.u32 %v2954_v18, %v2951_v42  ;;  %v2976_v48 = vshrl.u32 %v5864_v13, 16  ;;  %v2988_v63 = vshll.u32 %v5869_v8, 16  ;;  %v986_v18 = vrot.slane %v5685_v27, 1  ;;  %v3686_v27 = vld [vmem:[%s6638_s2 + $0xe0] sm:$0xff] }
  0xd1   : > { %v2969_v35 = vrot.slane %v2967_v62, 2  ;;  %3801 = vperm.xlu1 %5293, %v3679_v14   ;;  %v2964_v41 = vor.u32 %v2963_v11, %v2960_v6  ;;  %v1391_v29 = vrot.slane %v5357_v40, 1  ;;  %v3003_v11 = vshrl.u32 %v5887_v52, 16 }
  0xd2   : > { %v2956_v34 = vsel %vm2903_vm6, %v2946_v45, %v2955_v37  ;;  %v2990_v62 = vrot.slane %v2988_v63, 3  ;;  %v987_v20 = vsel %vm950_vm5, %v984_v61, %v986_v18  ;;  %v3687_v61 = vld [vmem:[%s6638_s2 + $0xe8] sm:$0xff]  ;;  %v3689_v63 = vld [vmem:[%s6638_s2 + $0xf8] sm:$0xff]  ;;  %v3012_v18 = vshrl.u32 %v5902_v16, 16 }
  0xd3   : > { %v2973_v51 = vor.u32 %v2972_v25, %v2969_v35  ;;  %v2965_v42 = vsel %vm2903_vm6, %v2955_v37, %v2964_v41  ;;  %v3685_v37 = vld [vmem:[%s6638_s2 + $0xd8] sm:$0xff]  ;;  %v1392_v14 = vsel %vm950_vm5, %v1390_v9, %v1391_v29  ;;  %v3021_v9 = vshrl.u32 %v5911_v24, 16 }
  0xd4   : > { %4738 = vmatmul.mubr.msk.bf16.gmra.mrb[20].mxu1 %vm492_vm2, %v975_v19  ;;  %v3680_v19 = vld [vmem:[%s6638_s2 + $0xb0] sm:$0xff]  ;;  %v5358_v35 = vld [vmem:[%s5436_s28 + $0x18] sm:$0xff]   ;;  %v3024_v40 = vshll.u32 %v5911_v24, 16 }
  0xd5   : > { %4741 = vmatprep.mubr.msk.bf16.mxu1 %vm492_vm2, %v977_v33  ;;  %v2947_v33 = vsel %vm2903_vm6, %v2937_v5, %v2946_v45  ;;  %3806 = vperm.xlu0 %5292, %v3680_v19   ;;  %v3682_v5 = vld [vmem:[%s6638_s2 + $0xc0] sm:$0xff]  ;;  %v2974_v45 = vsel %vm2903_vm6, %v2964_v41, %v2973_v51  ;;  %v2994_v19 = vshrl.u32 %v5882_v47, 16  ;;  %v1393_v25 = vrot.slane %v5358_v35, 1 }
  0xd6   : > { %3811 = vperm.xlu1 %5293, %v3681_v56   ;;  %v2999_v56 = vrot.slane %v2997_v58, 3  ;;  %v3023_v58 = vrot.slane %v3021_v9, 2  ;;  %v3033_v35 = vshll.u32 %v5933_v10, 16  ;;  %v3051_v9 = vshll.u32 %v5963_v17, 16 }
  0xd7   : > { %4908 = vmatmul.mubr.msk.bf16.vlgmr.msra.gmra.mrb[0].mxu0 %vm492_vm2, %v2929_v49  ;;  %v2979_v49 = vshll.u32 %v5864_v13, 16  ;;  %v2996_v41 = vrot.slane %v2994_v19, 2 }
  0xd8   : > { %4944 = vmatpush3.bf16.msra.mxu0 %v3443_v30  ;;  %4911 = vmatprep.mubr.msk.bf16.mxu0 %vm492_vm2, %v2938_v36  ;;  %v3683_v30 = vld [vmem:[%s6638_s2 + $0xc8] sm:$0xff]  ;;  %v3684_v36 = vld [vmem:[%s6638_s2 + $0xd0] sm:$0xff] }
  0xd9   : > { %3816 = vperm.xlu0 %5292, %v3682_v5   ;;  %v2981_v32 = vrot.slane %v2979_v49, 3  ;;  %v5359_v5 = vld [vmem:[%s5436_s28 + $0x20] sm:$0xff]   ;;  %v3005_v49 = vrot.slane %v3003_v11, 2  ;;  %v3026_v11 = vrot.slane %v3024_v40, 3 }
  0xda   : > { %3821 = vperm.xlu1 %5293, %v3683_v30   ;;  %v3690_v30 = vld [vmem:[%s6638_s2 + $0x100] sm:$0xff] }
  0xdc   : > { %4742 = vmatmul.mubr.msk.bf16.gmra.mrb[24].mxu1 %vm492_vm2, %v979_v43  ;;  %v2978_v43 = vrot.slane %v2976_v48, 2 }
  0xdd   : > { %4745 = vmatprep.mubr.msk.bf16.mxu1 %vm492_vm2, %v981_v23  ;;  %v2987_v23 = vrot.slane %v2985_v54, 2  ;;  %3826 = vperm.xlu0 %5292, %v3684_v36   ;;  %v3000_v36 = vor.u32 %v2999_v56, %v2996_v41  ;;  %v3042_v41 = vshll.u32 %v5938_v44, 16  ;;  %v5362_v56 = vld [vmem:[%s5436_s28 + $0x38] sm:$0xff]  }
  0xde   : > { %v2982_v0 = vor.u32 %v2981_v32, %v2978_v43  ;;  %3831 = vperm.xlu1 %5293, %v3685_v37   ;;  %v3015_v43 = vshll.u32 %v5902_v16, 16 }
  0xdf   : > { %4912 = vmatmul.mubr.msk.bf16.gmra.mrb[4].mxu0 %vm492_vm2, %v2947_v33  ;;  %v2991_v6 = vor.u32 %v2990_v62, %v2987_v23  ;;  %v3006_v33 = vshll.u32 %v5887_v52, 16  ;;  %v5360_v23 = vld [vmem:[%s5436_s28 + $0x28] sm:$0xff]  }
  0xe0   : > { %4915 = vmatprep.mubr.msk.bf16.mxu0 %vm492_vm2, %v2956_v34  ;;  %v3688_v34 = vld [vmem:[%s6638_s2 + $0xf0] sm:$0xff]  ;;  %v1397_v62 = vrot.slane %v5360_v23, 1  ;;  %v5364_v23 = vld [vmem:[%s5436_s28 + $0x48] sm:$0xff]  }
  0xe1   : > { %3836 = vperm.xlu0 %5292, %v3686_v27   ;;  %v2992_v48 = vsel %vm2903_vm6, %v2982_v0, %v2991_v6  ;;  %v3008_v54 = vrot.slane %v3006_v33, 3  ;;  %v3001_v37 = vsel %vm2903_vm6, %v2991_v6, %v3000_v36  ;;  %v3014_v27 = vrot.slane %v3012_v18, 2  ;;  %v3693_v33 = vld [vmem:[%s6638_s2 + $0x118] sm:$0xff] }
  0xe2   : > { %3841 = vperm.xlu1 %5293, %v3687_v61  }
  0xe3   : > { %v3009_v32 = vor.u32 %v3008_v54, %v3005_v49  ;;  %v3035_v49 = vrot.slane %v3033_v35, 3  ;;  %v5363_v54 = vld [vmem:[%s5436_s28 + $0x40] sm:$0xff]  }
  0xe4   : > { %4746 = vmatmul.mubr.msk.bf16.gmra.mrb[28].mxu1 %vm492_vm2, %v983_v39  ;;  %v2983_v39 = vsel %vm2903_vm6, %v2973_v51, %v2982_v0  ;;  %v1394_v51 = vsel %vm950_vm5, %v1391_v29, %v1393_v25  ;;  %v3691_v29 = vld [vmem:[%s6638_s2 + $0x108] sm:$0xff]  ;;  %v5361_v0 = vld [vmem:[%s5436_s28 + $0x30] sm:$0xff]  }
  0xe5   : > { %4749 = vmatprep.mubr.msk.bf16.mxu1 %vm492_vm2, %v985_v4  ;;  %v1395_v4 = vrot.slane %v5359_v5, 1  ;;  %3846 = vperm.xlu0 %5292, %v3688_v34   ;;  %v3010_v19 = vsel %vm2903_vm6, %v3000_v36, %v3009_v32  ;;  %v3030_v34 = vshrl.u32 %v5933_v10, 16  ;;  %v1401_v5 = vrot.slane %v5362_v56, 1 }
  0xe6   : > { %3851 = vperm.xlu1 %5293, %v3689_v63   ;;  %v1403_v63 = vrot.slane %v5363_v54, 1  ;;  %v3044_v36 = vrot.slane %v3042_v41, 3  ;;  %v5366_v41 = vld [vmem:[%s5436_s28 + $0x58] sm:$0xff]  }
  0xe7   : > { %4916 = vmatmul.mubr.msk.bf16.gmra.mrb[8].mxu0 %vm492_vm2, %v2965_v42  ;;  %v1396_v42 = vsel %vm950_vm5, %v1393_v25, %v1395_v4  ;;  %v3027_v25 = vor.u32 %v3026_v11, %v3023_v58  ;;  %v1409_v56 = vrot.slane %v5366_v41, 1  ;;  %v1812_v41 = vshrl.u32 %v5731_v57, 16 }
  0xe8   : > { %4919 = vmatprep.mubr.msk.bf16.mxu0 %vm492_vm2, %v2974_v45  ;;  %v3692_v45 = vld [vmem:[%s6638_s2 + $0x110] sm:$0xff] }
  0xe9   : > { %3856 = vperm.xlu0 %5292, %v3690_v30  }
  0xea   : > { %3861 = vperm.xlu1 %5293, %v3691_v29   ;;  %v3057_v29 = vshrl.u32 %v5967_v21, 16 }
  0xec   : > { %4750 = vmatmul.mubr.msk.bf16.gmra.mrb[32].mxu1 %vm492_vm2, %v987_v20  ;;  %v3017_v20 = vrot.slane %v3015_v43, 3  ;;  %v1404_v43 = vsel %vm950_vm5, %v1401_v5, %v1403_v63  ;;  %v3059_v11 = vrot.slane %v3057_v29, 2 }
  0xed   : > { %4755 = vmatprep.mubr.msk.bf16.mxu1 %vm492_vm2, %v1392_v14  ;;  %v1399_v14 = vrot.slane %v5361_v0, 1  ;;  %3866 = vperm.xlu0 %5292, %v3692_v45   ;;  %v3060_v45 = vshll.u32 %v5967_v21, 16  ;;  %v5365_v0 = vld [vmem:[%s5436_s28 + $0x50] sm:$0xff]  }
  0xee   : > { %v3018_v6 = vor.u32 %v3017_v20, %v3014_v27  ;;  %3871 = vperm.xlu1 %5293, %v3693_v33   ;;  %v3053_v20 = vrot.slane %v3051_v9, 3 }
  0xef   : > { %4920 = vmatmul.mubr.msk.bf16.gmra.mrb[12].mxu0 %vm492_vm2, %v2983_v39  ;;  %v1400_v61 = vsel %vm950_vm5, %v1397_v62, %v1399_v14  ;;  %v3039_v39 = vshrl.u32 %v5938_v44, 16  ;;  %v3062_v33 = vrot.slane %v3060_v45, 3  ;;  %v3356_v45 = vrot.slane %v5809_v50, 3 }
  0xf0   : > { %4923 = vmatprep.mubr.msk.bf16.mxu0 %vm492_vm2, %v2992_v48  ;;  %v3032_v48 = vrot.slane %v3030_v34, 2  ;;  %v3028_v30 = vsel %vm2903_vm6, %v3018_v6, %v3027_v25  ;;  %v3358_v50 = vrot.slane %v5821_v53, 3 }
  0xf2   : > { %v3036_v18 = vor.u32 %v3035_v49, %v3032_v48  ;;  %v1411_v49 = vrot.slane %v5712_v55, 1 }
  0xf4   : > { %4756 = vmatmul.mubr.msk.bf16.vlgmr.msra.gmra.mrb[0].mxu1 %vm492_vm2, %v1394_v51  ;;  %v3041_v51 = vrot.slane %v3039_v39, 2  ;;  %v3344_v39 = vld [vmem:[%s5436_s28 + $0x10] sm:$0x8] }
  0xf5   : > { %4759 = vmatprep.mubr.msk.bf16.mxu1 %vm492_vm2, %v1396_v42  ;;  %4982 = vmatpush3.bf16.msra.mxu1 %v5418_v2  ;;  %v1398_v2 = vsel %vm950_vm5, %v1395_v4, %v1397_v62  ;;  %v3019_v4 = vsel %vm2903_vm6, %v3009_v32, %v3018_v6  ;;  %v1402_v42 = vsel %vm950_vm5, %v1399_v14, %v1401_v5  ;;  %v3048_v32 = vshrl.u32 %v5963_v17, 16 }
  0xf6   : > { %v3045_v40 = vor.u32 %v3044_v36, %v3041_v51  ;;  %v1405_v62 = vrot.slane %v5364_v23, 1  ;;  %v1407_v14 = vrot.slane %v5365_v0, 1  ;;  %v1412_v36 = vsel %vm950_vm5, %v1409_v56, %v1411_v49 }
  0xf7   : > { %4924 = vmatmul.mubr.msk.bf16.gmra.mrb[16].mxu0 %vm492_vm2, %v3001_v37  ;;  %v3037_v37 = vsel %vm2903_vm6, %v3027_v25, %v3036_v18  ;;  %v3050_v27 = vrot.slane %v3048_v32, 2  ;;  %v3063_v25 = vor.u32 %v3062_v33, %v3059_v11  ;;  %v1415_v32 = vrot.slane %v5737_v60, 1 }
  0xf8   : > { %4927 = vmatprep.mubr.msk.bf16.mxu0 %vm492_vm2, %v3010_v19  ;;  %v6190_v19 = vld [vmem:[%s5436_s28 + $0xa0] ss:$0 sps:$4 sm:$0x77]   ;;  %v3046_v58 = vsel %vm2903_vm6, %v3036_v18, %v3045_v40  ;;  %v3352_v18 = vrot.slane %v5792_v38, 3  ;;  %v3354_v38 = vrot.slane %v5805_v46, 3  ;;  %v1417_v23 = vrot.slane %v5749_v7, 1 }
  0xf9   : > { %v3054_v6 = vor.u32 %v3053_v20, %v3050_v27  ;;  %v3066_v34 = vshrl.u32 %v6190_v19, 16  ;;  %v3069_v35 = vshll.u32 %v6190_v19, 16  ;;  %v3360_v0 = vrot.slane %v5827_v28, 3 }
  0xfa   : > { %v3357_v27 = vsel %vm3350_vm7, %v3354_v38, %v3356_v45  ;;  %v1418_v46 = vsel %vm950_vm5, %v1415_v32, %v1417_v23  ;;  %v1423_v11 = vrot.slane %v5769_v26, 1  ;;  %v1803_v33 = vshrl.u32 %v5712_v55, 16 }
  0xfb   : > { %v3055_v5 = vsel %vm2903_vm6, %v3045_v40, %v3054_v6  ;;  %v3071_v48 = vrot.slane %v3069_v35, 3  ;;  %v3064_v54 = vsel %vm2903_vm6, %v3054_v6, %v3063_v25  ;;  %v3361_v53 = vsel %vm3350_vm7, %v3358_v50, %v3360_v0  ;;  %v5355_v6 = vld [vmem:[%s5436_s28 + $0x98] ss:$0 sps:$4 sm:$0x11]   ;;  %s5282_s28 = smul.u32 288, %s6642_s16 }
  0xfc   : > { %4760 = vmatmul.mubr.msk.bf16.gmra.mrb[4].mxu1 %vm492_vm2, %v1398_v2  ;;  %v1406_v2 = vsel %vm950_vm5, %v1403_v63, %v1405_v62  ;;  %v4447_v63 = vcombine.low %v3344_v39, %v5779_v31  ;;  %v1805_v35 = vrot.slane %v1803_v33, 1  ;;  %v3364_v39 = vrot.slane %v5850_v1, 3 }
  0xfd   : > { %4763 = vmatprep.mubr.msk.bf16.mxu1 %vm492_vm2, %v1400_v61  ;;  %v1408_v61 = vsel %vm950_vm5, %v1405_v62, %v1407_v14  ;;  %v3355_v62 = vsel %vm3350_vm7, %v3352_v18, %v3354_v38  ;;  %s6371_s22 = scalar_lea.vmem %s6639_s3, %s5282_s28 }
  0xff   : > { %4928 = vmatmul.mubr.msk.bf16.gmra.mrb[20].mxu0 %vm492_vm2, %v3019_v4  ;;  %v3068_v4 = vrot.slane %v3066_v34, 2 }
 0x100   : > { %4931 = vmatprep.mubr.msk.bf16.mxu0 %vm492_vm2, %v3028_v30  ;;  %v1410_v30 = vsel %vm950_vm5, %v1407_v14, %v1409_v56  ;;  %v1421_v14 = vrot.slane %v5765_v22, 1  ;;  %v1815_v56 = vshll.u32 %v5731_v57, 16 }
 0x101   : > { %v3072_v51 = vor.u32 %v3071_v48, %v3068_v4  ;;  %v1824_v48 = vshll.u32 %v5737_v60, 16 }
 0x102   : > { %v1424_v34 = vsel %vm950_vm5, %v1421_v14, %v1423_v11 }
 0x103   : > { %v3073_v31 = vsel %vm2903_vm6, %v3063_v25, %v3072_v51 }
 0x104   : > { %4764 = vmatmul.mubr.msk.bf16.gmra.mrb[8].mxu1 %vm492_vm2, %v1402_v42  ;;  %v3351_v42 = vrot.slane %v4447_v63, 3  ;;  %v1817_v63 = vrot.slane %v1815_v56, 2 }
 0x105   : > { %4767 = vmatprep.mubr.msk.bf16.mxu1 %vm492_vm2, %v1404_v43  ;;  %v1413_v43 = vrot.slane %v5731_v57, 1 }
 0x106   : > { %v3353_v9 = vsel %vm3350_vm7, %v3351_v42, %v3352_v18  ;;  %v3368_v42 = vrot.slane %v5869_v8, 3  ;;  %v1830_v18 = vshrl.u32 %v5749_v7, 16 }
 0x107   : > { %4932 = vmatmul.mubr.msk.bf16.gmra.mrb[24].mxu0 %vm492_vm2, %v3037_v37  ;;  %v1414_v40 = vsel %vm950_vm5, %v1411_v49, %v1413_v43  ;;  %v1416_v29 = vsel %vm950_vm5, %v1413_v43, %v1415_v32  ;;  %v1419_v37 = vrot.slane %v5753_v12, 1  ;;  %v1833_v43 = vshll.u32 %v5749_v7, 16 }
 0x108   : > { %4935 = vmatprep.mubr.msk.bf16.mxu0 %vm492_vm2, %v3046_v58  ;;  %v3359_v58 = vsel %vm3350_vm7, %v3356_v45, %v3358_v50 }
 0x109   : > { %v1420_v20 = vsel %vm950_vm5, %v1417_v23, %v1419_v37  ;;  %v1422_v28 = vsel %vm950_vm5, %v1419_v37, %v1421_v14  ;;  %v1835_v38 = vrot.slane %v1833_v43, 2  ;;  %v1848_v37 = vshrl.u32 %v5765_v22, 16 }
 0x10b   : > { %v1850_v14 = vrot.slane %v1848_v37, 1 }
 0x10c   : > { %4768 = vmatmul.mubr.msk.bf16.gmra.mrb[12].mxu1 %vm492_vm2, %v1406_v2  ;;  %v1806_v2 = vshll.u32 %v5712_v55, 16  ;;  %v1425_v55 = vrot.slane %v5355_v6, 1  ;;  %v1869_v6 = vshll.u32 %v5785_v59, 16 }
 0x10d   : > { %4771 = vmatprep.mubr.msk.bf16.mxu1 %vm492_vm2, %v1408_v61  ;;  %v3362_v61 = vrot.slane %v5846_v3, 3  ;;  %v1821_v3 = vshrl.u32 %v5737_v60, 16 }
 0x10e   : > { %v1808_v25 = vrot.slane %v1806_v2, 2  ;;  %v1426_v1 = vsel %vm950_vm5, %v1423_v11, %v1425_v55  ;;  %v3374_v11 = vrot.slane %v5902_v16, 3 }
 0x10f   : > { %4936 = vmatmul.mubr.msk.bf16.gmra.mrb[28].mxu0 %vm492_vm2, %v3055_v5  ;;  %v3363_v5 = vsel %vm3350_vm7, %v3360_v0, %v3362_v61  ;;  %v3365_v49 = vsel %vm3350_vm7, %v3362_v61, %v3364_v39  ;;  %v1823_v51 = vrot.slane %v1821_v3, 1  ;;  %v3384_v3 = vrot.slane %v5967_v21, 3 }
 0x110   : > { %4939 = vmatprep.mubr.msk.bf16.mxu0 %vm492_vm2, %v3064_v54  ;;  %v1809_v4 = vor.u32 %v1808_v25, %v1805_v35  ;;  %v1814_v54 = vrot.slane %v1812_v41, 1  ;;  %v3380_v41 = vrot.slane %v5938_v44, 3 }
 0x112   : > { %v1810_v57 = vsel %vm1703_vm3, %v5626_v15, %v1809_v4  ;;  %v1818_v60 = vor.u32 %v1817_v63, %v1814_v54  ;;  %v1842_v15 = vshll.u32 %v5753_v12, 16 }
 0x114   : > { %4772 = vmatmul.mubr.msk.bf16.gmra.mrb[16].mxu1 %vm492_vm2, %v1410_v30  ;;  %v3366_v30 = vrot.slane %v5864_v13, 3  ;;  %v1839_v13 = vshrl.u32 %v5753_v12, 16  ;;  %v1819_v8 = vsel %vm1703_vm3, %v1809_v4, %v1818_v60  ;;  %v1844_v23 = vrot.slane %v1842_v15, 2 }
 0x115   : > { %4775 = vmatprep.mubr.msk.bf16.mxu1 %vm492_vm2, %v1412_v36  ;;  %v1826_v36 = vrot.slane %v1824_v48, 2 }
 0x116   : > { %v1841_v45 = vrot.slane %v1839_v13, 1 }
 0x117   : > { %4940 = vmatmul.mubr.msk.bf16.gmra.mrb[32].mxu0 %vm492_vm2, %v3073_v31  ;;  %v3367_v31 = vsel %vm3350_vm7, %v3364_v39, %v3366_v30  ;;  %v1827_v32 = vor.u32 %v1826_v36, %v1823_v51  ;;  %v3378_v39 = vrot.slane %v5933_v10, 3  ;;  %v3382_v10 = vrot.slane %v5963_v17, 3 }
 0x118   : > { %4945 = vmatprep.mubr.msk.bf16.mxu0 %vm492_vm2, %v3353_v9  ;;  %v3369_v9 = vsel %vm3350_vm7, %v3366_v30, %v3368_v42  ;;  %v1845_v50 = vor.u32 %v1844_v23, %v1841_v45 }
 0x119   : > { %v1828_v7 = vsel %vm1703_vm3, %v1818_v60, %v1827_v32  ;;  %v3383_v44 = vsel %vm3350_vm7, %v3380_v41, %v3382_v10  ;;  %v3385_v48 = vsel %vm3350_vm7, %v3382_v10, %v3384_v3 }
 0x11c   : > { %4776 = vmatmul.mubr.msk.bf16.gmra.mrb[20].mxu1 %vm492_vm2, %v1414_v40  ;;  %v1832_v40 = vrot.slane %v1830_v18, 1 }
 0x11d   : > { %4779 = vmatprep.mubr.msk.bf16.mxu1 %vm492_vm2, %v1416_v29  ;;  %v3370_v29 = vrot.slane %v5882_v47, 3  ;;  %v1857_v47 = vshrl.u32 %v5769_v26, 16 }
 0x11e   : > { %v1836_v12 = vor.u32 %v1835_v38, %v1832_v40 }
 0x11f   : > { %4946 = vmatmul.mubr.msk.bf16.vlgmr.msra.gmra.mrb[0].mxu0 %vm492_vm2, %v3355_v62  ;;  %v3372_v62 = vrot.slane %v5887_v52, 3  ;;  %v1859_v33 = vrot.slane %v1857_v47, 1 }
 0x120   : > { %4949 = vmatprep.mubr.msk.bf16.mxu0 %vm492_vm2, %v3357_v27  ;;  %v1851_v27 = vshll.u32 %v5765_v22, 16  ;;  %v1837_v52 = vsel %vm1703_vm3, %v1827_v32, %v1836_v12  ;;  %v1846_v22 = vsel %vm1703_vm3, %v1836_v12, %v1845_v50 }
 0x121   : > { %v3373_v0 = vsel %vm3350_vm7, %v3370_v29, %v3372_v62  ;;  %v3375_v61 = vsel %vm3350_vm7, %v3372_v62, %v3374_v11 }
 0x124   : > { %4780 = vmatmul.mubr.msk.bf16.gmra.mrb[24].mxu1 %vm492_vm2, %v1418_v46  ;;  %v3371_v46 = vsel %vm3350_vm7, %v3368_v42, %v3370_v29  ;;  %v3707_v42 = vpop.permute.xlu1 %3706 }
 0x125   : > { %4783 = vmatprep.mubr.msk.bf16.mxu1 %vm492_vm2, %v1420_v20  ;;  %v1860_v20 = vshll.u32 %v5769_v26, 16 }
 0x127   : > { %4950 = vmatmul.mubr.msk.bf16.gmra.mrb[4].mxu0 %vm492_vm2, %v3359_v58  ;;  %v1853_v58 = vrot.slane %v1851_v27, 2  ;;  %v1862_v2 = vrot.slane %v1860_v20, 2 }
 0x128   : > { %4953 = vmatprep.mubr.msk.bf16.mxu0 %vm492_vm2, %v3361_v53  ;;  %v3376_v53 = vrot.slane %v5911_v24, 3  ;;  %v1871_v24 = vrot.slane %v1869_v6, 2 }
 0x129   : > { %v1854_v26 = vor.u32 %v1853_v58, %v1850_v14 }
 0x12a   : > { %v3377_v16 = vsel %vm3350_vm7, %v3374_v11, %v3376_v53  ;;  %v3379_v56 = vsel %vm3350_vm7, %v3376_v53, %v3378_v39 }
 0x12b   : > { %v1855_v35 = vsel %vm1703_vm3, %v1845_v50, %v1854_v26 }
 0x12c   : > { %4784 = vmatmul.mubr.msk.bf16.gmra.mrb[28].mxu1 %vm492_vm2, %v1422_v28  ;;  %v1866_v28 = vshrl.u32 %v5785_v59, 16 }
 0x12d   : > { %4787 = vmatprep.mubr.msk.bf16.mxu1 %vm492_vm2, %v1424_v34  ;;  %v1863_v34 = vor.u32 %v1862_v2, %v1859_v33 }
 0x12e   : > { %v1868_v25 = vrot.slane %v1866_v28, 1 }
 0x12f   : > { %4954 = vmatmul.mubr.msk.bf16.gmra.mrb[8].mxu0 %vm492_vm2, %v3363_v5  ;;  %v1864_v55 = vsel %vm1703_vm3, %v1854_v26, %v1863_v34  ;;  %v3381_v5 = vsel %vm3350_vm7, %v3378_v39, %v3380_v41 }
 0x130   : > { %4957 = vmatprep.mubr.msk.bf16.mxu0 %vm492_vm2, %v3365_v49  ;;  %v1872_v59 = vor.u32 %v1871_v24, %v1868_v25  ;;  %v3386_v49 = vrot.slane %v6190_v19, 3  ;;  %v3712_v19 = vpop.permute.xlu1 %3711 }
 0x132   : > { %v1873_v4 = vsel %vm1703_vm3, %v1863_v34, %v1872_v59 }
 0x134   : > { %4788 = vmatmul.mubr.msk.bf16.gmra.mrb[32].mxu1 %vm492_vm2, %v1426_v1  ;;  %v3387_v1 = vsel %vm3350_vm7, %v3384_v3, %v3386_v49 }
 0x135   : > { %4813 = vmatprep.mubr.msk.bf16.mxu1 %vm492_vm2, %v1810_v57  ;;  %v3697_v57 = vpop.permute.xlu0 %3696 }
 0x137   : > { %4958 = vmatmul.mubr.msk.bf16.gmra.mrb[12].mxu0 %vm492_vm2, %v3367_v31 }
 0x138   : > { %4961 = vmatprep.mubr.msk.bf16.mxu0 %vm492_vm2, %v3369_v9  ;;  %v6335_v9 = vpop.permute.xlu1 %3721 }
 0x139   : > { %v3702_v18 = vpop.permute.xlu0 %3701 }
 0x13c   : > { %4814 = vmatmul.mubr.msk.bf16.vlgmr.msra.gmra.mrb[20].mxu1 %vm492_vm2, %v1819_v8  ;;  %v6345_v45 = vpop.permute.xlu1 %3731 }
 0x13d   : > { %4817 = vmatprep.mubr.msk.bf16.mxu1 %vm492_vm2, %v1828_v7  ;;  %v3717_v15 = vpop.permute.xlu0 %3716 }
 0x13f   : > { %4962 = vmatmul.mubr.msk.bf16.gmra.mrb[16].mxu0 %vm492_vm2, %v3371_v46 }
 0x140   : > { %4965 = vmatprep.mubr.msk.bf16.mxu0 %vm492_vm2, %v3373_v0  ;;  %v6355_v27 = vpop.permute.xlu1 %3741 }
 0x141   : > { %v3727_v29 = vpop.permute.xlu0 %3726 }
 0x144   : > { %4818 = vmatmul.mubr.msk.bf16.gmra.mrb[24].mxu1 %vm492_vm2, %v1837_v52  ;;  %v6361_v47 = vpop.permute.xlu1 %3751 }
 0x145   : > { %4821 = vmatprep.mubr.msk.bf16.mxu1 %vm492_vm2, %v1846_v22  ;;  %v6349_v62 = vpop.permute.xlu0 %3736 }
 0x147   : > { %4966 = vmatmul.mubr.msk.bf16.gmra.mrb[20].mxu0 %vm492_vm2, %v3375_v61 }
 0x148   : > { %4969 = vmatprep.mubr.msk.bf16.mxu0 %vm492_vm2, %v3377_v16  ;;  %v6366_v58 = vpop.permute.xlu1 %3761 }
 0x149   : > { %v6359_v50 = vpop.permute.xlu0 %3746 }
 0x14c   : > { %4822 = vmatmul.mubr.msk.bf16.gmra.mrb[28].mxu1 %vm492_vm2, %v1855_v35  ;;  %v6381_v35 = vpop.permute.xlu1 %3771 }
 0x14d   : > { %4825 = vmatprep.mubr.msk.bf16.mxu1 %vm492_vm2, %v1864_v55  ;;  %v6364_v20 = vpop.permute.xlu0 %3756 }
 0x14f   : > { %4970 = vmatmul.mubr.msk.bf16.gmra.mrb[24].mxu0 %vm492_vm2, %v3379_v56 }
 0x150   : > { %4973 = vmatprep.mubr.msk.bf16.mxu0 %vm492_vm2, %v3381_v5 }
 0x151   : > { %v6375_v61 = vpop.permute.xlu0 %3766 }
 0x154   : > { %4826 = vmatmul.mubr.msk.bf16.gmra.mrb[32].mxu1 %vm492_vm2, %v1873_v4 }
 0x157   : > { %4974 = vmatmul.mubr.msk.bf16.gmra.mrb[28].mxu0 %vm492_vm2, %v3383_v44 }
 0x158   : > { %4977 = vmatprep.mubr.msk.bf16.mxu0 %vm492_vm2, %v3385_v48 }
 0x15f   : > { %4978 = vmatmul.mubr.msk.bf16.gmra.mrb[32].mxu0 %vm492_vm2, %v3387_v1 }
 0x1c7   : > { %v4757_v54 = vpop.f32.mrb[0].mxu1 }
 0x1c8   : > { %v1518_v17 = vpop.f32.mrb[1].mxu1 }
 0x1c9   : > { %v4758_v63 = vpop.f32.mrb[2].mxu1 }
 0x1ca   : > { %v1521_v21 = vpop.f32.mrb[3].mxu1 }
 0x1cf   : > { %v4761_v30 = vpop.f32.mrb[4].mxu1 }
 0x1d0   : > { %v1534_v51 = vpop.f32.mrb[5].mxu1 }
 0x1d1   : > { %v6323_v36 = vpop.f32.mrb[6].mxu1 }
 0x1d2   : > { %v6325_v60 = vpop.f32.mrb[7].mxu1 }
 0x1d7   : > { %v6327_v43 = vpop.f32.mrb[8].mxu1 }
 0x1d8   : > { %v6329_v31 = vpop.f32.mrb[9].mxu1 }
 0x1d9   : > { %v6331_v32 = vpop.f32.mrb[10].mxu1 }
 0x1da   : > { %v6333_v13 = vpop.f32.mrb[11].mxu1 }
 0x1df   : > { %v6337_v8 = vpop.f32.mrb[12].mxu1 }
 0x1e0   : > { %v6339_v40 = vpop.f32.mrb[13].mxu1 }
 0x1e1   : > { %v6341_v38 = vpop.f32.mrb[14].mxu1 }
 0x1e2   : > { %v6343_v7 = vpop.f32.mrb[15].mxu1 }
 0x1e7   : > { %v6347_v23 = vpop.f32.mrb[16].mxu1 }
 0x1e8   : > { %v6351_v12 = vpop.f32.mrb[17].mxu1 }
 0x1e9   : > { %v6353_v37 = vpop.f32.mrb[18].mxu1 }
 0x1ea   : > { %v6357_v46 = vpop.f32.mrb[19].mxu1 }
 0x1f2   : > { %v4947_v0 = vpop.f32.mrb[0].mxu0 }
 0x1f3   : > { %v4983_v52 = vadd.f32 %v4947_v0, %v4757_v54  ;;  %v3479_v14 = vpop.f32.mrb[1].mxu0 }
 0x1f4   : > { %v4984_v11 = vadd.f32 %v3479_v14, %v1518_v17  ;;  %v4948_v22 = vpop.f32.mrb[2].mxu0 }
 0x1f5   : > { %v3876_v33 = vmul.f32 %v4983_v52, %v3707_v42  ;;  %v4985_v2 = vadd.f32 %v4948_v22, %v4758_v63  ;;  %v3482_v53 = vpop.f32.mrb[3].mxu0  ;;  %v6399_v52 = vpop.permute.xlu1 %3781 }
 0x1f6   : > { %v3874_v26 = vmul.f32 %v4984_v11, %v3697_v57  ;;  %v4986_v28 = vadd.f32 %v3482_v53, %v1521_v21  ;;  %v6391_v57 = vpop.permute.xlu0 %3776 }
 0x1f7   : > { %3912 = vst.msk [vmem:[%s6371_s22 + $0x10] sm:$0xff] %vm492_vm2, %v3876_v33  ;;  %v3877_v6 = vmul.f32 %v4985_v2, %v3712_v19  ;;  %v4025_v25 = vmul.f32 %v3876_v33, %v3876_v33  ;;  %v3949_v10 = vsel %vm492_vm2, %v3876_v33, 0.0 }
 0x1f8   : > { %3910 = vst.msk [vmem:[%s6371_s22] sm:$0xff] %vm492_vm2, %v3874_v26  ;;  %v4023_v34 = vmul.f32 %v3874_v26, %v3874_v26  ;;  %v3875_v16 = vmul.f32 %v4986_v28, %v3702_v18  ;;  %v3946_v24 = vsel %vm492_vm2, %v3874_v26, 0.0 }
 0x1f9   : > { %3913 = vst.msk [vmem:[%s6371_s22 + $0x18] sm:$0xff] %vm492_vm2, %v3877_v6  ;;  %v4026_v59 = vmul.f32 %v3877_v6, %v3877_v6  ;;  %v3951_v42 = vsel %vm492_vm2, %v3877_v6, 0.0 }
 0x1fa   : > { %3911 = vst.msk [vmem:[%s6371_s22 + $0x8] sm:$0xff] %vm492_vm2, %v3875_v16  ;;  %v3947_v39 = vsel %vm492_vm2, %v3875_v16, 0.0  ;;  %v4024_v55 = vmul.f32 %v3875_v16, %v3875_v16  ;;  %v4951_v41 = vpop.f32.mrb[4].mxu0  ;;  %v4059_v3 = vsel %vm492_vm2, %v4023_v34, 0.0 }
 0x1fb   : > { %v3948_v56 = vadd.f32 %v3947_v39, %v3946_v24  ;;  %v4987_v5 = vadd.f32 %v4951_v41, %v4761_v30  ;;  %v3495_v4 = vpop.f32.mrb[5].mxu0  ;;  %v4062_v30 = vsel %vm492_vm2, %v4025_v25, 0.0  ;;  %v6413_v25 = vpop.permute.xlu0 %3786 }
 0x1fc   : > { %v4060_v44 = vsel %vm492_vm2, %v4024_v55, 0.0  ;;  %v4988_v48 = vadd.f32 %v3495_v4, %v1534_v51  ;;  %v4952_v49 = vpop.f32.mrb[6].mxu0  ;;  %v4064_v51 = vsel %vm492_vm2, %v4026_v59, 0.0 }
 0x1fd   : > { %v3950_v1 = vadd.f32 %v3949_v10, %v3948_v56  ;;  %v4061_v54 = vadd.f32 %v4060_v44, %v4059_v3  ;;  %v3880_v17 = vmul.f32 %v4987_v5, %v3727_v29  ;;  %v4989_v63 = vadd.f32 %v4952_v49, %v6323_v36  ;;  %v3498_v21 = vpop.f32.mrb[7].mxu0 }
 0x1fe   : > { %v3878_v18 = vmul.f32 %v4988_v48, %v3717_v15  ;;  %v4990_v19 = vadd.f32 %v3498_v21, %v6325_v60 }
 0x1ff   : > { %v4063_v0 = vadd.f32 %v4062_v30, %v4061_v54  ;;  %3916 = vst.msk [vmem:[%s6371_s22 + $0x30] sm:$0xff] %vm492_vm2, %v3880_v17  ;;  %v3952_v29 = vadd.f32 %v3951_v42, %v3950_v1  ;;  %v3881_v11 = vmul.f32 %v4989_v63, %v6345_v45  ;;  %v4029_v33 = vmul.f32 %v3880_v17, %v3880_v17 }
 0x200   : > { %3914 = vst.msk [vmem:[%s6371_s22 + $0x20] sm:$0xff] %vm492_vm2, %v3878_v18  ;;  %v3953_v36 = vsel %vm492_vm2, %v3878_v18, 0.0  ;;  %v4027_v14 = vmul.f32 %v3878_v18, %v3878_v18  ;;  %v3879_v15 = vmul.f32 %v4990_v19, %v6335_v9  ;;  %v3957_v9 = vsel %vm492_vm2, %v3880_v17, 0.0 }
 0x201   : > { %v3954_v22 = vadd.f32 %v3953_v36, %v3952_v29  ;;  %v4065_v60 = vadd.f32 %v4064_v51, %v4063_v0  ;;  %3917 = vst.msk [vmem:[%s6371_s22 + $0x38] sm:$0xff] %vm492_vm2, %v3881_v11  ;;  %v4030_v24 = vmul.f32 %v3881_v11, %v3881_v11  ;;  %v3959_v10 = vsel %vm492_vm2, %v3881_v11, 0.0 }
 0x202   : > { %v4066_v2 = vsel %vm492_vm2, %v4027_v14, 0.0  ;;  %3915 = vst.msk [vmem:[%s6371_s22 + $0x28] sm:$0xff] %vm492_vm2, %v3879_v15  ;;  %v3955_v53 = vsel %vm492_vm2, %v3879_v15, 0.0  ;;  %v4955_v26 = vpop.f32.mrb[8].mxu0  ;;  %v4028_v34 = vmul.f32 %v3879_v15, %v3879_v15  ;;  %v4070_v48 = vsel %vm492_vm2, %v4029_v33, 0.0 }
 0x203   : > { %v4067_v28 = vadd.f32 %v4066_v2, %v4065_v60  ;;  %v3956_v6 = vadd.f32 %v3955_v53, %v3954_v22  ;;  %v4991_v16 = vadd.f32 %v4955_v26, %v6327_v43  ;;  %v3511_v45 = vpop.f32.mrb[9].mxu0  ;;  %v6420_v43 = vpop.permute.xlu1 %3791 }
 0x204   : > { %v4992_v39 = vadd.f32 %v3511_v45, %v6329_v31  ;;  %v4956_v55 = vpop.f32.mrb[10].mxu0  ;;  %v4068_v59 = vsel %vm492_vm2, %v4028_v34, 0.0 }
 0x205   : > { %v3958_v41 = vadd.f32 %v3957_v9, %v3956_v6  ;;  %v3884_v56 = vmul.f32 %v4991_v16, %v6359_v50  ;;  %v4993_v5 = vadd.f32 %v4956_v55, %v6331_v32  ;;  %v3514_v4 = vpop.f32.mrb[11].mxu0  ;;  %v4069_v3 = vadd.f32 %v4068_v59, %v4067_v28 }
 0x206   : > { %v3882_v44 = vmul.f32 %v4992_v39, %v6349_v62  ;;  %v4994_v31 = vadd.f32 %v3514_v4, %v6333_v13  ;;  %v4072_v62 = vsel %vm492_vm2, %v4030_v24, 0.0  ;;  %v6436_v13 = vpop.permute.xlu0 %3796 }
 0x207   : > { %3920 = vst.msk [vmem:[%s6371_s22 + $0x50] sm:$0xff] %vm492_vm2, %v3884_v56  ;;  %v3960_v49 = vadd.f32 %v3959_v10, %v3958_v41  ;;  %v3885_v50 = vmul.f32 %v4993_v5, %v6361_v47  ;;  %v4071_v32 = vadd.f32 %v4070_v48, %v4069_v3  ;;  %v4033_v19 = vmul.f32 %v3884_v56, %v3884_v56  ;;  %v6443_v29 = vpop.permute.xlu1 %3801 }
 0x208   : > { %3918 = vst.msk [vmem:[%s6371_s22 + $0x40] sm:$0xff] %vm492_vm2, %v3882_v44  ;;  %v3961_v1 = vsel %vm492_vm2, %v3882_v44, 0.0  ;;  %v4031_v54 = vmul.f32 %v3882_v44, %v3882_v44  ;;  %v3883_v17 = vmul.f32 %v4994_v31, %v6355_v27  ;;  %v3965_v36 = vsel %vm492_vm2, %v3884_v56, 0.0 }
 0x209   : > { %v3962_v63 = vadd.f32 %v3961_v1, %v3960_v49  ;;  %3921 = vst.msk [vmem:[%s6371_s22 + $0x58] sm:$0xff] %vm492_vm2, %v3885_v50  ;;  %v4073_v21 = vadd.f32 %v4072_v62, %v4071_v32  ;;  %v4034_v60 = vmul.f32 %v3885_v50, %v3885_v50  ;;  %v3967_v28 = vsel %vm492_vm2, %v3885_v50, 0.0 }
 0x20a   : > { %v4074_v30 = vsel %vm492_vm2, %v4031_v54, 0.0  ;;  %3919 = vst.msk [vmem:[%s6371_s22 + $0x48] sm:$0xff] %vm492_vm2, %v3883_v17  ;;  %v3963_v47 = vsel %vm492_vm2, %v3883_v17, 0.0  ;;  %v4032_v42 = vmul.f32 %v3883_v17, %v3883_v17  ;;  %v4959_v18 = vpop.f32.mrb[12].mxu0  ;;  %v4078_v45 = vsel %vm492_vm2, %v4033_v19, 0.0  ;;  %v6463_v24 = vpop.permute.xlu0 %3806 }
 0x20b   : > { %v3964_v51 = vadd.f32 %v3963_v47, %v3962_v63  ;;  %v4995_v27 = vadd.f32 %v4959_v18, %v6337_v8  ;;  %v3527_v0 = vpop.f32.mrb[13].mxu0  ;;  %v4075_v14 = vadd.f32 %v4074_v30, %v4073_v21  ;;  %v4080_v59 = vsel %vm492_vm2, %v4034_v60, 0.0 }
 0x20c   : > { %v4076_v11 = vsel %vm492_vm2, %v4032_v42, 0.0  ;;  %v4996_v15 = vadd.f32 %v3527_v0, %v6339_v40  ;;  %v4960_v22 = vpop.f32.mrb[14].mxu0 }
 0x20d   : > { %v3966_v33 = vadd.f32 %v3965_v36, %v3964_v51  ;;  %v3888_v2 = vmul.f32 %v4995_v27, %v6375_v61  ;;  %v4997_v53 = vadd.f32 %v4960_v22, %v6341_v38  ;;  %v3530_v8 = vpop.f32.mrb[15].mxu0  ;;  %v4077_v6 = vadd.f32 %v4076_v11, %v4075_v14 }
 0x20e   : > { %v3886_v34 = vmul.f32 %v4996_v15, %v6364_v20  ;;  %v4998_v16 = vadd.f32 %v3530_v8, %v6343_v7 }
 0x20f   : > { %v6450_v26 = vpop.f32.mrb[20].mxu1  ;;  %3924 = vst.msk [vmem:[%s6371_s22 + $0x70] sm:$0xff] %vm492_vm2, %v3888_v2  ;;  %v3968_v61 = vadd.f32 %v3967_v28, %v3966_v33  ;;  %v3889_v38 = vmul.f32 %v4997_v53, %v6381_v35  ;;  %v4079_v39 = vadd.f32 %v4078_v45, %v4077_v6  ;;  %v6474_v35 = vpop.permute.xlu1 %3811  ;;  %v4037_v31 = vmul.f32 %v3888_v2, %v3888_v2 }
 0x210   : > { %v6455_v40 = vpop.f32.mrb[21].mxu1  ;;  %3922 = vst.msk [vmem:[%s6371_s22 + $0x60] sm:$0xff] %vm492_vm2, %v3886_v34  ;;  %v3969_v7 = vsel %vm492_vm2, %v3886_v34, 0.0  ;;  %v4035_v20 = vmul.f32 %v3886_v34, %v3886_v34  ;;  %v3887_v55 = vmul.f32 %v4998_v16, %v6366_v58  ;;  %v3973_v50 = vsel %vm492_vm2, %v3888_v2, 0.0 }
 0x211   : > { %v6461_v9 = vpop.f32.mrb[22].mxu1  ;;  %v3970_v56 = vadd.f32 %v3969_v7, %v3968_v61  ;;  %3925 = vst.msk [vmem:[%s6371_s22 + $0x78] sm:$0xff] %vm492_vm2, %v3889_v38  ;;  %v4081_v5 = vadd.f32 %v4080_v59, %v4079_v39  ;;  %v4038_v62 = vmul.f32 %v3889_v38, %v3889_v38  ;;  %v3975_v18 = vsel %vm492_vm2, %v3889_v38, 0.0 }
 0x212   : > { %v6469_v41 = vpop.f32.mrb[23].mxu1  ;;  %v4082_v4 = vsel %vm492_vm2, %v4035_v20, 0.0  ;;  %3923 = vst.msk [vmem:[%s6371_s22 + $0x68] sm:$0xff] %vm492_vm2, %v3887_v55  ;;  %v3971_v10 = vsel %vm492_vm2, %v3887_v55, 0.0  ;;  %v4036_v3 = vmul.f32 %v3887_v55, %v3887_v55  ;;  %v4963_v44 = vpop.f32.mrb[16].mxu0 }
 0x213   : > { %v3972_v58 = vadd.f32 %v3971_v10, %v3970_v56  ;;  %v4999_v48 = vadd.f32 %v4963_v44, %v6347_v23  ;;  %v3543_v49 = vpop.f32.mrb[17].mxu0  ;;  %v4083_v32 = vadd.f32 %v4082_v4, %v4081_v5  ;;  %v6488_v23 = vpop.permute.xlu0 %3816  ;;  %v4088_v60 = vsel %vm492_vm2, %v4038_v62, 0.0 }
 0x214   : > { %v4084_v1 = vsel %vm492_vm2, %v4036_v3, 0.0  ;;  %v5000_v54 = vadd.f32 %v3543_v49, %v6351_v12  ;;  %v4964_v17 = vpop.f32.mrb[18].mxu0  ;;  %v6501_v14 = vpop.permute.xlu1 %3821 }
 0x215   : > { %v3974_v63 = vadd.f32 %v3973_v50, %v3972_v58  ;;  %v3892_v21 = vmul.f32 %v4999_v48, %v6413_v25  ;;  %v5001_v30 = vadd.f32 %v4964_v17, %v6353_v37  ;;  %v3546_v47 = vpop.f32.mrb[19].mxu0  ;;  %v4085_v19 = vadd.f32 %v4084_v1, %v4083_v32 }
 0x216   : > { %v3890_v51 = vmul.f32 %v5000_v54, %v6391_v57  ;;  %v5002_v12 = vadd.f32 %v3546_v47, %v6357_v46  ;;  %v4086_v25 = vsel %vm492_vm2, %v4037_v31, 0.0 }
 0x217   : > { %v6486_v42 = vpop.f32.mrb[24].mxu1  ;;  %3928 = vst.msk [vmem:[%s6371_s22 + $0x90] sm:$0xff] %vm492_vm2, %v3892_v21  ;;  %v3976_v37 = vadd.f32 %v3975_v18, %v3974_v63  ;;  %v3893_v0 = vmul.f32 %v5001_v30, %v6420_v43  ;;  %v4087_v11 = vadd.f32 %v4086_v25, %v4085_v19  ;;  %v4041_v6 = vmul.f32 %v3892_v21, %v3892_v21  ;;  %v3827_v45 = vpop.permute.xlu0 %3826 }
 0x218   : > { %v6493_v27 = vpop.f32.mrb[25].mxu1  ;;  %3926 = vst.msk [vmem:[%s6371_s22 + $0x80] sm:$0xff] %vm492_vm2, %v3890_v51  ;;  %v3977_v46 = vsel %vm492_vm2, %v3890_v51, 0.0  ;;  %v4039_v57 = vmul.f32 %v3890_v51, %v3890_v51  ;;  %v3891_v15 = vmul.f32 %v5002_v12, %v6399_v52  ;;  %v3981_v61 = vsel %vm492_vm2, %v3892_v21, 0.0  ;;  %v3832_v10 = vpop.permute.xlu1 %3831 }
 0x219   : > { %v6499_v36 = vpop.f32.mrb[26].mxu1  ;;  %v3978_v33 = vadd.f32 %v3977_v46, %v3976_v37  ;;  %3929 = vst.msk [vmem:[%s6371_s22 + $0x98] sm:$0xff] %vm492_vm2, %v3893_v0  ;;  %v4089_v43 = vadd.f32 %v4088_v60, %v4087_v11  ;;  %v4042_v55 = vmul.f32 %v3893_v0, %v3893_v0  ;;  %v3983_v3 = vsel %vm492_vm2, %v3893_v0, 0.0 }
 0x21a   : > { %v6507_v22 = vpop.f32.mrb[27].mxu1  ;;  %v4090_v2 = vsel %vm492_vm2, %v4039_v57, 0.0  ;;  %3927 = vst.msk [vmem:[%s6371_s22 + $0x88] sm:$0xff] %vm492_vm2, %v3891_v15  ;;  %v3979_v53 = vsel %vm492_vm2, %v3891_v15, 0.0  ;;  %v4040_v8 = vmul.f32 %v3891_v15, %v3891_v15  ;;  %v4967_v28 = vpop.f32.mrb[20].mxu0  ;;  %v4094_v48 = vsel %vm492_vm2, %v4041_v6, 0.0 }
 0x21b   : > { %v3980_v34 = vadd.f32 %v3979_v53, %v3978_v33  ;;  %v5003_v52 = vadd.f32 %v4967_v28, %v6450_v26  ;;  %v3559_v16 = vpop.f32.mrb[21].mxu0  ;;  %v4091_v38 = vadd.f32 %v4090_v2, %v4089_v43  ;;  %v4096_v54 = vsel %vm492_vm2, %v4042_v55, 0.0  ;;  %v6544_v62 = vpop.permute.xlu0 %3836 }
 0x21c   : > { %v4092_v39 = vsel %vm492_vm2, %v4040_v8, 0.0  ;;  %v5004_v7 = vadd.f32 %v3559_v16, %v6455_v40  ;;  %v4968_v20 = vpop.f32.mrb[22].mxu0  ;;  %v6551_v12 = vpop.permute.xlu1 %3841 }
 0x21d   : > { %v3982_v59 = vadd.f32 %v3981_v61, %v3980_v34  ;;  %v3896_v56 = vmul.f32 %v5003_v52, %v6463_v24  ;;  %v5005_v5 = vadd.f32 %v4968_v20, %v6461_v9  ;;  %v3562_v4 = vpop.f32.mrb[23].mxu0  ;;  %v4093_v44 = vadd.f32 %v4092_v39, %v4091_v38 }
 0x21e   : > { %v3894_v31 = vmul.f32 %v5004_v7, %v6436_v13  ;;  %v5006_v40 = vadd.f32 %v3562_v4, %v6469_v41 }
 0x21f   : > { %v6522_v26 = vpop.f32.mrb[28].mxu1  ;;  %3932 = vst.msk [vmem:[%s6371_s22 + $0xb0] sm:$0xff] %vm492_vm2, %v3896_v56  ;;  %v3984_v9 = vadd.f32 %v3983_v3, %v3982_v59  ;;  %v3897_v24 = vmul.f32 %v5005_v5, %v6474_v35  ;;  %v4095_v50 = vadd.f32 %v4094_v48, %v4093_v44  ;;  %v4045_v18 = vmul.f32 %v3896_v56, %v3896_v56  ;;  %v3847_v16 = vpop.permute.xlu0 %3846 }
 0x220   : > { %v6527_v58 = vpop.f32.mrb[29].mxu1  ;;  %3930 = vst.msk [vmem:[%s6371_s22 + $0xa0] sm:$0xff] %vm492_vm2, %v3894_v31  ;;  %v3985_v13 = vsel %vm492_vm2, %v3894_v31, 0.0  ;;  %v4043_v32 = vmul.f32 %v3894_v31, %v3894_v31  ;;  %v3895_v41 = vmul.f32 %v5006_v40, %v6443_v29  ;;  %v3989_v25 = vsel %vm492_vm2, %v3896_v56, 0.0  ;;  %v3852_v20 = vpop.permute.xlu1 %3851 }
 0x221   : > { %v6533_v49 = vpop.f32.mrb[30].mxu1  ;;  %v3986_v17 = vadd.f32 %v3985_v13, %v3984_v9  ;;  %3933 = vst.msk [vmem:[%s6371_s22 + $0xb8] sm:$0xff] %vm492_vm2, %v3897_v24  ;;  %v4097_v35 = vadd.f32 %v4096_v54, %v4095_v50  ;;  %v4046_v57 = vmul.f32 %v3897_v24, %v3897_v24  ;;  %v3991_v2 = vsel %vm492_vm2, %v3897_v24, 0.0 }
 0x222   : > { %v6539_v1 = vpop.f32.mrb[31].mxu1  ;;  %v4098_v63 = vsel %vm492_vm2, %v4043_v32, 0.0  ;;  %3931 = vst.msk [vmem:[%s6371_s22 + $0xa8] sm:$0xff] %vm492_vm2, %v3895_v41  ;;  %v3987_v21 = vsel %vm492_vm2, %v3895_v41, 0.0  ;;  %v4044_v30 = vmul.f32 %v3895_v41, %v3895_v41  ;;  %v4971_v47 = vpop.f32.mrb[24].mxu0 }
 0x223   : > { %v3988_v29 = vadd.f32 %v3987_v21, %v3986_v17  ;;  %v5007_v19 = vadd.f32 %v4971_v47, %v6486_v42  ;;  %v3575_v51 = vpop.f32.mrb[25].mxu0  ;;  %v4099_v37 = vadd.f32 %v4098_v63, %v4097_v35  ;;  %v4104_v39 = vsel %vm492_vm2, %v4046_v57, 0.0  ;;  %v3857_v17 = vpop.permute.xlu0 %3856 }
 0x224   : > { %v4100_v0 = vsel %vm492_vm2, %v4044_v30, 0.0  ;;  %v5008_v11 = vadd.f32 %v3575_v51, %v6493_v27  ;;  %v4972_v46 = vpop.f32.mrb[26].mxu0  ;;  %v4102_v27 = vsel %vm492_vm2, %v4045_v18, 0.0  ;;  %v3862_v18 = vpop.permute.xlu1 %3861 }
 0x225   : > { %v3990_v15 = vadd.f32 %v3989_v25, %v3988_v29  ;;  %v3900_v60 = vmul.f32 %v5007_v19, %v3827_v45  ;;  %v5009_v33 = vadd.f32 %v4972_v46, %v6499_v36  ;;  %v3578_v43 = vpop.f32.mrb[27].mxu0  ;;  %v4101_v53 = vadd.f32 %v4100_v0, %v4099_v37 }
 0x226   : > { %v3898_v8 = vmul.f32 %v5008_v11, %v6488_v23  ;;  %v5010_v28 = vadd.f32 %v3578_v43, %v6507_v22 }
 0x227   : > { %v6557_v42 = vpop.f32.mrb[32].mxu1  ;;  %3936 = vst.msk [vmem:[%s6371_s22 + $0xd0] sm:$0xff] %vm492_vm2, %v3900_v60  ;;  %v3992_v34 = vadd.f32 %v3991_v2, %v3990_v15  ;;  %v3901_v36 = vmul.f32 %v5009_v33, %v3832_v10  ;;  %v4103_v45 = vadd.f32 %v4102_v27, %v4101_v53  ;;  %v4049_v10 = vmul.f32 %v3900_v60, %v3900_v60 }
 0x228   : > { %v6562_v6 = vpop.f32.mrb[33].mxu1  ;;  %3934 = vst.msk [vmem:[%s6371_s22 + $0xc0] sm:$0xff] %vm492_vm2, %v3898_v8  ;;  %v3993_v23 = vsel %vm492_vm2, %v3898_v8, 0.0  ;;  %v4047_v61 = vmul.f32 %v3898_v8, %v3898_v8  ;;  %v3899_v22 = vmul.f32 %v5010_v28, %v6501_v14  ;;  %v3997_v31 = vsel %vm492_vm2, %v3900_v60, 0.0 }
 0x229   : > { %v6567_v52 = vpop.f32.mrb[34].mxu1  ;;  %v3994_v7 = vadd.f32 %v3993_v23, %v3992_v34  ;;  %3937 = vst.msk [vmem:[%s6371_s22 + $0xd8] sm:$0xff] %vm492_vm2, %v3901_v36  ;;  %v4105_v55 = vadd.f32 %v4104_v39, %v4103_v45  ;;  %v4050_v50 = vmul.f32 %v3901_v36, %v3901_v36  ;;  %v3872_v23 = vpop.permute.xlu1 %3871 }
 0x22a   : > { %v6573_v38 = vpop.f32.mrb[35].mxu1  ;;  %v4106_v59 = vsel %vm492_vm2, %v4047_v61, 0.0  ;;  %3935 = vst.msk [vmem:[%s6371_s22 + $0xc8] sm:$0xff] %vm492_vm2, %v3899_v22  ;;  %v3995_v56 = vsel %vm492_vm2, %v3899_v22, 0.0  ;;  %v4048_v5 = vmul.f32 %v3899_v22, %v3899_v22  ;;  %v4975_v4 = vpop.f32.mrb[28].mxu0 }
 0x22b   : > { %v3996_v3 = vadd.f32 %v3995_v56, %v3994_v7  ;;  %v5011_v14 = vadd.f32 %v4975_v4, %v6522_v26  ;;  %v3591_v44 = vpop.f32.mrb[29].mxu0  ;;  %v4107_v40 = vadd.f32 %v4106_v59, %v4105_v55  ;;  %v3999_v26 = vsel %vm492_vm2, %v3901_v36, 0.0 }
 0x22c   : > { %v4108_v48 = vsel %vm492_vm2, %v4048_v5, 0.0  ;;  %v5012_v9 = vadd.f32 %v3591_v44, %v6527_v58  ;;  %v4976_v24 = vpop.f32.mrb[30].mxu0  ;;  %v4110_v58 = vsel %vm492_vm2, %v4049_v10, 0.0 }
 0x22d   : > { %v3998_v13 = vadd.f32 %v3997_v31, %v3996_v3  ;;  %v3904_v32 = vmul.f32 %v5011_v14, %v3847_v16  ;;  %v5013_v41 = vadd.f32 %v4976_v24, %v6533_v49  ;;  %v3594_v54 = vpop.f32.mrb[31].mxu0  ;;  %v4109_v35 = vadd.f32 %v4108_v48, %v4107_v40 }
 0x22e   : > { %v3902_v63 = vmul.f32 %v5012_v9, %v6544_v62  ;;  %v5014_v21 = vadd.f32 %v3594_v54, %v6539_v1  ;;  %v4112_v62 = vsel %vm492_vm2, %v4050_v50, 0.0 }
 0x22f   : > { %3940 = vst.msk [vmem:[%s6371_s22 + $0xf0] sm:$0xff] %vm492_vm2, %v3904_v32  ;;  %v4000_v30 = vadd.f32 %v3999_v26, %v3998_v13  ;;  %v3905_v47 = vmul.f32 %v5013_v41, %v3852_v20  ;;  %v4111_v29 = vadd.f32 %v4110_v58, %v4109_v35  ;;  %v4053_v57 = vmul.f32 %v3904_v32, %v3904_v32 }
 0x230   : > { %3938 = vst.msk [vmem:[%s6371_s22 + $0xe0] sm:$0xff] %vm492_vm2, %v3902_v63  ;;  %v4001_v49 = vsel %vm492_vm2, %v3902_v63, 0.0  ;;  %v4051_v19 = vmul.f32 %v3902_v63, %v3902_v63  ;;  %v3903_v51 = vmul.f32 %v5014_v21, %v6551_v12  ;;  %v3867_v12 = vpop.permute.xlu0 %3866  ;;  %v4005_v43 = vsel %vm492_vm2, %v3904_v32, 0.0 }
 0x231   : > { %v4002_v25 = vadd.f32 %v4001_v49, %v4000_v30  ;;  %3941 = vst.msk [vmem:[%s6371_s22 + $0xf8] sm:$0xff] %vm492_vm2, %v3905_v47  ;;  %v4113_v1 = vadd.f32 %v4112_v62, %v4111_v29  ;;  %v4054_v27 = vmul.f32 %v3905_v47, %v3905_v47  ;;  %v4118_v7 = vsel %vm492_vm2, %v4053_v57, 0.0 }
 0x232   : > { %v4114_v37 = vsel %vm492_vm2, %v4051_v19, 0.0  ;;  %3939 = vst.msk [vmem:[%s6371_s22 + $0xe8] sm:$0xff] %vm492_vm2, %v3903_v51  ;;  %v4003_v0 = vsel %vm492_vm2, %v3903_v51, 0.0  ;;  %v4052_v11 = vmul.f32 %v3903_v51, %v3903_v51  ;;  %v4979_v46 = vpop.f32.mrb[32].mxu0 }
 0x233   : > { %v4004_v15 = vadd.f32 %v4003_v0, %v4002_v25  ;;  %v5015_v60 = vadd.f32 %v4979_v46, %v6557_v42  ;;  %v3607_v33 = vpop.f32.mrb[33].mxu0  ;;  %v4115_v2 = vadd.f32 %v4114_v37, %v4113_v1  ;;  %v4007_v42 = vsel %vm492_vm2, %v3905_v47, 0.0 }
 0x234   : > { %v4116_v53 = vsel %vm492_vm2, %v4052_v11, 0.0  ;;  %v5016_v8 = vadd.f32 %v3607_v33, %v6562_v6  ;;  %v4980_v28 = vpop.f32.mrb[34].mxu0  ;;  %v4120_v5 = vsel %vm492_vm2, %v4054_v27, 0.0 }
 0x235   : > { %v4006_v34 = vadd.f32 %v4005_v43, %v4004_v15  ;;  %v3908_v36 = vmul.f32 %v5015_v60, %v3867_v12  ;;  %v5017_v16 = vadd.f32 %v4980_v28, %v6567_v52  ;;  %v3610_v45 = vpop.f32.mrb[35].mxu0  ;;  %v4117_v61 = vadd.f32 %v4116_v53, %v4115_v2 }
 0x236   : > { %v3906_v22 = vmul.f32 %v5016_v8, %v3857_v17  ;;  %v5018_v39 = vadd.f32 %v3610_v45, %v6573_v38 }
 0x237   : > { %3944 = vst.msk [vmem:[%s6371_s22 + $0x110] sm:$0xff] %vm492_vm2, %v3908_v36  ;;  %v4008_v6 = vadd.f32 %v4007_v42, %v4006_v34  ;;  %v3909_v20 = vmul.f32 %v5017_v16, %v3872_v23  ;;  %v4119_v55 = vadd.f32 %v4118_v7, %v4117_v61  ;;  %v4057_v44 = vmul.f32 %v3908_v36, %v3908_v36 }
 0x238   : > { %3942 = vst.msk [vmem:[%s6371_s22 + $0x100] sm:$0xff] %vm492_vm2, %v3906_v22  ;;  %v4009_v52 = vsel %vm492_vm2, %v3906_v22, 0.0  ;;  %v4055_v59 = vmul.f32 %v3906_v22, %v3906_v22  ;;  %v3907_v56 = vmul.f32 %v5018_v39, %v3862_v18  ;;  %v4013_v40 = vsel %vm492_vm2, %v3908_v36, 0.0 }
 0x239   : > { %v4010_v4 = vadd.f32 %v4009_v52, %v4008_v6  ;;  %3945 = vst.msk [vmem:[%s6371_s22 + $0x118] sm:$0xff] %vm492_vm2, %v3909_v20  ;;  %v4121_v10 = vadd.f32 %v4120_v5, %v4119_v55  ;;  %v4058_v24 = vmul.f32 %v3909_v20, %v3909_v20  ;;  %v4015_v13 = vsel %vm492_vm2, %v3909_v20, 0.0 }
 0x23a   : > { %v4122_v38 = vsel %vm492_vm2, %v4055_v59, 0.0  ;;  %3943 = vst.msk [vmem:[%s6371_s22 + $0x108] sm:$0xff] %vm492_vm2, %v3907_v56  ;;  %v4011_v3 = vsel %vm492_vm2, %v3907_v56, 0.0  ;;  %v4056_v14 = vmul.f32 %v3907_v56, %v3907_v56  ;;  %v4126_v41 = vsel %vm492_vm2, %v4057_v44, 0.0 }
 0x23b   : > { %v4012_v31 = vadd.f32 %v4011_v3, %v4010_v4  ;;  %v4123_v48 = vadd.f32 %v4122_v38, %v4121_v10  ;;  %v4128_v26 = vsel %vm492_vm2, %v4058_v24, 0.0 }
 0x23c   : > { %v4124_v9 = vsel %vm492_vm2, %v4056_v14, 0.0 }
 0x23d   : > { %v4014_v50 = vadd.f32 %v4013_v40, %v4012_v31  ;;  %v4125_v32 = vadd.f32 %v4124_v9, %v4123_v48 }
 0x23f   : > { %v4016_v54 = vadd.f32 %v4015_v13, %v4014_v50  ;;  %v4127_v17 = vadd.f32 %v4126_v41, %v4125_v32 }
 0x241   : > { %v4017_v35 = vrot.slane %v4016_v54, 4  ;;  %v4129_v63 = vadd.f32 %v4128_v26, %v4127_v17 }
 0x243   : > { %v4018_v21 = vadd.f32 %v4017_v35, %v4016_v54  ;;  %v4130_v58 = vrot.slane %v4129_v63, 4 }
 0x245   : > { %v4019_v30 = vrot.slane %v4018_v21, 2  ;;  %v4131_v47 = vadd.f32 %v4130_v58, %v4129_v63 }
 0x247   : > { %v4020_v18 = vadd.f32 %v4019_v30, %v4018_v21  ;;  %v4132_v29 = vrot.slane %v4131_v47, 2 }
 0x249   : > { %v4021_v49 = vrot.slane %v4020_v18, 1  ;;  %v4133_v19 = vadd.f32 %v4132_v29, %v4131_v47 }
 0x24b   : > { %v4134_v51 = vrot.slane %v4133_v19, 1  ;;  %v4022_v62 = vadd.f32 %v4021_v49, %v4020_v18 }
 0x24d   : > { %v4135_v25 = vadd.f32 %v4134_v51, %v4133_v19 }
 0x24f   : > { %v4137_v1 = vsel %vm4136_vm8, %v4022_v62, %v4135_v25 }
 0x250   : > { %4139 = vst.msk [vmem:[%s208_s26] sm:$0x3] %vm4138_vm9, %v4137_v1 }
 0x251 PF: > { %s15_s15 = sadd.s32 1, %s5373_s15  }
 0x252   : > { %p12_p4 = scmp.ge.s32.totalorder %s15_s15, 4  }
 0x254   :  { %14 = sbr.rel (!%p12_p4) target bundleno = 1 (0x1), region = 82 }

</bundles_post_ra>
